<compile_context>
chip_gen: v7x
topology: tpu7x:2x2x1
jax: 0.10.0
libtpu: 0.0.40
codegen_flags: <defaults>
</compile_context>

<pallas_src>
import functools

import jax
import jax.numpy as jnp
from jax.experimental import pallas as pl
from jax.experimental.pallas import tpu as pltpu

_VMEM_LIMIT = 32 * 1024 * 1024  # explicit scoped-VMEM budget (defaults: 16/32 MiB)


# ----------------------------------------------------------------------------
# Fused per-point MLP chain kernel (optionally with max-pool epilogue)
# ----------------------------------------------------------------------------

def _make_chain_kernel(n_layers, relu_flags, pool):
    def kernel(*refs):
        # refs = (x_ref, w_1, sh_1, ..., w_L, sh_L, o_ref)
        x_ref = refs[0]
        o_ref = refs[-1]
        y = x_ref[...].astype(jnp.bfloat16)               # (TN, Cin) bf16
        for li in range(n_layers):
            w = refs[1 + 2 * li][...]                     # (K, C) bf16, BN scale folded
            sh = refs[2 + 2 * li][...]                    # (1, C) f32 shift / bias
            acc = jnp.dot(y, w, preferred_element_type=jnp.float32)
            acc = acc + sh
            if relu_flags[li]:
                acc = jnp.maximum(acc, 0.0)
            # Hold the activation in bf16 between layers; only the MXU accumulator
            # and the final tile stay f32.
            y = acc.astype(jnp.bfloat16) if li + 1 < n_layers else acc
        if pool:
            # Running max over the reduction (last) grid axis; output block resident.
            tile_max = jnp.max(y, axis=0, keepdims=True)  # (1, Cout) f32

            @pl.when(pl.program_id(2) == 0)
            def _init():
                o_ref[...] = jnp.full(o_ref.shape, -jnp.inf, o_ref.dtype)

            o_ref[...] = jnp.maximum(o_ref[...], tile_max)
        else:
            o_ref[...] = y.astype(o_ref.dtype)
    return kernel


# ----------------------------------------------------------------------------
# Point-axis padding & chain-dependent tile selection
# ----------------------------------------------------------------------------

def _round_up(x, m):
    return ((x + m - 1) // m) * m


def _pad_points(n):
    # Small N: pad to a multiple of 8 sublanes; large N: pad to a multiple of 1024
    # so tiles stay big and per-grid-step overhead (~0.35us) is amortized.
    return _round_up(n, 8) if n <= 1024 else _round_up(n, 1024)


def _choose_tile_n(n_pad, wide):
    # Wide chains (>=512-channel intermediates): 1024-row tiles, sized against the
    # scoped-VMEM budget (raised via vmem_limit_bytes) while keeping M large for the
    # K=64 MXU-underutilized layers.  Light chains: 2048 rows (mem-bound, amortize
    # grid-step overhead).
    cap = 1024 if wide else 2048
    if n_pad <= cap:
        return n_pad
    t = cap
    while n_pad % t:
        t //= 2
    return t


# ----------------------------------------------------------------------------
# Fused chain wrapper
# ----------------------------------------------------------------------------

def fused_pointwise_chain(x, layers, relu_flags, pool, out_dtype=jnp.float32):
    """Apply a chain of (weight, shift) 1x1-conv layers to every point.

    x      : (B, Npad, Cin), bf16 (cast in-kernel if not).
    layers : list of (w, shift).  w is (K, C) bf16 [resident, shared across batch] or
             (B, K, C) bf16 [per-batch, e.g. T-Net folded in]; shift is (1, C) or
             (B, 1, C) f32.  BN scale pre-folded into w's columns.
    pool   : True  -> fused max over points in the epilogue, returns (B, Cout) f32.
             False -> returns (B, Npad, Cout) in out_dtype.
    """
    B, N, cin = x.shape
    widths = [cin] + [int(w.shape[-1]) for w, _ in layers]
    wide = max(widths) >= 512
    tn = _choose_tile_n(N, wide)
    n_steps = N // tn
    cout = layers[-1][0].shape[-1]

    if pool:
        # Split the point axis into a second "parallel" grid axis (partial maxes
        # combined in the wrapper) so both v7x TensorCores get work at small B.
        splits = 2 if (n_steps >= 2 and n_steps % 2 == 0) else 1
        sps = n_steps // splits
        grid = (B, splits, sps)
        in_specs = [pl.BlockSpec((None, tn, cin),
                                 lambda b, s, n, sps=sps: (b, s * sps + n, 0))]
        for w, sh in layers:
            if w.ndim == 3:
                in_specs.append(pl.BlockSpec((None,) + tuple(w.shape[1:]),
                                             lambda b, s, n: (b, 0, 0)))
            else:
                in_specs.append(pl.BlockSpec(tuple(w.shape), lambda b, s, n: (0, 0)))
            if sh.ndim == 3:
                in_specs.append(pl.BlockSpec((None,) + tuple(sh.shape[1:]),
                                             lambda b, s, n: (b, 0, 0)))
            else:
                in_specs.append(pl.BlockSpec(tuple(sh.shape), lambda b, s, n: (0, 0)))
        out_shape = jax.ShapeDtypeStruct((B, splits, 1, cout), jnp.float32)
        out_spec = pl.BlockSpec((None, None, 1, cout), lambda b, s, n: (b, s, 0, 0))
        dims = ("parallel", "parallel", "arbitrary")
    else:
        grid = (B, n_steps)
        in_specs = [pl.BlockSpec((None, tn, cin), lambda b, n: (b, n, 0))]
        for w, sh in layers:
            if w.ndim == 3:
                in_specs.append(pl.BlockSpec((None,) + tuple(w.shape[1:]),
                                             lambda b, n: (b, 0, 0)))
            else:
                in_specs.append(pl.BlockSpec(tuple(w.shape), lambda b, n: (0, 0)))
            if sh.ndim == 3:
                in_specs.append(pl.BlockSpec((None,) + tuple(sh.shape[1:]),
                                             lambda b, n: (b, 0, 0)))
            else:
                in_specs.append(pl.BlockSpec(tuple(sh.shape), lambda b, n: (0, 0)))
        out_shape = jax.ShapeDtypeStruct((B, N, cout), out_dtype)
        out_spec = pl.BlockSpec((None, tn, cout), lambda b, n: (b, n, 0))
        dims = ("parallel", "parallel")

    args = [x]
    for w, sh in layers:
        args.extend((w, sh))

    kernel = _make_chain_kernel(len(layers), tuple(relu_flags), pool)
    out = pl.pallas_call(
        kernel,
        out_shape=out_shape,
        grid=grid,
        in_specs=in_specs,
        out_specs=out_spec,
        compiler_params=pltpu.CompilerParams(
            dimension_semantics=dims, vmem_limit_bytes=_VMEM_LIMIT),
    )(*args)
    if pool:
        return jnp.max(out, axis=1)[:, 0, :]     # combine split partial maxes
    return out


# ----------------------------------------------------------------------------
# Deterministic synthetic parameters (BatchNorm folded, scale folded into W).
# Kernel-facing weights are stored pre-cast to bf16; shifts stay f32.
# ----------------------------------------------------------------------------

_EPS = 1e-5


def _bn_fold(key, cout):
    kg, kb, km, kv = jax.random.split(key, 4)
    gamma = 1.0 + 0.1 * jax.random.normal(kg, (cout,), jnp.float32)
    beta = 0.1 * jax.random.normal(kb, (cout,), jnp.float32)
    mean = 0.1 * jax.random.normal(km, (cout,), jnp.float32)
    var = 1.0 + 0.1 * jnp.abs(jax.random.normal(kv, (cout,), jnp.float32))
    scale = gamma / jnp.sqrt(var + _EPS)
    shift = beta - mean * scale
    return scale, shift


def _conv_bn(key, cin, cout, pad_cin_to=None):
    # Conv1d(cin, cout, 1, bias=False) + BatchNorm1d(cout); BN scale folded into W.
    kw, kbn = jax.random.split(key)
    w = 0.05 * jax.random.normal(kw, (cout, cin), jnp.float32)
    scale, shift = _bn_fold(kbn, cout)
    w_t = w.T * scale[None, :]
    if pad_cin_to is not None and pad_cin_to > cin:
        # Zero rows for unused input channels (lets the input T-Net read full x).
        w_t = jnp.pad(w_t, ((0, pad_cin_to - cin), (0, 0)))
    return (w_t, shift[None, :])


def _as_bf16_w(layer):
    w, sh = layer
    return (w.astype(jnp.bfloat16), sh)


def _linear_bn(key, cin, cout):
    # Linear with bias + BatchNorm1d(cout): BN(xW^T + b) = x(W^T*s) + (s*b + sh)
    kw, kb, kbn = jax.random.split(key, 3)
    w = 0.05 * jax.random.normal(kw, (cout, cin), jnp.float32)
    b = 0.05 * jax.random.normal(kb, (cout,), jnp.float32)
    scale, shift = _bn_fold(kbn, cout)
    return (w.T * scale[None, :], (shift + scale * b)[None, :])


def _linear_plain(key, cin, cout):
    kw, kb = jax.random.split(key)
    w = 0.05 * jax.random.normal(kw, (cout, cin), jnp.float32)
    b = 0.05 * jax.random.normal(kb, (cout,), jnp.float32)
    return (w.T, b[None, :])


def tnet_params(key, input_dim, output_dim, h_dim=1024, in_pad_to=None):
    ks = jax.random.split(key, 6)
    return {
        "c1": _as_bf16_w(_conv_bn(ks[0], input_dim, 64, pad_cin_to=in_pad_to)),
        "c2": _as_bf16_w(_conv_bn(ks[1], 64, 128)),
        "c3": _as_bf16_w(_conv_bn(ks[2], 128, h_dim)),
        "f1": _linear_bn(ks[3], h_dim, 512),     # post-pool FCs run in XLA (f32)
        "f2": _linear_bn(ks[4], 512, 256),
        "f3": _linear_plain(ks[5], 256, output_dim * output_dim),
    }


def base_params(key, point_dimension=3, channels_in=9):
    ks = jax.random.split(key, 7)
    return {
        # Input T-Net consumes the full (B,N,channels_in) tensor; its first conv
        # weight rows beyond the xyz channels are zero (avoids a (B,N,3) HBM slice).
        "tnet_in": tnet_params(ks[0], point_dimension, point_dimension,
                               in_pad_to=channels_in),
        "tnet_feat": tnet_params(ks[1], 64, 64),
        "c1": _conv_bn(ks[2], channels_in, 64),       # f32: input T-Net folded per-batch
        "c2": _as_bf16_w(_conv_bn(ks[3], 64, 64)),
        "c3": _conv_bn(ks[4], 64, 64),                # f32: feature T-Net folded per-batch
        "c4": _as_bf16_w(_conv_bn(ks[5], 64, 128)),
        "c5": _as_bf16_w(_conv_bn(ks[6], 128, 1024)),
    }


def seg_params(key, num_classes, point_dimension=3, channels_in=9):
    ks = jax.random.split(key, 5)

    # Head conv_1: Conv1d(1088, 512, 1) with bias + BN, split over
    # [global feature (1024) | local feature (64)] so the 1088-wide concat never
    # materializes.
    kw, kb, kbn = jax.random.split(ks[1], 3)
    w = 0.05 * jax.random.normal(kw, (512, 1088), jnp.float32)
    b = 0.05 * jax.random.normal(kb, (512,), jnp.float32)
    scale, shift = _bn_fold(kbn, 512)
    w_t = w.T * scale[None, :]                 # (1088, 512), scale folded
    wg = w_t[:1024]                            # global part (1024, 512), used in XLA
    wl = w_t[1024:]                            # local part (64, 512), T-Net folded later
    sh1 = (shift + scale * b)[None, :]         # (1, 512)

    # Head conv_4: Conv1d(128, num_classes, 1) with bias, no BN — lane-pad to 128.
    w4, b4 = _linear_plain(ks[4], 128, num_classes)
    nc_pad = ((num_classes + 127) // 128) * 128
    w4p = jnp.pad(w4, ((0, 0), (0, nc_pad - num_classes))).astype(jnp.bfloat16)
    b4p = jnp.pad(b4, ((0, 0), (0, nc_pad - num_classes)))

    return {
        "base": base_params(ks[0], point_dimension, channels_in),
        "c1": (wl, wg, sh1),
        "c2": _as_bf16_w(_linear_bn(ks[2], 512, 256)),
        "c3": _as_bf16_w(_linear_bn(ks[3], 256, 128)),
        "c4": (w4p, b4p),
    }


# ----------------------------------------------------------------------------
# Forward pass
# ----------------------------------------------------------------------------

def transformation_net(p, x_bnd, out_dim):
    """x_bnd: (B, Npad, d) bf16 -> (B, out_dim, out_dim) f32."""
    B = x_bnd.shape[0]
    # Fused conv chain (d->64->128->h_dim) + fused max over points, one pallas_call.
    g = fused_pointwise_chain(x_bnd, [p["c1"], p["c2"], p["c3"]],
                              [True, True, True], pool=True)           # (B, h_dim) f32
    # Post-pool FC layers run on (B, .) rows — plain XLA (launch overhead dominates).
    w1, b1 = p["f1"]
    w2, b2 = p["f2"]
    w3, b3 = p["f3"]
    g = jnp.maximum(g @ w1 + b1, 0.0)
    g = jnp.maximum(g @ w2 + b2, 0.0)
    g = g @ w3 + b3
    return g.reshape(B, out_dim, out_dim) + jnp.eye(out_dim, dtype=g.dtype)


def base_pointnet(p, x, point_dim):
    """x: (B, Npad, channels_in) bf16.
    Returns (h2 (B,Npad,64) bf16, t_feat (B,64,64) f32, g (B,1024) f32)."""
    B, N, C = x.shape

    # Input T-Net on the full point tensor (c1 weight rows beyond xyz are zero).
    t_in = transformation_net(p["tnet_in"], x, point_dim)              # (B, 3, 3)

    # Fold the 3x3 transform into conv_1's (BN-scaled) weight: per-batch bf16 W.
    w1, sh1 = p["c1"]                                                  # (C, 64) f32
    w1_top = jnp.einsum("bij,jk->bik", t_in, w1[:point_dim])           # (B, 3, 64)
    w1_rest = jnp.broadcast_to(w1[point_dim:][None], (B, C - point_dim, 64))
    w1_eff = jnp.concatenate([w1_top, w1_rest], axis=1).astype(jnp.bfloat16)

    # Fused base conv_1 -> conv_2 (HBM-bound) — bf16 in/out halves the traffic.
    h2 = fused_pointwise_chain(x, [(w1_eff, sh1), p["c2"]],
                               [True, True], pool=False,
                               out_dtype=jnp.bfloat16)                 # (B, N, 64) bf16

    # Feature T-Net.
    t_feat = transformation_net(p["tnet_feat"], h2, 64)                # (B, 64, 64)

    # Fold the 64x64 feature transform into conv_3's weight (local = h2 @ t_feat).
    w3, sh3 = p["c3"]
    w3_eff = jnp.einsum("bij,jk->bik", t_feat, w3).astype(jnp.bfloat16)  # (B, 64, 64)

    # Fused conv_3 -> conv_4 -> conv_5 with the global max-pool in the epilogue,
    # so the (B, N, 1024) activation never hits HBM.
    g = fused_pointwise_chain(h2, [(w3_eff, sh3), p["c4"], p["c5"]],
                              [True, True, True], pool=True)           # (B, 1024) f32
    return h2, t_feat, g


def segmentation_pointnet(params, x, *, point_dim=3, num_classes=4):
    B, N, C = x.shape
    n_pad = _pad_points(N)
    if n_pad != N:
        # Edge-replicate the last point: duplicated rows cannot change any fused
        # max-pool, and padded per-point outputs are sliced off below.
        x = jnp.concatenate(
            [x, jnp.broadcast_to(x[:, -1:, :], (B, n_pad - N, C))], axis=1)
    x = x.astype(jnp.bfloat16)

    h2, t_feat, g = base_pointnet(params["base"], x, point_dim)

    # Segmentation head conv_1 split: per-point part uses (t_feat @ W_local); the
    # global feature enters as a per-batch additive bias — the (B, N, 1088) concat
    # is never materialized.
    wl, wg, sh1 = params["c1"]
    wl_eff = jnp.einsum("bij,jk->bik", t_feat, wl).astype(jnp.bfloat16)  # (B, 64, 512)
    bias1 = (g @ wg + sh1)[:, None, :]                                   # (B, 1, 512) f32

    # Fused head: 64->512->256->128->128(padded classes), one pallas_call, bf16 out.
    h = fused_pointwise_chain(h2,
                              [(wl_eff, bias1), params["c2"], params["c3"], params["c4"]],
                              [True, True, True, False], pool=False,
                              out_dtype=jnp.bfloat16)                    # (B, Npad, 128)

    logits = jnp.transpose(
        h[:, :N, :num_classes].astype(jnp.float32), (0, 2, 1))           # (B, nc, N)
    return logits, t_feat


# ----------------------------------------------------------------------------

if __name__ == "__main__":
    B, N, CIN = 2, 16, 9
    NUM_CLASSES = 4

    key = jax.random.PRNGKey(0)
    kp, kx = jax.random.split(key)
    params = seg_params(kp, NUM_CLASSES, point_dimension=3, channels_in=CIN)
    x = jax.random.normal(kx, (B, N, CIN), jnp.float32)

    fwd = jax.jit(functools.partial(segmentation_pointnet,
                                    point_dim=3, num_classes=NUM_CLASSES))
    logits, feature_transform = fwd(params, x)
    jax.block_until_ready((logits, feature_transform))

    assert logits.shape == (B, NUM_CLASSES, N), logits.shape
    assert feature_transform.shape == (B, 64, 64), feature_transform.shape
    assert bool(jnp.all(jnp.isfinite(logits)))
    assert bool(jnp.all(jnp.isfinite(feature_transform)))
    print("KERNEL_OK")
</pallas_src>

<mosaic_0001>
module attributes {stable_mosaic.version = 11 : i64} {
  func.func @kernel(%arg0: i32, %arg1: i32, %arg2: i32, %arg3: memref<1x16x9xbf16, #tpu.memory_space<vmem>>, %arg4: memref<9x64xbf16, #tpu.memory_space<vmem>>, %arg5: memref<1x64xf32, #tpu.memory_space<vmem>>, %arg6: memref<64x128xbf16, #tpu.memory_space<vmem>>, %arg7: memref<1x128xf32, #tpu.memory_space<vmem>>, %arg8: memref<128x1024xbf16, #tpu.memory_space<vmem>>, %arg9: memref<1x1024xf32, #tpu.memory_space<vmem>>, %arg10: memref<1x1x1x1024xf32, #tpu.memory_space<vmem>>) attributes {dimension_semantics = [#tpu.dimension_semantics<parallel>, #tpu.dimension_semantics<parallel>, #tpu.dimension_semantics<arbitrary>], iteration_bounds = array<i64: 2, 1, 1>, scalar_prefetch = 0 : i64, scratch_operands = 0 : i64, tpu.core_type = #tpu.core_type<tc>, window_params = [{transform_indices = @transform_0, window_bounds = array<i64: 1, 16, 9>}, {pipeline_mode = #tpu.pipeline_mode<synchronous>, transform_indices = @transform_1, window_bounds = array<i64: 9, 64>}, {pipeline_mode = #tpu.pipeline_mode<synchronous>, transform_indices = @transform_2, window_bounds = array<i64: 1, 64>}, {pipeline_mode = #tpu.pipeline_mode<synchronous>, transform_indices = @transform_3, window_bounds = array<i64: 64, 128>}, {pipeline_mode = #tpu.pipeline_mode<synchronous>, transform_indices = @transform_4, window_bounds = array<i64: 1, 128>}, {pipeline_mode = #tpu.pipeline_mode<synchronous>, transform_indices = @transform_5, window_bounds = array<i64: 128, 1024>}, {pipeline_mode = #tpu.pipeline_mode<synchronous>, transform_indices = @transform_6, window_bounds = array<i64: 1, 1024>}, {transform_indices = @transform_7, window_bounds = array<i64: 1, 1, 1, 1024>}]} {
    %c0 = arith.constant 0 : index
    %c0_0 = arith.constant 0 : index
    %c0_1 = arith.constant 0 : index
    %0 = vector.load %arg3[%c0, %c0_0, %c0_1] : memref<1x16x9xbf16, #tpu.memory_space<vmem>>, vector<1x16x9xbf16>
    %1 = vector.shape_cast %0 : vector<1x16x9xbf16> to vector<16x9xbf16>
    %c0_2 = arith.constant 0 : index
    %c0_3 = arith.constant 0 : index
    %2 = vector.load %arg4[%c0_2, %c0_3] : memref<9x64xbf16, #tpu.memory_space<vmem>>, vector<9x64xbf16>
    %c0_4 = arith.constant 0 : index
    %c0_5 = arith.constant 0 : index
    %3 = vector.load %arg5[%c0_4, %c0_5] : memref<1x64xf32, #tpu.memory_space<vmem>>, vector<1x64xf32>
    %cst = arith.constant dense<0.000000e+00> : vector<16x64xf32>
    %4 = tpu.matmul %1, %2, %cst {dimension_numbers = #tpu.dot_dimension_numbers<[1], [0], [0], [1], [0, 0, 1, 1], [], []>} : vector<16x9xbf16>, vector<9x64xbf16>, vector<16x64xf32> -> vector<16x64xf32>
    %5 = vector.broadcast %3 : vector<1x64xf32> to vector<16x64xf32>
    %6 = arith.addf %4, %5 : vector<16x64xf32>
    %cst_6 = arith.constant 0.000000e+00 : f32
    %7 = vector.broadcast %cst_6 : f32 to vector<16x64xf32>
    %8 = arith.maximumf %6, %7 : vector<16x64xf32>
    %9 = arith.truncf %8 : vector<16x64xf32> to vector<16x64xbf16>
    %c0_7 = arith.constant 0 : index
    %c0_8 = arith.constant 0 : index
    %10 = vector.load %arg6[%c0_7, %c0_8] : memref<64x128xbf16, #tpu.memory_space<vmem>>, vector<64x128xbf16>
    %c0_9 = arith.constant 0 : index
    %c0_10 = arith.constant 0 : index
    %11 = vector.load %arg7[%c0_9, %c0_10] : memref<1x128xf32, #tpu.memory_space<vmem>>, vector<1x128xf32>
    %cst_11 = arith.constant dense<0.000000e+00> : vector<16x128xf32>
    %12 = tpu.matmul %9, %10, %cst_11 {dimension_numbers = #tpu.dot_dimension_numbers<[1], [0], [0], [1], [0, 0, 1, 1], [], []>} : vector<16x64xbf16>, vector<64x128xbf16>, vector<16x128xf32> -> vector<16x128xf32>
    %13 = vector.broadcast %11 : vector<1x128xf32> to vector<16x128xf32>
    %14 = arith.addf %12, %13 : vector<16x128xf32>
    %cst_12 = arith.constant 0.000000e+00 : f32
    %15 = vector.broadcast %cst_12 : f32 to vector<16x128xf32>
    %16 = arith.maximumf %14, %15 : vector<16x128xf32>
    %17 = arith.truncf %16 : vector<16x128xf32> to vector<16x128xbf16>
    %c0_13 = arith.constant 0 : index
    %c0_14 = arith.constant 0 : index
    %18 = vector.load %arg8[%c0_13, %c0_14] : memref<128x1024xbf16, #tpu.memory_space<vmem>>, vector<128x1024xbf16>
    %c0_15 = arith.constant 0 : index
    %c0_16 = arith.constant 0 : index
    %19 = vector.load %arg9[%c0_15, %c0_16] : memref<1x1024xf32, #tpu.memory_space<vmem>>, vector<1x1024xf32>
    %cst_17 = arith.constant dense<0.000000e+00> : vector<16x1024xf32>
    %20 = tpu.matmul %17, %18, %cst_17 {dimension_numbers = #tpu.dot_dimension_numbers<[1], [0], [0], [1], [0, 0, 1, 1], [], []>} : vector<16x128xbf16>, vector<128x1024xbf16>, vector<16x1024xf32> -> vector<16x1024xf32>
    %21 = vector.broadcast %19 : vector<1x1024xf32> to vector<16x1024xf32>
    %22 = arith.addf %20, %21 : vector<16x1024xf32>
    %cst_18 = arith.constant 0.000000e+00 : f32
    %23 = vector.broadcast %cst_18 : f32 to vector<16x1024xf32>
    %24 = arith.maximumf %22, %23 : vector<16x1024xf32>
    %cst_19 = arith.constant dense<0xFF800000> : vector<1024xf32>
    %25 = vector.multi_reduction <maximumf>, %24, %cst_19 [0] : vector<16x1024xf32> to vector<1024xf32>
    %26 = vector.shape_cast %25 : vector<1024xf32> to vector<1x1024xf32>
    %c0_i32 = arith.constant 0 : i32
    %27 = arith.cmpi eq, %arg2, %c0_i32 : i32
    %28 = arith.extui %27 : i1 to i32
    %c0_i32_20 = arith.constant 0 : i32
    %29 = arith.cmpi ne, %28, %c0_i32_20 : i32
    scf.if %29 {
      %cst_29 = arith.constant 0xFF800000 : f32
      %36 = vector.broadcast %cst_29 : f32 to vector<1x1024xf32>
      %c0_30 = arith.constant 0 : index
      %c0_31 = arith.constant 0 : index
      %c0_32 = arith.constant 0 : index
      %c0_33 = arith.constant 0 : index
      %37 = vector.load %arg10[%c0_30, %c0_31, %c0_32, %c0_33] : memref<1x1x1x1024xf32, #tpu.memory_space<vmem>>, vector<1x1x1x1024xf32>
      %38 = vector.shape_cast %37 : vector<1x1x1x1024xf32> to vector<1x1024xf32>
      %39 = vector.shape_cast %36 : vector<1x1024xf32> to vector<1x1x1x1024xf32>
      tpu.vector_store %arg10[%c0_30, %c0_31, %c0_32, %c0_33], %39 {strides = array<i32>} : memref<1x1x1x1024xf32, #tpu.memory_space<vmem>>, vector<1x1x1x1024xf32>,
    } else {
    }
    %c0_21 = arith.constant 0 : index
    %c0_22 = arith.constant 0 : index
    %c0_23 = arith.constant 0 : index
    %c0_24 = arith.constant 0 : index
    %30 = vector.load %arg10[%c0_21, %c0_22, %c0_23, %c0_24] : memref<1x1x1x1024xf32, #tpu.memory_space<vmem>>, vector<1x1x1x1024xf32>
    %31 = vector.shape_cast %30 : vector<1x1x1x1024xf32> to vector<1x1024xf32>
    %32 = arith.maximumf %31, %26 : vector<1x1024xf32>
    %c0_25 = arith.constant 0 : index
    %c0_26 = arith.constant 0 : index
    %c0_27 = arith.constant 0 : index
    %c0_28 = arith.constant 0 : index
    %33 = vector.load %arg10[%c0_25, %c0_26, %c0_27, %c0_28] : memref<1x1x1x1024xf32, #tpu.memory_space<vmem>>, vector<1x1x1x1024xf32>
    %34 = vector.shape_cast %33 : vector<1x1x1x1024xf32> to vector<1x1024xf32>
    %35 = vector.shape_cast %32 : vector<1x1024xf32> to vector<1x1x1x1024xf32>
    tpu.vector_store %arg10[%c0_25, %c0_26, %c0_27, %c0_28], %35 {strides = array<i32>} : memref<1x1x1x1024xf32, #tpu.memory_space<vmem>>, vector<1x1x1x1024xf32>,
    return
  }
  func.func @transform_0(%arg0: i32, %arg1: i32, %arg2: i32) -> (i32, i32, i32) {
    %c1_i32 = arith.constant 1 : i32
    %0 = arith.muli %arg1, %c1_i32 : i32
    %1 = arith.addi %0, %arg2 : i32
    %c0_i32 = arith.constant 0 : i32
    %c0_i32_0 = arith.constant 0 : i32
    return %arg0, %1, %c0_i32 : i32, i32, i32
  }
  func.func @transform_1(%arg0: i32, %arg1: i32, %arg2: i32) -> (i32, i32) {
    %c0_i32 = arith.constant 0 : i32
    %c0_i32_0 = arith.constant 0 : i32
    %c0_i32_1 = arith.constant 0 : i32
    return %c0_i32, %c0_i32_0 : i32, i32
  }
  func.func @transform_2(%arg0: i32, %arg1: i32, %arg2: i32) -> (i32, i32) {
    %c0_i32 = arith.constant 0 : i32
    %c0_i32_0 = arith.constant 0 : i32
    %c0_i32_1 = arith.constant 0 : i32
    return %c0_i32, %c0_i32_0 : i32, i32
  }
  func.func @transform_3(%arg0: i32, %arg1: i32, %arg2: i32) -> (i32, i32) {
    %c0_i32 = arith.constant 0 : i32
    %c0_i32_0 = arith.constant 0 : i32
    %c0_i32_1 = arith.constant 0 : i32
    return %c0_i32, %c0_i32_0 : i32, i32
  }
  func.func @transform_4(%arg0: i32, %arg1: i32, %arg2: i32) -> (i32, i32) {
    %c0_i32 = arith.constant 0 : i32
    %c0_i32_0 = arith.constant 0 : i32
    %c0_i32_1 = arith.constant 0 : i32
    return %c0_i32, %c0_i32_0 : i32, i32
  }
  func.func @transform_5(%arg0: i32, %arg1: i32, %arg2: i32) -> (i32, i32) {
    %c0_i32 = arith.constant 0 : i32
    %c0_i32_0 = arith.constant 0 : i32
    %c0_i32_1 = arith.constant 0 : i32
    return %c0_i32, %c0_i32_0 : i32, i32
  }
  func.func @transform_6(%arg0: i32, %arg1: i32, %arg2: i32) -> (i32, i32) {
    %c0_i32 = arith.constant 0 : i32
    %c0_i32_0 = arith.constant 0 : i32
    %c0_i32_1 = arith.constant 0 : i32
    return %c0_i32, %c0_i32_0 : i32, i32
  }
  func.func @transform_7(%arg0: i32, %arg1: i32, %arg2: i32) -> (i32, i32, i32, i32) {
    %c0_i32 = arith.constant 0 : i32
    %c0_i32_0 = arith.constant 0 : i32
    %c0_i32_1 = arith.constant 0 : i32
    return %arg0, %arg1, %c0_i32, %c0_i32_0 : i32, i32, i32, i32
  }
}

module attributes {stable_mosaic.version = 11 : i64} {
  func.func @kernel(%arg0: i32, %arg1: i32, %arg2: i32, %arg3: memref<1x16x64xbf16, #tpu.memory_space<vmem>>, %arg4: memref<64x64xbf16, #tpu.memory_space<vmem>>, %arg5: memref<1x64xf32, #tpu.memory_space<vmem>>, %arg6: memref<64x128xbf16, #tpu.memory_space<vmem>>, %arg7: memref<1x128xf32, #tpu.memory_space<vmem>>, %arg8: memref<128x1024xbf16, #tpu.memory_space<vmem>>, %arg9: memref<1x1024xf32, #tpu.memory_space<vmem>>, %arg10: memref<1x1x1x1024xf32, #tpu.memory_space<vmem>>) attributes {dimension_semantics = [#tpu.dimension_semantics<parallel>, #tpu.dimension_semantics<parallel>, #tpu.dimension_semantics<arbitrary>], iteration_bounds = array<i64: 2, 1, 1>, scalar_prefetch = 0 : i64, scratch_operands = 0 : i64, tpu.core_type = #tpu.core_type<tc>, window_params = [{transform_indices = @transform_0, window_bounds = array<i64: 1, 16, 64>}, {pipeline_mode = #tpu.pipeline_mode<synchronous>, transform_indices = @transform_1, window_bounds = array<i64: 64, 64>}, {pipeline_mode = #tpu.pipeline_mode<synchronous>, transform_indices = @transform_2, window_bounds = array<i64: 1, 64>}, {pipeline_mode = #tpu.pipeline_mode<synchronous>, transform_indices = @transform_3, window_bounds = array<i64: 64, 128>}, {pipeline_mode = #tpu.pipeline_mode<synchronous>, transform_indices = @transform_4, window_bounds = array<i64: 1, 128>}, {pipeline_mode = #tpu.pipeline_mode<synchronous>, transform_indices = @transform_5, window_bounds = array<i64: 128, 1024>}, {pipeline_mode = #tpu.pipeline_mode<synchronous>, transform_indices = @transform_6, window_bounds = array<i64: 1, 1024>}, {transform_indices = @transform_7, window_bounds = array<i64: 1, 1, 1, 1024>}]} {
    %c0 = arith.constant 0 : index
    %c0_0 = arith.constant 0 : index
    %c0_1 = arith.constant 0 : index
    %0 = vector.load %arg3[%c0, %c0_0, %c0_1] : memref<1x16x64xbf16, #tpu.memory_space<vmem>>, vector<1x16x64xbf16>
    %1 = vector.shape_cast %0 : vector<1x16x64xbf16> to vector<16x64xbf16>
    %c0_2 = arith.constant 0 : index
    %c0_3 = arith.constant 0 : index
    %2 = vector.load %arg4[%c0_2, %c0_3] : memref<64x64xbf16, #tpu.memory_space<vmem>>, vector<64x64xbf16>
    %c0_4 = arith.constant 0 : index
    %c0_5 = arith.constant 0 : index
    %3 = vector.load %arg5[%c0_4, %c0_5] : memref<1x64xf32, #tpu.memory_space<vmem>>, vector<1x64xf32>
    %cst = arith.constant dense<0.000000e+00> : vector<16x64xf32>
    %4 = tpu.matmul %1, %2, %cst {dimension_numbers = #tpu.dot_dimension_numbers<[1], [0], [0], [1], [0, 0, 1, 1], [], []>} : vector<16x64xbf16>, vector<64x64xbf16>, vector<16x64xf32> -> vector<16x64xf32>
    %5 = vector.broadcast %3 : vector<1x64xf32> to vector<16x64xf32>
    %6 = arith.addf %4, %5 : vector<16x64xf32>
    %cst_6 = arith.constant 0.000000e+00 : f32
    %7 = vector.broadcast %cst_6 : f32 to vector<16x64xf32>
    %8 = arith.maximumf %6, %7 : vector<16x64xf32>
    %9 = arith.truncf %8 : vector<16x64xf32> to vector<16x64xbf16>
    %c0_7 = arith.constant 0 : index
    %c0_8 = arith.constant 0 : index
    %10 = vector.load %arg6[%c0_7, %c0_8] : memref<64x128xbf16, #tpu.memory_space<vmem>>, vector<64x128xbf16>
    %c0_9 = arith.constant 0 : index
    %c0_10 = arith.constant 0 : index
    %11 = vector.load %arg7[%c0_9, %c0_10] : memref<1x128xf32, #tpu.memory_space<vmem>>, vector<1x128xf32>
    %cst_11 = arith.constant dense<0.000000e+00> : vector<16x128xf32>
    %12 = tpu.matmul %9, %10, %cst_11 {dimension_numbers = #tpu.dot_dimension_numbers<[1], [0], [0], [1], [0, 0, 1, 1], [], []>} : vector<16x64xbf16>, vector<64x128xbf16>, vector<16x128xf32> -> vector<16x128xf32>
    %13 = vector.broadcast %11 : vector<1x128xf32> to vector<16x128xf32>
    %14 = arith.addf %12, %13 : vector<16x128xf32>
    %cst_12 = arith.constant 0.000000e+00 : f32
    %15 = vector.broadcast %cst_12 : f32 to vector<16x128xf32>
    %16 = arith.maximumf %14, %15 : vector<16x128xf32>
    %17 = arith.truncf %16 : vector<16x128xf32> to vector<16x128xbf16>
    %c0_13 = arith.constant 0 : index
    %c0_14 = arith.constant 0 : index
    %18 = vector.load %arg8[%c0_13, %c0_14] : memref<128x1024xbf16, #tpu.memory_space<vmem>>, vector<128x1024xbf16>
    %c0_15 = arith.constant 0 : index
    %c0_16 = arith.constant 0 : index
    %19 = vector.load %arg9[%c0_15, %c0_16] : memref<1x1024xf32, #tpu.memory_space<vmem>>, vector<1x1024xf32>
    %cst_17 = arith.constant dense<0.000000e+00> : vector<16x1024xf32>
    %20 = tpu.matmul %17, %18, %cst_17 {dimension_numbers = #tpu.dot_dimension_numbers<[1], [0], [0], [1], [0, 0, 1, 1], [], []>} : vector<16x128xbf16>, vector<128x1024xbf16>, vector<16x1024xf32> -> vector<16x1024xf32>
    %21 = vector.broadcast %19 : vector<1x1024xf32> to vector<16x1024xf32>
    %22 = arith.addf %20, %21 : vector<16x1024xf32>
    %cst_18 = arith.constant 0.000000e+00 : f32
    %23 = vector.broadcast %cst_18 : f32 to vector<16x1024xf32>
    %24 = arith.maximumf %22, %23 : vector<16x1024xf32>
    %cst_19 = arith.constant dense<0xFF800000> : vector<1024xf32>
    %25 = vector.multi_reduction <maximumf>, %24, %cst_19 [0] : vector<16x1024xf32> to vector<1024xf32>
    %26 = vector.shape_cast %25 : vector<1024xf32> to vector<1x1024xf32>
    %c0_i32 = arith.constant 0 : i32
    %27 = arith.cmpi eq, %arg2, %c0_i32 : i32
    %28 = arith.extui %27 : i1 to i32
    %c0_i32_20 = arith.constant 0 : i32
    %29 = arith.cmpi ne, %28, %c0_i32_20 : i32
    scf.if %29 {
      %cst_29 = arith.constant 0xFF800000 : f32
      %36 = vector.broadcast %cst_29 : f32 to vector<1x1024xf32>
      %c0_30 = arith.constant 0 : index
      %c0_31 = arith.constant 0 : index
      %c0_32 = arith.constant 0 : index
      %c0_33 = arith.constant 0 : index
      %37 = vector.load %arg10[%c0_30, %c0_31, %c0_32, %c0_33] : memref<1x1x1x1024xf32, #tpu.memory_space<vmem>>, vector<1x1x1x1024xf32>
      %38 = vector.shape_cast %37 : vector<1x1x1x1024xf32> to vector<1x1024xf32>
      %39 = vector.shape_cast %36 : vector<1x1024xf32> to vector<1x1x1x1024xf32>
      tpu.vector_store %arg10[%c0_30, %c0_31, %c0_32, %c0_33], %39 {strides = array<i32>} : memref<1x1x1x1024xf32, #tpu.memory_space<vmem>>, vector<1x1x1x1024xf32>,
    } else {
    }
    %c0_21 = arith.constant 0 : index
    %c0_22 = arith.constant 0 : index
    %c0_23 = arith.constant 0 : index
    %c0_24 = arith.constant 0 : index
    %30 = vector.load %arg10[%c0_21, %c0_22, %c0_23, %c0_24] : memref<1x1x1x1024xf32, #tpu.memory_space<vmem>>, vector<1x1x1x1024xf32>
    %31 = vector.shape_cast %30 : vector<1x1x1x1024xf32> to vector<1x1024xf32>
    %32 = arith.maximumf %31, %26 : vector<1x1024xf32>
    %c0_25 = arith.constant 0 : index
    %c0_26 = arith.constant 0 : index
    %c0_27 = arith.constant 0 : index
    %c0_28 = arith.constant 0 : index
    %33 = vector.load %arg10[%c0_25, %c0_26, %c0_27, %c0_28] : memref<1x1x1x1024xf32, #tpu.memory_space<vmem>>, vector<1x1x1x1024xf32>
    %34 = vector.shape_cast %33 : vector<1x1x1x1024xf32> to vector<1x1024xf32>
    %35 = vector.shape_cast %32 : vector<1x1024xf32> to vector<1x1x1x1024xf32>
    tpu.vector_store %arg10[%c0_25, %c0_26, %c0_27, %c0_28], %35 {strides = array<i32>} : memref<1x1x1x1024xf32, #tpu.memory_space<vmem>>, vector<1x1x1x1024xf32>,
    return
  }
  func.func @transform_0(%arg0: i32, %arg1: i32, %arg2: i32) -> (i32, i32, i32) {
    %c1_i32 = arith.constant 1 : i32
    %0 = arith.muli %arg1, %c1_i32 : i32
    %1 = arith.addi %0, %arg2 : i32
    %c0_i32 = arith.constant 0 : i32
    %c0_i32_0 = arith.constant 0 : i32
    return %arg0, %1, %c0_i32 : i32, i32, i32
  }
  func.func @transform_1(%arg0: i32, %arg1: i32, %arg2: i32) -> (i32, i32) {
    %c0_i32 = arith.constant 0 : i32
    %c0_i32_0 = arith.constant 0 : i32
    %c0_i32_1 = arith.constant 0 : i32
    return %c0_i32, %c0_i32_0 : i32, i32
  }
  func.func @transform_2(%arg0: i32, %arg1: i32, %arg2: i32) -> (i32, i32) {
    %c0_i32 = arith.constant 0 : i32
    %c0_i32_0 = arith.constant 0 : i32
    %c0_i32_1 = arith.constant 0 : i32
    return %c0_i32, %c0_i32_0 : i32, i32
  }
  func.func @transform_3(%arg0: i32, %arg1: i32, %arg2: i32) -> (i32, i32) {
    %c0_i32 = arith.constant 0 : i32
    %c0_i32_0 = arith.constant 0 : i32
    %c0_i32_1 = arith.constant 0 : i32
    return %c0_i32, %c0_i32_0 : i32, i32
  }
  func.func @transform_4(%arg0: i32, %arg1: i32, %arg2: i32) -> (i32, i32) {
    %c0_i32 = arith.constant 0 : i32
    %c0_i32_0 = arith.constant 0 : i32
    %c0_i32_1 = arith.constant 0 : i32
    return %c0_i32, %c0_i32_0 : i32, i32
  }
  func.func @transform_5(%arg0: i32, %arg1: i32, %arg2: i32) -> (i32, i32) {
    %c0_i32 = arith.constant 0 : i32
    %c0_i32_0 = arith.constant 0 : i32
    %c0_i32_1 = arith.constant 0 : i32
    return %c0_i32, %c0_i32_0 : i32, i32
  }
  func.func @transform_6(%arg0: i32, %arg1: i32, %arg2: i32) -> (i32, i32) {
    %c0_i32 = arith.constant 0 : i32
    %c0_i32_0 = arith.constant 0 : i32
    %c0_i32_1 = arith.constant 0 : i32
    return %c0_i32, %c0_i32_0 : i32, i32
  }
  func.func @transform_7(%arg0: i32, %arg1: i32, %arg2: i32) -> (i32, i32, i32, i32) {
    %c0_i32 = arith.constant 0 : i32
    %c0_i32_0 = arith.constant 0 : i32
    %c0_i32_1 = arith.constant 0 : i32
    return %arg0, %arg1, %c0_i32, %c0_i32_0 : i32, i32, i32, i32
  }
}

module attributes {stable_mosaic.version = 11 : i64} {
  func.func @kernel(%arg0: i32, %arg1: i32, %arg2: memref<1x16x9xbf16, #tpu.memory_space<vmem>>, %arg3: memref<1x9x64xbf16, #tpu.memory_space<vmem>>, %arg4: memref<1x64xf32, #tpu.memory_space<vmem>>, %arg5: memref<64x64xbf16, #tpu.memory_space<vmem>>, %arg6: memref<1x64xf32, #tpu.memory_space<vmem>>, %arg7: memref<1x16x64xbf16, #tpu.memory_space<vmem>>) attributes {dimension_semantics = [#tpu.dimension_semantics<parallel>, #tpu.dimension_semantics<parallel>], iteration_bounds = array<i64: 2, 1>, scalar_prefetch = 0 : i64, scratch_operands = 0 : i64, tpu.core_type = #tpu.core_type<tc>, window_params = [{transform_indices = @transform_0, window_bounds = array<i64: 1, 16, 9>}, {transform_indices = @transform_1, window_bounds = array<i64: 1, 9, 64>}, {pipeline_mode = #tpu.pipeline_mode<synchronous>, transform_indices = @transform_2, window_bounds = array<i64: 1, 64>}, {pipeline_mode = #tpu.pipeline_mode<synchronous>, transform_indices = @transform_3, window_bounds = array<i64: 64, 64>}, {pipeline_mode = #tpu.pipeline_mode<synchronous>, transform_indices = @transform_4, window_bounds = array<i64: 1, 64>}, {transform_indices = @transform_5, window_bounds = array<i64: 1, 16, 64>}]} {
    %c0 = arith.constant 0 : index
    %c0_0 = arith.constant 0 : index
    %c0_1 = arith.constant 0 : index
    %0 = vector.load %arg2[%c0, %c0_0, %c0_1] : memref<1x16x9xbf16, #tpu.memory_space<vmem>>, vector<1x16x9xbf16>
    %1 = vector.shape_cast %0 : vector<1x16x9xbf16> to vector<16x9xbf16>
    %c0_2 = arith.constant 0 : index
    %c0_3 = arith.constant 0 : index
    %c0_4 = arith.constant 0 : index
    %2 = vector.load %arg3[%c0_2, %c0_3, %c0_4] : memref<1x9x64xbf16, #tpu.memory_space<vmem>>, vector<1x9x64xbf16>
    %3 = vector.shape_cast %2 : vector<1x9x64xbf16> to vector<9x64xbf16>
    %c0_5 = arith.constant 0 : index
    %c0_6 = arith.constant 0 : index
    %4 = vector.load %arg4[%c0_5, %c0_6] : memref<1x64xf32, #tpu.memory_space<vmem>>, vector<1x64xf32>
    %cst = arith.constant dense<0.000000e+00> : vector<16x64xf32>
    %5 = tpu.matmul %1, %3, %cst {dimension_numbers = #tpu.dot_dimension_numbers<[1], [0], [0], [1], [0, 0, 1, 1], [], []>} : vector<16x9xbf16>, vector<9x64xbf16>, vector<16x64xf32> -> vector<16x64xf32>
    %6 = vector.broadcast %4 : vector<1x64xf32> to vector<16x64xf32>
    %7 = arith.addf %5, %6 : vector<16x64xf32>
    %cst_7 = arith.constant 0.000000e+00 : f32
    %8 = vector.broadcast %cst_7 : f32 to vector<16x64xf32>
    %9 = arith.maximumf %7, %8 : vector<16x64xf32>
    %10 = arith.truncf %9 : vector<16x64xf32> to vector<16x64xbf16>
    %c0_8 = arith.constant 0 : index
    %c0_9 = arith.constant 0 : index
    %11 = vector.load %arg5[%c0_8, %c0_9] : memref<64x64xbf16, #tpu.memory_space<vmem>>, vector<64x64xbf16>
    %c0_10 = arith.constant 0 : index
    %c0_11 = arith.constant 0 : index
    %12 = vector.load %arg6[%c0_10, %c0_11] : memref<1x64xf32, #tpu.memory_space<vmem>>, vector<1x64xf32>
    %cst_12 = arith.constant dense<0.000000e+00> : vector<16x64xf32>
    %13 = tpu.matmul %10, %11, %cst_12 {dimension_numbers = #tpu.dot_dimension_numbers<[1], [0], [0], [1], [0, 0, 1, 1], [], []>} : vector<16x64xbf16>, vector<64x64xbf16>, vector<16x64xf32> -> vector<16x64xf32>
    %14 = vector.broadcast %12 : vector<1x64xf32> to vector<16x64xf32>
    %15 = arith.addf %13, %14 : vector<16x64xf32>
    %cst_13 = arith.constant 0.000000e+00 : f32
    %16 = vector.broadcast %cst_13 : f32 to vector<16x64xf32>
    %17 = arith.maximumf %15, %16 : vector<16x64xf32>
    %18 = arith.truncf %17 : vector<16x64xf32> to vector<16x64xbf16>
    %c0_14 = arith.constant 0 : index
    %c0_15 = arith.constant 0 : index
    %c0_16 = arith.constant 0 : index
    %19 = vector.load %arg7[%c0_14, %c0_15, %c0_16] : memref<1x16x64xbf16, #tpu.memory_space<vmem>>, vector<1x16x64xbf16>
    %20 = vector.shape_cast %19 : vector<1x16x64xbf16> to vector<16x64xbf16>
    %21 = vector.shape_cast %18 : vector<16x64xbf16> to vector<1x16x64xbf16>
    tpu.vector_store %arg7[%c0_14, %c0_15, %c0_16], %21 {strides = array<i32>} : memref<1x16x64xbf16, #tpu.memory_space<vmem>>, vector<1x16x64xbf16>,
    return
  }
  func.func @transform_0(%arg0: i32, %arg1: i32) -> (i32, i32, i32) {
    %c0_i32 = arith.constant 0 : i32
    %c0_i32_0 = arith.constant 0 : i32
    return %arg0, %arg1, %c0_i32 : i32, i32, i32
  }
  func.func @transform_1(%arg0: i32, %arg1: i32) -> (i32, i32, i32) {
    %c0_i32 = arith.constant 0 : i32
    %c0_i32_0 = arith.constant 0 : i32
    %c0_i32_1 = arith.constant 0 : i32
    return %arg0, %c0_i32, %c0_i32_0 : i32, i32, i32
  }
  func.func @transform_2(%arg0: i32, %arg1: i32) -> (i32, i32) {
    %c0_i32 = arith.constant 0 : i32
    %c0_i32_0 = arith.constant 0 : i32
    %c0_i32_1 = arith.constant 0 : i32
    return %c0_i32, %c0_i32_0 : i32, i32
  }
  func.func @transform_3(%arg0: i32, %arg1: i32) -> (i32, i32) {
    %c0_i32 = arith.constant 0 : i32
    %c0_i32_0 = arith.constant 0 : i32
    %c0_i32_1 = arith.constant 0 : i32
    return %c0_i32, %c0_i32_0 : i32, i32
  }
  func.func @transform_4(%arg0: i32, %arg1: i32) -> (i32, i32) {
    %c0_i32 = arith.constant 0 : i32
    %c0_i32_0 = arith.constant 0 : i32
    %c0_i32_1 = arith.constant 0 : i32
    return %c0_i32, %c0_i32_0 : i32, i32
  }
  func.func @transform_5(%arg0: i32, %arg1: i32) -> (i32, i32, i32) {
    %c0_i32 = arith.constant 0 : i32
    %c0_i32_0 = arith.constant 0 : i32
    return %arg0, %arg1, %c0_i32 : i32, i32, i32
  }
}

module attributes {stable_mosaic.version = 11 : i64} {
  func.func @kernel(%arg0: i32, %arg1: i32, %arg2: i32, %arg3: memref<1x16x64xbf16, #tpu.memory_space<vmem>>, %arg4: memref<1x64x64xbf16, #tpu.memory_space<vmem>>, %arg5: memref<1x64xf32, #tpu.memory_space<vmem>>, %arg6: memref<64x128xbf16, #tpu.memory_space<vmem>>, %arg7: memref<1x128xf32, #tpu.memory_space<vmem>>, %arg8: memref<128x1024xbf16, #tpu.memory_space<vmem>>, %arg9: memref<1x1024xf32, #tpu.memory_space<vmem>>, %arg10: memref<1x1x1x1024xf32, #tpu.memory_space<vmem>>) attributes {dimension_semantics = [#tpu.dimension_semantics<parallel>, #tpu.dimension_semantics<parallel>, #tpu.dimension_semantics<arbitrary>], iteration_bounds = array<i64: 2, 1, 1>, scalar_prefetch = 0 : i64, scratch_operands = 0 : i64, tpu.core_type = #tpu.core_type<tc>, window_params = [{transform_indices = @transform_0, window_bounds = array<i64: 1, 16, 64>}, {transform_indices = @transform_1, window_bounds = array<i64: 1, 64, 64>}, {pipeline_mode = #tpu.pipeline_mode<synchronous>, transform_indices = @transform_2, window_bounds = array<i64: 1, 64>}, {pipeline_mode = #tpu.pipeline_mode<synchronous>, transform_indices = @transform_3, window_bounds = array<i64: 64, 128>}, {pipeline_mode = #tpu.pipeline_mode<synchronous>, transform_indices = @transform_4, window_bounds = array<i64: 1, 128>}, {pipeline_mode = #tpu.pipeline_mode<synchronous>, transform_indices = @transform_5, window_bounds = array<i64: 128, 1024>}, {pipeline_mode = #tpu.pipeline_mode<synchronous>, transform_indices = @transform_6, window_bounds = array<i64: 1, 1024>}, {transform_indices = @transform_7, window_bounds = array<i64: 1, 1, 1, 1024>}]} {
    %c0 = arith.constant 0 : index
    %c0_0 = arith.constant 0 : index
    %c0_1 = arith.constant 0 : index
    %0 = vector.load %arg3[%c0, %c0_0, %c0_1] : memref<1x16x64xbf16, #tpu.memory_space<vmem>>, vector<1x16x64xbf16>
    %1 = vector.shape_cast %0 : vector<1x16x64xbf16> to vector<16x64xbf16>
    %c0_2 = arith.constant 0 : index
    %c0_3 = arith.constant 0 : index
    %c0_4 = arith.constant 0 : index
    %2 = vector.load %arg4[%c0_2, %c0_3, %c0_4] : memref<1x64x64xbf16, #tpu.memory_space<vmem>>, vector<1x64x64xbf16>
    %3 = vector.shape_cast %2 : vector<1x64x64xbf16> to vector<64x64xbf16>
    %c0_5 = arith.constant 0 : index
    %c0_6 = arith.constant 0 : index
    %4 = vector.load %arg5[%c0_5, %c0_6] : memref<1x64xf32, #tpu.memory_space<vmem>>, vector<1x64xf32>
    %cst = arith.constant dense<0.000000e+00> : vector<16x64xf32>
    %5 = tpu.matmul %1, %3, %cst {dimension_numbers = #tpu.dot_dimension_numbers<[1], [0], [0], [1], [0, 0, 1, 1], [], []>} : vector<16x64xbf16>, vector<64x64xbf16>, vector<16x64xf32> -> vector<16x64xf32>
    %6 = vector.broadcast %4 : vector<1x64xf32> to vector<16x64xf32>
    %7 = arith.addf %5, %6 : vector<16x64xf32>
    %cst_7 = arith.constant 0.000000e+00 : f32
    %8 = vector.broadcast %cst_7 : f32 to vector<16x64xf32>
    %9 = arith.maximumf %7, %8 : vector<16x64xf32>
    %10 = arith.truncf %9 : vector<16x64xf32> to vector<16x64xbf16>
    %c0_8 = arith.constant 0 : index
    %c0_9 = arith.constant 0 : index
    %11 = vector.load %arg6[%c0_8, %c0_9] : memref<64x128xbf16, #tpu.memory_space<vmem>>, vector<64x128xbf16>
    %c0_10 = arith.constant 0 : index
    %c0_11 = arith.constant 0 : index
    %12 = vector.load %arg7[%c0_10, %c0_11] : memref<1x128xf32, #tpu.memory_space<vmem>>, vector<1x128xf32>
    %cst_12 = arith.constant dense<0.000000e+00> : vector<16x128xf32>
    %13 = tpu.matmul %10, %11, %cst_12 {dimension_numbers = #tpu.dot_dimension_numbers<[1], [0], [0], [1], [0, 0, 1, 1], [], []>} : vector<16x64xbf16>, vector<64x128xbf16>, vector<16x128xf32> -> vector<16x128xf32>
    %14 = vector.broadcast %12 : vector<1x128xf32> to vector<16x128xf32>
    %15 = arith.addf %13, %14 : vector<16x128xf32>
    %cst_13 = arith.constant 0.000000e+00 : f32
    %16 = vector.broadcast %cst_13 : f32 to vector<16x128xf32>
    %17 = arith.maximumf %15, %16 : vector<16x128xf32>
    %18 = arith.truncf %17 : vector<16x128xf32> to vector<16x128xbf16>
    %c0_14 = arith.constant 0 : index
    %c0_15 = arith.constant 0 : index
    %19 = vector.load %arg8[%c0_14, %c0_15] : memref<128x1024xbf16, #tpu.memory_space<vmem>>, vector<128x1024xbf16>
    %c0_16 = arith.constant 0 : index
    %c0_17 = arith.constant 0 : index
    %20 = vector.load %arg9[%c0_16, %c0_17] : memref<1x1024xf32, #tpu.memory_space<vmem>>, vector<1x1024xf32>
    %cst_18 = arith.constant dense<0.000000e+00> : vector<16x1024xf32>
    %21 = tpu.matmul %18, %19, %cst_18 {dimension_numbers = #tpu.dot_dimension_numbers<[1], [0], [0], [1], [0, 0, 1, 1], [], []>} : vector<16x128xbf16>, vector<128x1024xbf16>, vector<16x1024xf32> -> vector<16x1024xf32>
    %22 = vector.broadcast %20 : vector<1x1024xf32> to vector<16x1024xf32>
    %23 = arith.addf %21, %22 : vector<16x1024xf32>
    %cst_19 = arith.constant 0.000000e+00 : f32
    %24 = vector.broadcast %cst_19 : f32 to vector<16x1024xf32>
    %25 = arith.maximumf %23, %24 : vector<16x1024xf32>
    %cst_20 = arith.constant dense<0xFF800000> : vector<1024xf32>
    %26 = vector.multi_reduction <maximumf>, %25, %cst_20 [0] : vector<16x1024xf32> to vector<1024xf32>
    %27 = vector.shape_cast %26 : vector<1024xf32> to vector<1x1024xf32>
    %c0_i32 = arith.constant 0 : i32
    %28 = arith.cmpi eq, %arg2, %c0_i32 : i32
    %29 = arith.extui %28 : i1 to i32
    %c0_i32_21 = arith.constant 0 : i32
    %30 = arith.cmpi ne, %29, %c0_i32_21 : i32
    scf.if %30 {
      %cst_30 = arith.constant 0xFF800000 : f32
      %37 = vector.broadcast %cst_30 : f32 to vector<1x1024xf32>
      %c0_31 = arith.constant 0 : index
      %c0_32 = arith.constant 0 : index
      %c0_33 = arith.constant 0 : index
      %c0_34 = arith.constant 0 : index
      %38 = vector.load %arg10[%c0_31, %c0_32, %c0_33, %c0_34] : memref<1x1x1x1024xf32, #tpu.memory_space<vmem>>, vector<1x1x1x1024xf32>
      %39 = vector.shape_cast %38 : vector<1x1x1x1024xf32> to vector<1x1024xf32>
      %40 = vector.shape_cast %37 : vector<1x1024xf32> to vector<1x1x1x1024xf32>
      tpu.vector_store %arg10[%c0_31, %c0_32, %c0_33, %c0_34], %40 {strides = array<i32>} : memref<1x1x1x1024xf32, #tpu.memory_space<vmem>>, vector<1x1x1x1024xf32>,
    } else {
    }
    %c0_22 = arith.constant 0 : index
    %c0_23 = arith.constant 0 : index
    %c0_24 = arith.constant 0 : index
    %c0_25 = arith.constant 0 : index
    %31 = vector.load %arg10[%c0_22, %c0_23, %c0_24, %c0_25] : memref<1x1x1x1024xf32, #tpu.memory_space<vmem>>, vector<1x1x1x1024xf32>
    %32 = vector.shape_cast %31 : vector<1x1x1x1024xf32> to vector<1x1024xf32>
    %33 = arith.maximumf %32, %27 : vector<1x1024xf32>
    %c0_26 = arith.constant 0 : index
    %c0_27 = arith.constant 0 : index
    %c0_28 = arith.constant 0 : index
    %c0_29 = arith.constant 0 : index
    %34 = vector.load %arg10[%c0_26, %c0_27, %c0_28, %c0_29] : memref<1x1x1x1024xf32, #tpu.memory_space<vmem>>, vector<1x1x1x1024xf32>
    %35 = vector.shape_cast %34 : vector<1x1x1x1024xf32> to vector<1x1024xf32>
    %36 = vector.shape_cast %33 : vector<1x1024xf32> to vector<1x1x1x1024xf32>
    tpu.vector_store %arg10[%c0_26, %c0_27, %c0_28, %c0_29], %36 {strides = array<i32>} : memref<1x1x1x1024xf32, #tpu.memory_space<vmem>>, vector<1x1x1x1024xf32>,
    return
  }
  func.func @transform_0(%arg0: i32, %arg1: i32, %arg2: i32) -> (i32, i32, i32) {
    %c1_i32 = arith.constant 1 : i32
    %0 = arith.muli %arg1, %c1_i32 : i32
    %1 = arith.addi %0, %arg2 : i32
    %c0_i32 = arith.constant 0 : i32
    %c0_i32_0 = arith.constant 0 : i32
    return %arg0, %1, %c0_i32 : i32, i32, i32
  }
  func.func @transform_1(%arg0: i32, %arg1: i32, %arg2: i32) -> (i32, i32, i32) {
    %c0_i32 = arith.constant 0 : i32
    %c0_i32_0 = arith.constant 0 : i32
    %c0_i32_1 = arith.constant 0 : i32
    return %arg0, %c0_i32, %c0_i32_0 : i32, i32, i32
  }
  func.func @transform_2(%arg0: i32, %arg1: i32, %arg2: i32) -> (i32, i32) {
    %c0_i32 = arith.constant 0 : i32
    %c0_i32_0 = arith.constant 0 : i32
    %c0_i32_1 = arith.constant 0 : i32
    return %c0_i32, %c0_i32_0 : i32, i32
  }
  func.func @transform_3(%arg0: i32, %arg1: i32, %arg2: i32) -> (i32, i32) {
    %c0_i32 = arith.constant 0 : i32
    %c0_i32_0 = arith.constant 0 : i32
    %c0_i32_1 = arith.constant 0 : i32
    return %c0_i32, %c0_i32_0 : i32, i32
  }
  func.func @transform_4(%arg0: i32, %arg1: i32, %arg2: i32) -> (i32, i32) {
    %c0_i32 = arith.constant 0 : i32
    %c0_i32_0 = arith.constant 0 : i32
    %c0_i32_1 = arith.constant 0 : i32
    return %c0_i32, %c0_i32_0 : i32, i32
  }
  func.func @transform_5(%arg0: i32, %arg1: i32, %arg2: i32) -> (i32, i32) {
    %c0_i32 = arith.constant 0 : i32
    %c0_i32_0 = arith.constant 0 : i32
    %c0_i32_1 = arith.constant 0 : i32
    return %c0_i32, %c0_i32_0 : i32, i32
  }
  func.func @transform_6(%arg0: i32, %arg1: i32, %arg2: i32) -> (i32, i32) {
    %c0_i32 = arith.constant 0 : i32
    %c0_i32_0 = arith.constant 0 : i32
    %c0_i32_1 = arith.constant 0 : i32
    return %c0_i32, %c0_i32_0 : i32, i32
  }
  func.func @transform_7(%arg0: i32, %arg1: i32, %arg2: i32) -> (i32, i32, i32, i32) {
    %c0_i32 = arith.constant 0 : i32
    %c0_i32_0 = arith.constant 0 : i32
    %c0_i32_1 = arith.constant 0 : i32
    return %arg0, %arg1, %c0_i32, %c0_i32_0 : i32, i32, i32, i32
  }
}

module attributes {stable_mosaic.version = 11 : i64} {
  func.func @kernel(%arg0: i32, %arg1: i32, %arg2: memref<1x16x64xbf16, #tpu.memory_space<vmem>>, %arg3: memref<1x64x512xbf16, #tpu.memory_space<vmem>>, %arg4: memref<1x1x512xf32, #tpu.memory_space<vmem>>, %arg5: memref<512x256xbf16, #tpu.memory_space<vmem>>, %arg6: memref<1x256xf32, #tpu.memory_space<vmem>>, %arg7: memref<256x128xbf16, #tpu.memory_space<vmem>>, %arg8: memref<1x128xf32, #tpu.memory_space<vmem>>, %arg9: memref<128x128xbf16, #tpu.memory_space<vmem>>, %arg10: memref<1x128xf32, #tpu.memory_space<vmem>>, %arg11: memref<1x16x128xbf16, #tpu.memory_space<vmem>>) attributes {dimension_semantics = [#tpu.dimension_semantics<parallel>, #tpu.dimension_semantics<parallel>], iteration_bounds = array<i64: 2, 1>, scalar_prefetch = 0 : i64, scratch_operands = 0 : i64, tpu.core_type = #tpu.core_type<tc>, window_params = [{transform_indices = @transform_0, window_bounds = array<i64: 1, 16, 64>}, {transform_indices = @transform_1, window_bounds = array<i64: 1, 64, 512>}, {transform_indices = @transform_2, window_bounds = array<i64: 1, 1, 512>}, {pipeline_mode = #tpu.pipeline_mode<synchronous>, transform_indices = @transform_3, window_bounds = array<i64: 512, 256>}, {pipeline_mode = #tpu.pipeline_mode<synchronous>, transform_indices = @transform_4, window_bounds = array<i64: 1, 256>}, {pipeline_mode = #tpu.pipeline_mode<synchronous>, transform_indices = @transform_5, window_bounds = array<i64: 256, 128>}, {pipeline_mode = #tpu.pipeline_mode<synchronous>, transform_indices = @transform_6, window_bounds = array<i64: 1, 128>}, {pipeline_mode = #tpu.pipeline_mode<synchronous>, transform_indices = @transform_7, window_bounds = array<i64: 128, 128>}, {pipeline_mode = #tpu.pipeline_mode<synchronous>, transform_indices = @transform_8, window_bounds = array<i64: 1, 128>}, {transform_indices = @transform_9, window_bounds = array<i64: 1, 16, 128>}]} {
    %c0 = arith.constant 0 : index
    %c0_0 = arith.constant 0 : index
    %c0_1 = arith.constant 0 : index
    %0 = vector.load %arg2[%c0, %c0_0, %c0_1] : memref<1x16x64xbf16, #tpu.memory_space<vmem>>, vector<1x16x64xbf16>
    %1 = vector.shape_cast %0 : vector<1x16x64xbf16> to vector<16x64xbf16>
    %c0_2 = arith.constant 0 : index
    %c0_3 = arith.constant 0 : index
    %c0_4 = arith.constant 0 : index
    %2 = vector.load %arg3[%c0_2, %c0_3, %c0_4] : memref<1x64x512xbf16, #tpu.memory_space<vmem>>, vector<1x64x512xbf16>
    %3 = vector.shape_cast %2 : vector<1x64x512xbf16> to vector<64x512xbf16>
    %c0_5 = arith.constant 0 : index
    %c0_6 = arith.constant 0 : index
    %c0_7 = arith.constant 0 : index
    %4 = vector.load %arg4[%c0_5, %c0_6, %c0_7] : memref<1x1x512xf32, #tpu.memory_space<vmem>>, vector<1x1x512xf32>
    %5 = vector.shape_cast %4 : vector<1x1x512xf32> to vector<1x512xf32>
    %cst = arith.constant dense<0.000000e+00> : vector<16x512xf32>
    %6 = tpu.matmul %1, %3, %cst {dimension_numbers = #tpu.dot_dimension_numbers<[1], [0], [0], [1], [0, 0, 1, 1], [], []>} : vector<16x64xbf16>, vector<64x512xbf16>, vector<16x512xf32> -> vector<16x512xf32>
    %7 = vector.broadcast %5 : vector<1x512xf32> to vector<16x512xf32>
    %8 = arith.addf %6, %7 : vector<16x512xf32>
    %cst_8 = arith.constant 0.000000e+00 : f32
    %9 = vector.broadcast %cst_8 : f32 to vector<16x512xf32>
    %10 = arith.maximumf %8, %9 : vector<16x512xf32>
    %11 = arith.truncf %10 : vector<16x512xf32> to vector<16x512xbf16>
    %c0_9 = arith.constant 0 : index
    %c0_10 = arith.constant 0 : index
    %12 = vector.load %arg5[%c0_9, %c0_10] : memref<512x256xbf16, #tpu.memory_space<vmem>>, vector<512x256xbf16>
    %c0_11 = arith.constant 0 : index
    %c0_12 = arith.constant 0 : index
    %13 = vector.load %arg6[%c0_11, %c0_12] : memref<1x256xf32, #tpu.memory_space<vmem>>, vector<1x256xf32>
    %cst_13 = arith.constant dense<0.000000e+00> : vector<16x256xf32>
    %14 = tpu.matmul %11, %12, %cst_13 {dimension_numbers = #tpu.dot_dimension_numbers<[1], [0], [0], [1], [0, 0, 1, 1], [], []>} : vector<16x512xbf16>, vector<512x256xbf16>, vector<16x256xf32> -> vector<16x256xf32>
    %15 = vector.broadcast %13 : vector<1x256xf32> to vector<16x256xf32>
    %16 = arith.addf %14, %15 : vector<16x256xf32>
    %cst_14 = arith.constant 0.000000e+00 : f32
    %17 = vector.broadcast %cst_14 : f32 to vector<16x256xf32>
    %18 = arith.maximumf %16, %17 : vector<16x256xf32>
    %19 = arith.truncf %18 : vector<16x256xf32> to vector<16x256xbf16>
    %c0_15 = arith.constant 0 : index
    %c0_16 = arith.constant 0 : index
    %20 = vector.load %arg7[%c0_15, %c0_16] : memref<256x128xbf16, #tpu.memory_space<vmem>>, vector<256x128xbf16>
    %c0_17 = arith.constant 0 : index
    %c0_18 = arith.constant 0 : index
    %21 = vector.load %arg8[%c0_17, %c0_18] : memref<1x128xf32, #tpu.memory_space<vmem>>, vector<1x128xf32>
    %cst_19 = arith.constant dense<0.000000e+00> : vector<16x128xf32>
    %22 = tpu.matmul %19, %20, %cst_19 {dimension_numbers = #tpu.dot_dimension_numbers<[1], [0], [0], [1], [0, 0, 1, 1], [], []>} : vector<16x256xbf16>, vector<256x128xbf16>, vector<16x128xf32> -> vector<16x128xf32>
    %23 = vector.broadcast %21 : vector<1x128xf32> to vector<16x128xf32>
    %24 = arith.addf %22, %23 : vector<16x128xf32>
    %cst_20 = arith.constant 0.000000e+00 : f32
    %25 = vector.broadcast %cst_20 : f32 to vector<16x128xf32>
    %26 = arith.maximumf %24, %25 : vector<16x128xf32>
    %27 = arith.truncf %26 : vector<16x128xf32> to vector<16x128xbf16>
    %c0_21 = arith.constant 0 : index
    %c0_22 = arith.constant 0 : index
    %28 = vector.load %arg9[%c0_21, %c0_22] : memref<128x128xbf16, #tpu.memory_space<vmem>>, vector<128x128xbf16>
    %c0_23 = arith.constant 0 : index
    %c0_24 = arith.constant 0 : index
    %29 = vector.load %arg10[%c0_23, %c0_24] : memref<1x128xf32, #tpu.memory_space<vmem>>, vector<1x128xf32>
    %cst_25 = arith.constant dense<0.000000e+00> : vector<16x128xf32>
    %30 = tpu.matmul %27, %28, %cst_25 {dimension_numbers = #tpu.dot_dimension_numbers<[1], [0], [0], [1], [0, 0, 1, 1], [], []>} : vector<16x128xbf16>, vector<128x128xbf16>, vector<16x128xf32> -> vector<16x128xf32>
    %31 = vector.broadcast %29 : vector<1x128xf32> to vector<16x128xf32>
    %32 = arith.addf %30, %31 : vector<16x128xf32>
    %33 = arith.truncf %32 : vector<16x128xf32> to vector<16x128xbf16>
    %c0_26 = arith.constant 0 : index
    %c0_27 = arith.constant 0 : index
    %c0_28 = arith.constant 0 : index
    %34 = vector.load %arg11[%c0_26, %c0_27, %c0_28] : memref<1x16x128xbf16, #tpu.memory_space<vmem>>, vector<1x16x128xbf16>
    %35 = vector.shape_cast %34 : vector<1x16x128xbf16> to vector<16x128xbf16>
    %36 = vector.shape_cast %33 : vector<16x128xbf16> to vector<1x16x128xbf16>
    tpu.vector_store %arg11[%c0_26, %c0_27, %c0_28], %36 {strides = array<i32>} : memref<1x16x128xbf16, #tpu.memory_space<vmem>>, vector<1x16x128xbf16>,
    return
  }
  func.func @transform_0(%arg0: i32, %arg1: i32) -> (i32, i32, i32) {
    %c0_i32 = arith.constant 0 : i32
    %c0_i32_0 = arith.constant 0 : i32
    return %arg0, %arg1, %c0_i32 : i32, i32, i32
  }
  func.func @transform_1(%arg0: i32, %arg1: i32) -> (i32, i32, i32) {
    %c0_i32 = arith.constant 0 : i32
    %c0_i32_0 = arith.constant 0 : i32
    %c0_i32_1 = arith.constant 0 : i32
    return %arg0, %c0_i32, %c0_i32_0 : i32, i32, i32
  }
  func.func @transform_2(%arg0: i32, %arg1: i32) -> (i32, i32, i32) {
    %c0_i32 = arith.constant 0 : i32
    %c0_i32_0 = arith.constant 0 : i32
    %c0_i32_1 = arith.constant 0 : i32
    return %arg0, %c0_i32, %c0_i32_0 : i32, i32, i32
  }
  func.func @transform_3(%arg0: i32, %arg1: i32) -> (i32, i32) {
    %c0_i32 = arith.constant 0 : i32
    %c0_i32_0 = arith.constant 0 : i32
    %c0_i32_1 = arith.constant 0 : i32
    return %c0_i32, %c0_i32_0 : i32, i32
  }
  func.func @transform_4(%arg0: i32, %arg1: i32) -> (i32, i32) {
    %c0_i32 = arith.constant 0 : i32
    %c0_i32_0 = arith.constant 0 : i32
    %c0_i32_1 = arith.constant 0 : i32
    return %c0_i32, %c0_i32_0 : i32, i32
  }
  func.func @transform_5(%arg0: i32, %arg1: i32) -> (i32, i32) {
    %c0_i32 = arith.constant 0 : i32
    %c0_i32_0 = arith.constant 0 : i32
    %c0_i32_1 = arith.constant 0 : i32
    return %c0_i32, %c0_i32_0 : i32, i32
  }
  func.func @transform_6(%arg0: i32, %arg1: i32) -> (i32, i32) {
    %c0_i32 = arith.constant 0 : i32
    %c0_i32_0 = arith.constant 0 : i32
    %c0_i32_1 = arith.constant 0 : i32
    return %c0_i32, %c0_i32_0 : i32, i32
  }
  func.func @transform_7(%arg0: i32, %arg1: i32) -> (i32, i32) {
    %c0_i32 = arith.constant 0 : i32
    %c0_i32_0 = arith.constant 0 : i32
    %c0_i32_1 = arith.constant 0 : i32
    return %c0_i32, %c0_i32_0 : i32, i32
  }
  func.func @transform_8(%arg0: i32, %arg1: i32) -> (i32, i32) {
    %c0_i32 = arith.constant 0 : i32
    %c0_i32_0 = arith.constant 0 : i32
    %c0_i32_1 = arith.constant 0 : i32
    return %c0_i32, %c0_i32_0 : i32, i32
  }
  func.func @transform_9(%arg0: i32, %arg1: i32) -> (i32, i32, i32) {
    %c0_i32 = arith.constant 0 : i32
    %c0_i32_0 = arith.constant 0 : i32
    return %arg0, %arg1, %c0_i32 : i32, i32, i32
  }
}

</mosaic_0001>

<bundles_post_ra>
// kernel: segmentation_pointnet.6
= control target key start
LH: loop header
LB: loop body
LE: loop exit
PB: predicated region body
PF: predicated region fallthrough
CT: control target
= control target key end

     0   :  { %s702_s18 = smov 0   ;;  %s704_s19 = smov 0   ;;  %s761_s0 = inlined_call_operand.vmem [shape: bf16[2,16,9], index: 0, kind: input, shape index: {}]   ;;  %s762_s1 = inlined_call_operand.vmem [shape: bf16[2,9,64], index: 1, kind: input, shape index: {}]   ;;  %s763_s2 = inlined_call_operand.vmem [shape: f32[1,64], index: 2, kind: input, shape index: {}]   ;;  %s764_s3 = inlined_call_operand.vmem [shape: bf16[64,64], index: 3, kind: input, shape index: {}]   ;;  %s765_s4 = inlined_call_operand.vmem [shape: f32[1,64], index: 4, kind: input, shape index: {}]   ;;  %s766_s5 = inlined_call_operand.vmem [shape: bf16[2,16,64], index: 5, kind: output, shape index: {}]  }
   0x1   :  { %s706_s20 = smov 0  }
   0x2 LB: > { %s27_s21 = sadd.s32 1, %s663_s19  ;;  %p561_p0 = scmp.ge.s32.totalorder %s667_s20, 1  ;;  %s667_s20 = sphi %s706_s20, %s15_s20   ;;  %s663_s19 = sphi %s704_s19, %s768_s19   ;;  %s659_s18 = sphi %s702_s18, %s767_s18  }
   0x3   : > { %p29_p1 = scmp.ge.s32.totalorder %s27_s21, 2  ;;  %p218_p2 = scmp.lt.s32.totalorder %s667_s20, 3 }
   0x5   : > { %s770_s21 = smov (%p29_p1, %s27_s21), 0  ;;  %p219_p3 = pnand %p561_p0, %p218_p2 }
   0x6   : > { %p260_p4 = scmp.lt.s32.totalorder (!%p219_p3), %s659_s18, 1  ;;  %vm310_vm0 = vcmask (!%p219_p3), 1043456   ;;  %v641_v0 = vld [vmem:[%s764_s3] sm:$0xff] (!%p219_p3)   ;;  %v669_v1 = vmov (!%p219_p3), 0.0   ;;  %vm311_vm1 = vcmask (!%p219_p3), 1044480   ;;  %v670_v2 = vmov (!%p219_p3), 65535  }
   0x7   : > { %222 = sbr.rel (%p219_p3) target bundleno = 464 (0x1d0), region = 40  ;;  %594 = vmatprep.subr.bf16.mxu0 (!%p219_p3), %v669_v1  ;;  %v312_v3 = vsel (!%p219_p3), %vm310_vm0, 4294967295, %v670_v2  ;;  %600 = vmatprep.subr.bf16.mxu1 (!%p219_p3), %v669_v1  ;;  %vm671_vm2 = vmmov (!%p219_p3), 0   ;;  %v642_v4 = vld [vmem:[%s764_s3 + $0x8] sm:$0xff] (!%p219_p3)   ;;  %vm306_vm3 = vcmask (!%p219_p3), 72704   ;;  %v643_v9 = vld [vmem:[%s764_s3 + $0x10] sm:$0xff] (!%p219_p3)  }
   0x8   : > { %596 = vmatprep.mubr.msk.bf16.mxu0 (!%p219_p3), %vm671_vm2, %v669_v1  ;;  %601 = vmatpush3.bf16.msra.mxu1 (!%p219_p3), %v641_v0  ;;  %v313_v5 = vsel (!%p219_p3), %vm311_vm1, %v312_v3, 0  ;;  %v644_v10 = vld [vmem:[%s764_s3 + $0x18] sm:$0xff] (!%p219_p3)   ;;  %v568_v11 = vld [vmem:[%s763_s2] ss:$0 sm:$0xff] (!%p219_p3)  ;;  %vm400_vm4 = vcmask (!%p219_p3), 523264   ;;  %vm455_vm5 = vcmask (!%p219_p3), 519168  }
   0x9   : > { %602 = vmatprep.subr.bf16.mxu1 (!%p219_p3), %v669_v1  ;;  %608 = vmatprep.mubr.msk.bf16.mxu1 (!%p219_p3), %vm671_vm2, %v669_v1  ;;  %v572_v21 = vld [vmem:[%s765_s4] ss:$0 sm:$0xff] (!%p219_p3) }
   0xc   : > { %603 = vmatpush3.bf16.msra.mxu1 (!%p219_p3), %v642_v4 }
   0xd   : > { %604 = vmatprep.subr.bf16.mxu1 (!%p219_p3), %v669_v1 }
   0xe   : > { %s772_s18 = smov (!%p260_p4, %s659_s18), 1 }
   0xf   : > { %s726_s26 = sshll.u32 %s772_s18, 3 }
  0x10   : > { %s273_s29 = scalar_lea.vmem %s762_s1, %s726_s26  ;;  %s267_s7 = scalar_lea.vmem %s761_s0, %s726_s26  ;;  %605 = vmatpush3.bf16.msra.mxu1 %v643_v9 }
  0x11   : > { %v639_v6 = vld [vmem:[%s273_s29] sm:$0x1f]   ;;  %606 = vmatprep.subr.bf16.mxu1 %v669_v1  ;;  %s282_s18 = scalar_lea.vmem %s766_s5, %s726_s26 }
  0x12   : > { %v315_v7 = vand.u32 %v639_v6, %v313_v5  ;;  %v640_v8 = vld [vmem:[%s267_s7] sm:$0xff]  }
  0x14   : > { %595 = vmatpush3.bf16.msra.mxu0 %v315_v7  ;;  %607 = vmatpush3.bf16.msra.mxu1 %v644_v10 }
  0x17   : > { %597 = vmatmul.mubr.msk.bf16.vlgmr.msra.gmra.mrb[0].mxu0 %vm306_vm3, %v640_v8 }
  0xea   : > { %v351_v12 = vpop.f32.mrb[0].mxu0 }
  0xeb   : > { %v352_v13 = vadd.f32 %v568_v11, %v351_v12  ;;  %v598_v14 = vpop.f32.mrb[1].mxu0 }
  0xec   : > { %v354_v15 = vpop.f32.mrb[2].mxu0 }
  0xed   : > { %v355_v16 = vadd.f32 %v568_v11, %v354_v15  ;;  %v599_v17 = vpop.f32.mrb[3].mxu0  ;;  %v358_v18 = vmax.f32 %v352_v13, 0.0 }
  0xef   : > { %v359_v19 = vmax.f32 %v355_v16, 0.0 }
  0xf1   : > { %v360_v20 = vpack.c.bf16 %v359_v19, %v358_v18 }
  0xf3   : > { %609 = vmatmul.mubr.msk.bf16.vlgmr.msra.gmra.mrb[0].mxu1 %vm400_vm4, %v360_v20 }
 0x1c6   : > { %v438_v22 = vpop.f32.mrb[0].mxu1 }
 0x1c7   : > { %v439_v23 = vadd.f32 %v572_v21, %v438_v22  ;;  %v610_v24 = vpop.f32.mrb[1].mxu1 }
 0x1c8   : > { %v441_v25 = vpop.f32.mrb[2].mxu1 }
 0x1c9   : > { %v445_v26 = vmax.f32 %v439_v23, 0.0  ;;  %v442_v27 = vadd.f32 %v572_v21, %v441_v25  ;;  %v611_v28 = vpop.f32.mrb[3].mxu1 }
 0x1cb   : > { %v585_v29 = vpack.c.bf16 %v445_v26, %v445_v26  ;;  %v446_v30 = vmax.f32 %v442_v27, 0.0 }
 0x1cd   : > { %456 = vst.msk [vmem:[%s282_s18] sm:$0xf] %vm455_vm5, %v585_v29  ;;  %v586_v31 = vpack.c.bf16 %v446_v30, %v446_v30 }
 0x1cf   : > { %457 = vst.msk [vmem:[%s282_s18 + $0x4] sm:$0xf] %vm455_vm5, %v586_v31 }
 0x1d0 PF: > { %s15_s20 = sadd.s32 1, %s667_s20   ;;  %s767_s18 = smov %s663_s19 }
 0x1d1   : > { %p12_p5 = scmp.ge.s32.totalorder %s15_s20, 4   ;;  %s768_s19 = smov %s770_s21 }
 0x1d3   :  { %14 = sbr.rel (!%p12_p5) target bundleno = 2 (0x2), region = 73 }

// kernel: segmentation_pointnet.5
= control target key start
LH: loop header
LB: loop body
LE: loop exit
PB: predicated region body
PF: predicated region fallthrough
CT: control target
= control target key end

     0   :  { %12 = vsyncpa [#allocation3], 0  ;;  %s2206_s0 = inlined_call_operand.vmem [shape: bf16[2,16,9], index: 0, kind: input, shape index: {}]   ;;  %s2207_s1 = inlined_call_operand.hbm [shape: bf16[9,64], index: 1, kind: input, shape index: {}]   ;;  %s2208_s2 = inlined_call_operand.hbm [shape: f32[1,64], index: 2, kind: input, shape index: {}]   ;;  %s2209_s3 = inlined_call_operand.hbm [shape: bf16[64,128], index: 3, kind: input, shape index: {}]   ;;  %s2210_s4 = inlined_call_operand.hbm [shape: f32[1,128], index: 4, kind: input, shape index: {}]   ;;  %s2211_s5 = inlined_call_operand.hbm [shape: bf16[128,1024], index: 5, kind: input, shape index: {}]   ;;  %s2212_s6 = inlined_call_operand.hbm [shape: f32[1,1024], index: 6, kind: input, shape index: {}]   ;;  %s2213_s7 = inlined_call_operand.vmem [shape: f32[2,1,1,1024], index: 7, kind: output, shape index: {}]  }
   0x1   :  { %13 = vsyncpa [#allocation5], 0 }
   0x2   :  { %14 = vsyncpa [#allocation8], 0 }
   0x3   :  { %15 = vsyncpa [#allocation11], 0  ;;  %s1944_s24 = smov 0   ;;  %s1946_s25 = smov 0  }
   0x4   :  { %s1948_s26 = smov 0  }
   0x5 LB: > { %s1889_s27 = smov [#allocation4]   ;;  %s1458_s29 = sadd.s32 4294967295, %s1887_s26   ;;  %s1887_s26 = sphi %s1948_s26, %s21_s26   ;;  %s1883_s25 = sphi %s1946_s25, %s2226_s25   ;;  %s1879_s24 = sphi %s1944_s24, %s2225_s24  }
   0x6   : > { %s255_s28 = sshll.u32 %s1889_s27, 4  ;;  %p1460_p0 = scmp.ge.s32.totalorder %s1887_s26, 1  ;;  %s256_s28 = int_to_ptr.vmem [resolvable:$true] %s255_s28 }
   0x7   : > { %p229_p1 = scmp.lt.s32.totalorder %s1887_s26, 3  ;;  %p1962_p2 = scmp.eq.s32.totalorder %s1458_s29, 0 }
   0x8   : > { %s1890_s9 = smov [#allocation7]   ;;  %s40_s12 = sadd.s32 1, %s1883_s25 }
   0x9   : > { %s2217_s30 = scalar_select %p1962_p2, 1, 0 }
   0xa   : > { %p1966_p3 = pnand %p1460_p0, %p229_p1  ;;  %s279_s10 = sshll.u32 %s1890_s9, 4  ;;  %s1972_s10 = int_to_ptr.vmem [resolvable:$true] %s279_s10 }
   0xb   : > { %p1983_p6 = scmp.ge.s32.totalorder %s40_s12, 2  ;;  %s1681_s16 = scalar_lea.hbm %s2208_s2, 16 }
   0xc   : > { %s2218_s8 = scalar_select %p1966_p3, 1, 0 }
   0xd   : > { %p1604_p4 = pneg %p1966_p3  ;;  %p1682_p7 = scmp.ne.s32.totalorder %s2208_s2, %s1681_s16 }
   0xe   : > { %s2220_s13 = scalar_select %p1983_p6, 1, 0 }
   0xf   : > { %p1976_p5 = pnand %p1962_p2, %p1604_p4  ;;  %p1688_p11 = scmp.lt.u32.totalorder %s1681_s16, %s2208_s2 }
  0x11   : > { %p1995_p8 = pneg %p1976_p5 }
  0x13   : > { %p1684_p9 = pnand %p1995_p8, %p1682_p7 }
  0x15   : > { %p1685_p10 = pneg %p1684_p9 }
  0x17   : > { %p1690_p12 = pnand %p1688_p11, %p1685_p10 }
  0x19   : > { %1693 = shalt.err (!%p1690_p12)
}
  0x1a   : > { %s1694_s22 = scalar_lea.vmem %s256_s28, 16  ;;  %s1701_s23 = scalar_lea.vmem %s256_s28, 32 }
  0x1b   : > { %p1695_p13 = scmp.ne.s32.totalorder %s256_s28, %s1694_s22  ;;  %p1702_p4 = scmp.lt.s32.totalorder %s256_s28, %s256_s28 }
  0x1c   : > { %p1703_p2 = scmp.lt.s32.totalorder %s1701_s23, %s1694_s22 }
  0x1d   : > { %p1697_p0 = pnand %p1695_p13, %p1995_p8 }
  0x1e   : > { %p1704_p3 = por %p1703_p2, %p1702_p4 }
  0x1f   : > { %p1698_p1 = pneg %p1697_p0 }
  0x21   : > { %p1705_p6 = pnand %p1704_p3, %p1698_p1 }
  0x23   : > { %1708 = shalt.err (!%p1705_p6)
}
  0x24   : > { %1610 = dma.hbm_to_vmem [thread:$0]  (!%p1976_p5), %s2208_s2, 16, %s256_s28, [#allocation5]  }
  0x25   : > { %s1709_s15 = scalar_lea.hbm %s2210_s4, 16 }
  0x26   : > { %p1710_p7 = scmp.ne.s32.totalorder %s2210_s4, %s1709_s15  ;;  %p1716_p3 = scmp.lt.u32.totalorder %s1709_s15, %s2210_s4 }
  0x28   : > { %p1712_p9 = pnand %p1710_p7, %p1995_p8 }
  0x2a   : > { %p1713_p2 = pneg %p1712_p9 }
  0x2c   : > { %p1718_p6 = pnand %p1716_p3, %p1713_p2 }
  0x2e   : > { %1721 = shalt.err (!%p1718_p6)
}
  0x2f   : > { %s1722_s28 = scalar_lea.vmem %s1972_s10, 16  ;;  %s1729_s21 = scalar_lea.vmem %s1972_s10, 32 }
  0x30   : > { %p1723_p10 = scmp.ne.s32.totalorder %s1972_s10, %s1722_s28  ;;  %p1730_p13 = scmp.lt.s32.totalorder %s1972_s10, %s1972_s10 }
  0x31   : > { %p1731_p0 = scmp.lt.s32.totalorder %s1729_s21, %s1722_s28 }
  0x32   : > { %p1725_p11 = pnand %p1723_p10, %p1995_p8 }
  0x33   : > { %p1732_p1 = por %p1731_p0, %p1730_p13 }
  0x34   : > { %p1726_p12 = pneg %p1725_p11 }
  0x36   : > { %p1733_p4 = pnand %p1732_p1, %p1726_p12 }
  0x38   : > { %1736 = shalt.err (!%p1733_p4)
}
  0x39   : > { %1616 = dma.hbm_to_vmem [thread:$0]  (!%p1976_p5), %s2210_s4, 16, %s1972_s10, [#allocation8]  }
  0x3a   : > { %p2222_p7 = scmp.ne.s32.totalorder %s2220_s13, 0  ;;  %s1891_s27 = smov [#allocation2]  }
  0x3b   : > { %s241_s29 = sshll.u32 %s1891_s27, 4  ;;  %s1737_s15 = scalar_lea.hbm %s2207_s1, 128  ;;  %s242_s29 = int_to_ptr.vmem [resolvable:$true] %s241_s29 }
  0x3c   : > { %s2228_s12 = smov (%p2222_p7, %s40_s12), 0  ;;  %p1738_p9 = scmp.ne.s32.totalorder %s2207_s1, %s1737_s15 }
  0x3d   : > { %p1744_p6 = scmp.lt.u32.totalorder %s1737_s15, %s2207_s1 }
  0x3e   : > { %p1740_p2 = pnand %p1738_p9, %p1995_p8 }
  0x40   : > { %p1741_p3 = pneg %p1740_p2 }
  0x42   : > { %p1746_p10 = pnand %p1744_p6, %p1741_p3 }
  0x44   : > { %1749 = shalt.err (!%p1746_p10)
}
  0x45   : > { %s1750_s13 = scalar_lea.vmem %s242_s29, 128  ;;  %p1758_p0 = scmp.lt.s32.totalorder %s242_s29, %s242_s29 }
  0x46   : > { %p1751_p11 = scmp.ne.s32.totalorder %s242_s29, %s1750_s13  ;;  %p1759_p1 = scmp.lt.s32.totalorder %s1750_s13, %s1750_s13 }
  0x48   : > { %p1753_p12 = pnand %p1751_p11, %p1995_p8  ;;  %p1760_p4 = por %p1759_p1, %p1758_p0 }
  0x4a   : > { %p1754_p13 = pneg %p1753_p12 }
  0x4c   : > { %p1761_p7 = pnand %p1760_p4, %p1754_p13 }
  0x4e   : > { %1764 = shalt.err (!%p1761_p7)
}
  0x4f   : > { %s1892_s20 = smov 64   ;;  %s1893_s28 = smov 4  }
  0x50   : > { %1607 = dma.hbm_to_vmem [thread:$0]  (!%p1976_p5), %s2207_s1, 128, %s242_s29, [#allocation3], %s1892_s20, %s1892_s20, %s1893_s28  }
  0x51   : > { %s1894_s23 = smov [#allocation6]   ;;  %s1895_s9 = smov [#allocation9]  }
  0x52   : > { %s265_s27 = sshll.u32 %s1894_s23, 4  ;;  %s289_s14 = sshll.u32 %s1895_s9, 4  ;;  %s266_s27 = int_to_ptr.vmem [resolvable:$true] %s265_s27  ;;  %s2059_s14 = int_to_ptr.vmem [resolvable:$true] %s289_s14 }
  0x53   : > { %s1765_s17 = scalar_lea.hbm %s2209_s3, 512 }
  0x54   : > { %p1766_p9 = scmp.ne.s32.totalorder %s2209_s3, %s1765_s17  ;;  %p1772_p6 = scmp.lt.u32.totalorder %s1765_s17, %s2209_s3 }
  0x56   : > { %p1768_p2 = pnand %p1766_p9, %p1995_p8 }
  0x58   : > { %p1769_p3 = pneg %p1768_p2 }
  0x5a   : > { %p1774_p10 = pnand %p1772_p6, %p1769_p3 }
  0x5c   : > { %1777 = shalt.err (!%p1774_p10)
}
  0x5d   : > { %s1778_s21 = scalar_lea.vmem %s266_s27, 512  ;;  %p1786_p0 = scmp.lt.s32.totalorder %s266_s27, %s266_s27 }
  0x5e   : > { %p1779_p11 = scmp.ne.s32.totalorder %s266_s27, %s1778_s21  ;;  %p1787_p1 = scmp.lt.s32.totalorder %s1778_s21, %s1778_s21 }
  0x60   : > { %p1781_p12 = pnand %p1779_p11, %p1995_p8  ;;  %p1788_p4 = por %p1787_p1, %p1786_p0 }
  0x62   : > { %p1782_p13 = pneg %p1781_p12 }
  0x64   : > { %p1789_p7 = pnand %p1788_p4, %p1782_p13 }
  0x66   : > { %1792 = shalt.err (!%p1789_p7)
}
  0x67   : > { %1613 = dma.hbm_to_vmem [thread:$0]  (!%p1976_p5), %s2209_s3, 512, %s266_s27, [#allocation5], %s1892_s20, %s1892_s20, %s1893_s28  }
  0x68   : > { %s1793_s16 = scalar_lea.hbm %s2211_s5, 8192 }
  0x69   : > { %p1794_p9 = scmp.ne.s32.totalorder %s2211_s5, %s1793_s16  ;;  %p1800_p6 = scmp.lt.u32.totalorder %s1793_s16, %s2211_s5 }
  0x6b   : > { %p1796_p2 = pnand %p1794_p9, %p1995_p8 }
  0x6d   : > { %p1797_p3 = pneg %p1796_p2 }
  0x6f   : > { %p1802_p10 = pnand %p1800_p6, %p1797_p3 }
  0x71   : > { %1805 = shalt.err (!%p1802_p10)
}
  0x72   : > { %s1806_s20 = scalar_lea.vmem %s2059_s14, 8192  ;;  %p1814_p0 = scmp.lt.s32.totalorder %s2059_s14, %s2059_s14 }
  0x73   : > { %p1807_p11 = scmp.ne.s32.totalorder %s2059_s14, %s1806_s20  ;;  %p1815_p1 = scmp.lt.s32.totalorder %s1806_s20, %s1806_s20 }
  0x75   : > { %p1809_p12 = pnand %p1807_p11, %p1995_p8  ;;  %p1816_p4 = por %p1815_p1, %p1814_p0 }
  0x77   : > { %p1810_p13 = pneg %p1809_p12 }
  0x79   : > { %p1817_p7 = pnand %p1816_p4, %p1810_p13 }
  0x7b   : > { %1820 = shalt.err (!%p1817_p7)
}
  0x7c   : > { %s1896_s28 = smov 512   ;;  %s1897_s27 = smov 32  }
  0x7d   : > { %1619 = dma.hbm_to_vmem [thread:$0]  (!%p1976_p5), %s2211_s5, 8192, %s2059_s14, [#allocation8], %s1896_s28, %s1896_s28, %s1897_s27  }
  0x7e   : > { %s1898_s22 = smov [#allocation10]   ;;  %s1821_s16 = scalar_lea.hbm %s2212_s6, 128 }
  0x7f   : > { %s303_s23 = sshll.u32 %s1898_s22, 4  ;;  %p1822_p9 = scmp.ne.s32.totalorder %s2212_s6, %s1821_s16  ;;  %s304_s23 = int_to_ptr.vmem [resolvable:$true] %s303_s23 }
  0x80   : > { %p1828_p6 = scmp.lt.u32.totalorder %s1821_s16, %s2212_s6 }
  0x81   : > { %p1824_p2 = pnand %p1822_p9, %p1995_p8 }
  0x83   : > { %p1825_p3 = pneg %p1824_p2 }
  0x85   : > { %p1830_p10 = pnand %p1828_p6, %p1825_p3 }
  0x87   : > { %1833 = shalt.err (!%p1830_p10)
}
  0x88   : > { %s1834_s14 = scalar_lea.vmem %s304_s23, 128  ;;  %p1842_p0 = scmp.lt.s32.totalorder %s304_s23, %s304_s23 }
  0x89   : > { %p1835_p11 = scmp.ne.s32.totalorder %s304_s23, %s1834_s14  ;;  %p1843_p1 = scmp.lt.s32.totalorder %s1834_s14, %s1834_s14 }
  0x8b   : > { %p1837_p12 = pnand %p1835_p11, %p1995_p8  ;;  %p1844_p4 = por %p1843_p1, %p1842_p0 }
  0x8d   : > { %p1838_p13 = pneg %p1837_p12 }
  0x8f   : > { %p1845_p7 = pnand %p1844_p4, %p1838_p13 }
  0x91   : > { %1848 = shalt.err (!%p1845_p7)
}
  0x92   : > { %1622 = dma.hbm_to_vmem [thread:$0]  (!%p1976_p5), %s2212_s6, 128, %s304_s23, [#allocation11]  }
  0x93   : > { %p2223_p9 = scmp.ne.s32.totalorder %s2218_s8, 0 }
  0x94   : > { %p2224_p2 = scmp.ne.s32.totalorder (!%p2223_p9), %s2217_s30, 0 }
  0x95   : > { %331 = sbr.rel (%p2223_p9) target bundleno = 888 (0x378), region = 48 }
  0x9c   : > { %1862 = dma.done.wait (%p2224_p2), [#allocation3], 128  }
  0x9d   : > { %1864 = vsyncadd (%p2224_p2), [#allocation3], 4294967168 }
  0x9e   : > { %1866 = dma.done.wait (%p2224_p2), [#allocation5], 528  }
  0x9f   : > { %1868 = vsyncadd (%p2224_p2), [#allocation5], 4294966768 }
  0xa0   : > { %1870 = dma.done.wait (%p2224_p2), [#allocation8], 8208  }
  0xa1   : > { %1872 = vsyncadd (%p2224_p2), [#allocation8], 4294959088 }
  0xa2   : > { %1874 = dma.done.wait (%p2224_p2), [#allocation11], 128  }
  0xa3   : > { %1876 = vsyncadd (%p2224_p2), [#allocation11], 4294967168  ;;  %vm437_vm0 = vcmask 1043456   ;;  %v1899_v0 = vmov 0.0   ;;  %p393_p5 = scmp.lt.s32.totalorder %s1879_s24, 1  ;;  %vm1900_vm1 = vmmov 0  }
  0xa4   : > { %1562 = vmatprep.subr.bf16.mxu0 %v1899_v0  ;;  %1568 = vmatprep.subr.bf16.mxu1 %v1899_v0  ;;  %vm438_vm2 = vcmask 1044480   ;;  %v1901_v1 = vmov 65535   ;;  %v1675_v4 = vld [vmem:[#allocation2] sm:$0x1f]   ;;  %v1677_v6 = vld [vmem:[#allocation6] sm:$0xff]   ;;  %vm433_vm3 = vcmask 72704  }
  0xa5   : > { %1564 = vmatprep.mubr.msk.bf16.mxu0 %vm1900_vm1, %v1899_v0  ;;  %1576 = vmatprep.mubr.msk.bf16.mxu1 %vm1900_vm1, %v1899_v0  ;;  %v439_v2 = vsel %vm437_vm0, 4294967295, %v1901_v1  ;;  %s2230_s24 = smov (!%p393_p5, %s1879_s24), 1  ;;  %v1678_v8 = vld [vmem:[#allocation6 + $0x8] sm:$0xff]   ;;  %v1679_v9 = vld [vmem:[#allocation6 + $0x10] sm:$0xff]   ;;  %v1680_v10 = vld [vmem:[#allocation6 + $0x18] sm:$0xff]   ;;  %vm527_vm4 = vcmask 523264  }
  0xa6   : > { %s1554_s8 = sshll.u32 %s2230_s24, 3  ;;  %v440_v3 = vsel %vm438_vm2, %v439_v2, 0  ;;  %1569 = vmatpush3.bf16.msra.mxu1 %v1677_v6  ;;  %v575_v11 = vld [vmem:[#allocation9] sm:$0xff]  ;;  %v576_v13 = vld [vmem:[#allocation9 + $0x8] sm:$0xff]  ;;  %v1478_v39 = vld [vmem:[#allocation4] ss:$0 sm:$0xff] }
  0xa7   : > { %s400_s19 = scalar_lea.vmem %s2206_s0, %s1554_s8  ;;  %v442_v5 = vand.u32 %v1675_v4, %v440_v3  ;;  %1570 = vmatprep.subr.bf16.mxu1 %v1899_v0  ;;  %v579_v12 = vld [vmem:[#allocation9 + $0x20] sm:$0xff]  ;;  %v580_v16 = vld [vmem:[#allocation9 + $0x28] sm:$0xff]  ;;  %s410_s21 = scalar_lea.vmem %s2213_s7, %s1554_s8 }
  0xa8   : > { %v1676_v7 = vld [vmem:[%s400_s19] sm:$0xff]   ;;  %v1488_v14 = vcombine.low %v575_v11, %v579_v12  ;;  %v1489_v15 = vcombine.high %v575_v11, %v579_v12  ;;  %v583_v17 = vld [vmem:[#allocation9 + $0x40] sm:$0xff]  ;;  %v1490_v19 = vcombine.low %v576_v13, %v580_v16  ;;  %v1491_v20 = vcombine.high %v576_v13, %v580_v16  ;;  %v584_v46 = vld [vmem:[#allocation9 + $0x48] sm:$0xff] }
  0xa9   : > { %1563 = vmatpush3.bf16.msra.mxu0 %v442_v5  ;;  %v587_v18 = vld [vmem:[#allocation9 + $0x60] sm:$0xff]  ;;  %v588_v47 = vld [vmem:[#allocation9 + $0x68] sm:$0xff] }
  0xaa   : > { %1571 = vmatpush3.bf16.msra.mxu1 %v1678_v8  ;;  %v1497_v21 = vcombine.high %v583_v17, %v587_v18  ;;  %1001 = vmatprep.subr.bf16.mxu0 %v1489_v15  ;;  %v1496_v22 = vcombine.low %v583_v17, %v587_v18  ;;  %v591_v23 = vld [vmem:[#allocation9 + $0x80] sm:$0xff]  ;;  %v1499_v51 = vcombine.high %v584_v46, %v588_v47  ;;  %v592_v52 = vld [vmem:[#allocation9 + $0x88] sm:$0xff] }
  0xab   : > { %1572 = vmatprep.subr.bf16.mxu1 %v1899_v0  ;;  %v595_v24 = vld [vmem:[#allocation9 + $0xa0] sm:$0xff]  ;;  %v596_v53 = vld [vmem:[#allocation9 + $0xa8] sm:$0xff]  ;;  %v1498_v54 = vcombine.low %v584_v46, %v588_v47  ;;  %v593_v46 = vld [vmem:[#allocation9 + $0x90] sm:$0xff] }
  0xac   : > { %1565 = vmatmul.mubr.msk.bf16.vlgmr.msra.gmra.mrb[0].mxu0 %vm433_vm3, %v1676_v7  ;;  %v1505_v25 = vcombine.high %v591_v23, %v595_v24  ;;  %v1504_v26 = vcombine.low %v591_v23, %v595_v24  ;;  %v599_v27 = vld [vmem:[#allocation9 + $0xc0] sm:$0xff]  ;;  %v1507_v55 = vcombine.high %v592_v52, %v596_v53  ;;  %v600_v56 = vld [vmem:[#allocation9 + $0xc8] sm:$0xff]  ;;  %v1506_v58 = vcombine.low %v592_v52, %v596_v53  ;;  %v578_v23 = vld [vmem:[#allocation9 + $0x18] sm:$0xff] }
  0xad   : > { %1002 = vmatpush1.bf16.msra.mxu0 %v1488_v14  ;;  %v603_v28 = vld [vmem:[#allocation9 + $0xe0] sm:$0xff]  ;;  %v604_v57 = vld [vmem:[#allocation9 + $0xe8] sm:$0xff]  ;;  %v597_v47 = vld [vmem:[#allocation9 + $0xb0] sm:$0xff] }
  0xae   : > { %1573 = vmatpush3.bf16.msra.mxu1 %v1679_v9  ;;  %1003 = vmatprep.subr.bf16.mxu0 %v1497_v21  ;;  %v1513_v29 = vcombine.high %v599_v27, %v603_v28  ;;  %v1512_v30 = vcombine.low %v599_v27, %v603_v28  ;;  %v607_v31 = vld [vmem:[#allocation9 + $0x100] sm:$0xff]  ;;  %v1515_v59 = vcombine.high %v600_v56, %v604_v57  ;;  %v608_v60 = vld [vmem:[#allocation9 + $0x108] sm:$0xff]  ;;  %v577_v21 = vld [vmem:[#allocation9 + $0x10] sm:$0xff] }
  0xaf   : > { %1574 = vmatprep.subr.bf16.mxu1 %v1899_v0  ;;  %v611_v32 = vld [vmem:[#allocation9 + $0x120] sm:$0xff]  ;;  %v612_v61 = vld [vmem:[#allocation9 + $0x128] sm:$0xff]  ;;  %v1514_v62 = vcombine.low %v600_v56, %v604_v57  ;;  %v1509_v52 = vcombine.high %v593_v46, %v597_v47  ;;  %v602_v56 = vld [vmem:[#allocation9 + $0xd8] sm:$0xff] }
  0xb0   : > { %v1521_v33 = vcombine.high %v607_v31, %v611_v32  ;;  %v1520_v34 = vcombine.low %v607_v31, %v611_v32  ;;  %v615_v35 = vld [vmem:[#allocation9 + $0x140] sm:$0xff]  ;;  %v1523_v63 = vcombine.high %v608_v60, %v612_v61  ;;  %v616_v0 = vld [vmem:[#allocation9 + $0x148] sm:$0xff]  ;;  %v1522_v2 = vcombine.low %v608_v60, %v612_v61  ;;  %v606_v57 = vld [vmem:[#allocation9 + $0xf8] sm:$0xff] }
  0xb1   : > { %1004 = vmatpush1.bf16.msra.mxu0 %v1496_v22  ;;  %v619_v36 = vld [vmem:[#allocation9 + $0x160] sm:$0xff]  ;;  %v620_v1 = vld [vmem:[#allocation9 + $0x168] sm:$0xff]  ;;  %v581_v22 = vld [vmem:[#allocation9 + $0x30] sm:$0xff]  ;;  %v1519_v61 = vcombine.high %v602_v56, %v606_v57 }
  0xb2   : > { %1575 = vmatpush3.bf16.msra.mxu1 %v1680_v10  ;;  %1005 = vmatprep.subr.bf16.mxu0 %v1505_v25  ;;  %v1529_v37 = vcombine.high %v615_v35, %v619_v36  ;;  %v1528_v38 = vcombine.low %v615_v35, %v619_v36  ;;  %v1531_v3 = vcombine.high %v616_v0, %v620_v1  ;;  %v623_v5 = vld [vmem:[#allocation9 + $0x180] sm:$0xff]  ;;  %v624_v7 = vld [vmem:[#allocation9 + $0x188] sm:$0xff]  ;;  %v582_v25 = vld [vmem:[#allocation9 + $0x38] sm:$0xff] }
  0xb3   : > { %1044 = vmatprep.subr.bf16.mxu1 %v1491_v20  ;;  %v1530_v4 = vcombine.low %v616_v0, %v620_v1  ;;  %v627_v6 = vld [vmem:[#allocation9 + $0x1a0] sm:$0xff]  ;;  %v628_v9 = vld [vmem:[#allocation9 + $0x1a8] sm:$0xff]  ;;  %v1493_v24 = vcombine.high %v577_v21, %v581_v22  ;;  %v1494_v27 = vcombine.low %v578_v23, %v582_v25  ;;  %v1495_v28 = vcombine.high %v578_v23, %v582_v25  ;;  %v610_v0 = vld [vmem:[#allocation9 + $0x118] sm:$0xff] }
  0xb4   : > { %v1537_v8 = vcombine.high %v623_v5, %v627_v6  ;;  %v1536_v10 = vcombine.low %v623_v5, %v627_v6  ;;  %v1538_v11 = vcombine.low %v624_v7, %v628_v9  ;;  %v1539_v12 = vcombine.high %v624_v7, %v628_v9  ;;  %v631_v13 = vld [vmem:[#allocation9 + $0x1c0] sm:$0xff]  ;;  %v632_v15 = vld [vmem:[#allocation9 + $0x1c8] sm:$0xff]  ;;  %v614_v1 = vld [vmem:[#allocation9 + $0x138] sm:$0xff] }
  0xb5   : > { %1006 = vmatpush1.bf16.msra.mxu0 %v1504_v26  ;;  %v635_v14 = vld [vmem:[#allocation9 + $0x1e0] sm:$0xff]  ;;  %v636_v17 = vld [vmem:[#allocation9 + $0x1e8] sm:$0xff]  ;;  %v1492_v26 = vcombine.low %v577_v21, %v581_v22  ;;  %v1527_v5 = vcombine.high %v610_v0, %v614_v1  ;;  %v617_v6 = vld [vmem:[#allocation9 + $0x150] sm:$0xff] }
  0xb6   : > { %1007 = vmatprep.subr.bf16.mxu0 %v1513_v29  ;;  %v1545_v16 = vcombine.high %v631_v13, %v635_v14  ;;  %v1544_v18 = vcombine.low %v631_v13, %v635_v14  ;;  %v1547_v20 = vcombine.high %v632_v15, %v636_v17  ;;  %v1902_v29 = vmov 0   ;;  %v621_v7 = vld [vmem:[#allocation9 + $0x170] sm:$0xff]  ;;  %v622_v9 = vld [vmem:[#allocation9 + $0x178] sm:$0xff] }
  0xb7   : > { %1033 = vmatprep.mubr.bf16.mxu0 %v1902_v29  ;;  %v625_v14 = vld [vmem:[#allocation9 + $0x190] sm:$0xff]  ;;  %v638_v25 = vld [vmem:[#allocation9 + $0x1f8] sm:$0xff] }
  0xb8   : > { %v633_v22 = vld [vmem:[#allocation9 + $0x1d0] sm:$0xff] }
  0xb9   : > { %1008 = vmatpush1.bf16.msra.mxu0 %v1512_v30  ;;  %v1482_v30 = vld [vmem:[#allocation7] ss:$0 sm:$0xff]  ;;  %v637_v23 = vld [vmem:[#allocation9 + $0x1f0] sm:$0xff] }
  0xba   : > { %1009 = vmatprep.subr.bf16.mxu0 %v1521_v33 }
  0xbd   : > { %1010 = vmatpush1.bf16.msra.mxu0 %v1520_v34 }
  0xbe   : > { %1011 = vmatprep.subr.bf16.mxu0 %v1529_v37  ;;  %v585_v37 = vld [vmem:[#allocation9 + $0x50] sm:$0xff] }
  0xc1   : > { %1012 = vmatpush1.bf16.msra.mxu0 %v1528_v38  ;;  %v589_v38 = vld [vmem:[#allocation9 + $0x70] sm:$0xff] }
  0xc2   : > { %1013 = vmatprep.subr.bf16.mxu0 %v1537_v8  ;;  %v618_v8 = vld [vmem:[#allocation9 + $0x158] sm:$0xff] }
  0xc3   : > { %v1535_v13 = vcombine.high %v618_v8, %v622_v9 }
  0xc5   : > { %1014 = vmatpush1.bf16.msra.mxu0 %v1536_v10 }
  0xc6   : > { %1015 = vmatprep.subr.bf16.mxu0 %v1545_v16  ;;  %v626_v16 = vld [vmem:[#allocation9 + $0x198] sm:$0xff] }
  0xc9   : > { %1016 = vmatpush1.bf16.msra.mxu0 %v1544_v18  ;;  %v1532_v18 = vcombine.low %v617_v6, %v621_v7 }
  0xca   : > { %1087 = vmatprep.subr.bf16.mxu0 %v1493_v24  ;;  %v634_v24 = vld [vmem:[#allocation9 + $0x1d8] sm:$0xff] }
 0x17f   : > { %v478_v40 = vpop.f32.mrb[0].mxu0 }
 0x180   : > { %v479_v41 = vadd.f32 %v1478_v39, %v478_v40  ;;  %v1566_v42 = vpop.f32.mrb[1].mxu0  ;;  %v590_v40 = vld [vmem:[#allocation9 + $0x78] sm:$0xff] }
 0x181   : > { %v481_v43 = vpop.f32.mrb[2].mxu0 }
 0x182   : > { %v482_v44 = vadd.f32 %v1478_v39, %v481_v43  ;;  %v1567_v45 = vpop.f32.mrb[3].mxu0  ;;  %v485_v48 = vmax.f32 %v479_v41, 0.0  ;;  %v586_v39 = vld [vmem:[#allocation9 + $0x58] sm:$0xff] }
 0x183   : > { %v1503_v45 = vcombine.high %v586_v39, %v590_v40 }
 0x184   : > { %v486_v49 = vmax.f32 %v482_v44, 0.0  ;;  %v1501_v44 = vcombine.high %v585_v37, %v589_v38 }
 0x186   : > { %v487_v50 = vpack.c.bf16 %v486_v49, %v485_v48  ;;  %v594_v48 = vld [vmem:[#allocation9 + $0x98] sm:$0xff] }
 0x187   : > { %v598_v49 = vld [vmem:[#allocation9 + $0xb8] sm:$0xff] }
 0x188   : > { %1577 = vmatmul.mubr.msk.bf16.vlgmr.msra.gmra.mrb[0].mxu1 %vm527_vm4, %v487_v50  ;;  %v1500_v50 = vcombine.low %v585_v37, %v589_v38  ;;  %v1511_v53 = vcombine.high %v594_v48, %v598_v49 }
 0x189   : > { %1045 = vmatpush1.bf16.msra.mxu1 %v1490_v19  ;;  %v1546_v19 = vcombine.low %v632_v15, %v636_v17  ;;  %1076 = vmatprep.mubr.bf16.mxu1 %v1902_v29  ;;  %v629_v15 = vld [vmem:[#allocation9 + $0x1b0] sm:$0xff]  ;;  %v630_v17 = vld [vmem:[#allocation9 + $0x1b8] sm:$0xff] }
 0x18a   : > { %1046 = vmatprep.subr.bf16.mxu1 %v1499_v51  ;;  %v1502_v51 = vcombine.low %v586_v39, %v590_v40  ;;  %v1543_v21 = vcombine.high %v626_v16, %v630_v17 }
 0x18d   : > { %1047 = vmatpush1.bf16.msra.mxu1 %v1498_v54  ;;  %v601_v54 = vld [vmem:[#allocation9 + $0xd0] sm:$0xff] }
 0x18e   : > { %1048 = vmatprep.subr.bf16.mxu1 %v1507_v55  ;;  %v605_v55 = vld [vmem:[#allocation9 + $0xf0] sm:$0xff] }
 0x18f   : > { %v1517_v60 = vcombine.high %v601_v54, %v605_v55 }
 0x191   : > { %1049 = vmatpush1.bf16.msra.mxu1 %v1506_v58  ;;  %v1508_v58 = vcombine.low %v593_v46, %v597_v47 }
 0x192   : > { %1050 = vmatprep.subr.bf16.mxu1 %v1515_v59  ;;  %v1510_v59 = vcombine.low %v594_v48, %v598_v49 }
 0x195   : > { %1051 = vmatpush1.bf16.msra.mxu1 %v1514_v62  ;;  %v609_v62 = vld [vmem:[#allocation9 + $0x110] sm:$0xff] }
 0x196   : > { %1052 = vmatprep.subr.bf16.mxu1 %v1523_v63  ;;  %v613_v63 = vld [vmem:[#allocation9 + $0x130] sm:$0xff] }
 0x197   : > { %v1524_v10 = vcombine.low %v609_v62, %v613_v63 }
 0x199   : > { %1053 = vmatpush1.bf16.msra.mxu1 %v1522_v2  ;;  %v1516_v2 = vcombine.low %v601_v54, %v605_v55 }
 0x19a   : > { %1054 = vmatprep.subr.bf16.mxu1 %v1531_v3  ;;  %v1518_v3 = vcombine.low %v602_v56, %v606_v57 }
 0x19d   : > { %1055 = vmatpush1.bf16.msra.mxu1 %v1530_v4  ;;  %v1525_v4 = vcombine.high %v609_v62, %v613_v63 }
 0x19e   : > { %1056 = vmatprep.subr.bf16.mxu1 %v1539_v12  ;;  %v1533_v12 = vcombine.high %v617_v6, %v621_v7 }
 0x1a1   : > { %1057 = vmatpush1.bf16.msra.mxu1 %v1538_v11  ;;  %v1526_v11 = vcombine.low %v610_v0, %v614_v1 }
 0x1a2   : > { %1058 = vmatprep.subr.bf16.mxu1 %v1547_v20  ;;  %v1541_v20 = vcombine.high %v625_v14, %v629_v15 }
 0x1a5   : > { %1059 = vmatpush1.bf16.msra.mxu1 %v1546_v19  ;;  %v1534_v19 = vcombine.low %v618_v8, %v622_v9 }
 0x1a6   : > { %1130 = vmatprep.subr.bf16.mxu1 %v1495_v28  ;;  %v1549_v28 = vcombine.high %v633_v22, %v637_v23 }
 0x25b   : > { %v565_v31 = vpop.f32.mrb[0].mxu1 }
 0x25c   : > { %v566_v32 = vadd.f32 %v1482_v30, %v565_v31  ;;  %v1578_v33 = vpop.f32.mrb[1].mxu1  ;;  %v1550_v31 = vcombine.low %v634_v24, %v638_v25 }
 0x25d   : > { %v568_v34 = vpop.f32.mrb[2].mxu1 }
 0x25e   : > { %v569_v35 = vadd.f32 %v1482_v30, %v568_v34  ;;  %v1579_v36 = vpop.f32.mrb[3].mxu1  ;;  %v572_v41 = vmax.f32 %v566_v32, 0.0  ;;  %v1548_v30 = vcombine.low %v633_v22, %v637_v23  ;;  %v641_v32 = vlaneseq }
 0x25f   : > { %v2158_v36 = vld [vmem:[#allocation10] sm:$0xff] }
 0x260   : > { %v573_v42 = vmax.f32 %v569_v35, 0.0  ;;  %v2154_v33 = vshrl.u32 %v641_v32, 7 }
 0x262   : > { %v2148_v43 = vpack.c.bf16 %v573_v42, %v572_v41  ;;  %v643_v34 = vsub.s32 0, %v2154_v33  ;;  %v651_v35 = vsub.s32 2, %v2154_v33  ;;  %v647_v37 = vsub.s32 1, %v2154_v33 }
 0x263   : > { %v655_v38 = vsub.s32 3, %v2154_v33 }
 0x264   : > { %1034 = vmatmul.mubr.bf16.vlgmr.msra.gmra.mrb[4].mxu0 %v2148_v43  ;;  %1077 = vmatmul.mubr.bf16.vlgmr.msra.gmra.mrb[4].mxu1 %v2148_v43  ;;  %v644_v39 = vrot.slane %v2158_v36, %v643_v34  ;;  %v652_v40 = vrot.slane %v2158_v36, %v651_v35  ;;  %v648_v41 = vrot.slane %v2158_v36, %v647_v37 }
 0x265   : > { %1088 = vmatpush1.bf16.msra.mxu0 %v1492_v26  ;;  %1131 = vmatpush1.bf16.msra.mxu1 %v1494_v27  ;;  %v1540_v26 = vcombine.low %v625_v14, %v629_v15  ;;  %v1542_v27 = vcombine.low %v626_v16, %v630_v17  ;;  %v656_v42 = vrot.slane %v2158_v36, %v655_v38  ;;  %v1903_v14 = vmov 1966171168  }
 0x266   : > { %1089 = vmatprep.subr.bf16.mxu0 %v1501_v44  ;;  %1132 = vmatprep.subr.bf16.mxu1 %v1503_v45  ;;  %v1264_v15 = vunpack.c.l.s4 %v1903_v14 }
 0x267   : > { %1119 = vmatprep.mubr.bf16.mxu0 %v1902_v29  ;;  %1162 = vmatprep.mubr.bf16.mxu1 %v1902_v29  ;;  %v1551_v29 = vcombine.high %v634_v24, %v638_v25 }
 0x268   : > { %v1265_v24 = vunpack.c.0.s8 %v1264_v15 }
 0x269   : > { %1090 = vmatpush1.bf16.msra.mxu0 %v1500_v50  ;;  %1133 = vmatpush1.bf16.msra.mxu1 %v1502_v51 }
 0x26a   : > { %1091 = vmatprep.subr.bf16.mxu0 %v1509_v52  ;;  %1134 = vmatprep.subr.bf16.mxu1 %v1511_v53  ;;  %v2167_v34 = vsub.s32 %v1265_v24, %v2154_v33 }
 0x26d   : > { %1092 = vmatpush1.bf16.msra.mxu0 %v1508_v58  ;;  %1135 = vmatpush1.bf16.msra.mxu1 %v1510_v59 }
 0x26e   : > { %1093 = vmatprep.subr.bf16.mxu0 %v1517_v60  ;;  %1136 = vmatprep.subr.bf16.mxu1 %v1519_v61 }
 0x271   : > { %1094 = vmatpush1.bf16.msra.mxu0 %v1516_v2  ;;  %1137 = vmatpush1.bf16.msra.mxu1 %v1518_v3 }
 0x272   : > { %1095 = vmatprep.subr.bf16.mxu0 %v1525_v4  ;;  %1138 = vmatprep.subr.bf16.mxu1 %v1527_v5 }
 0x275   : > { %1096 = vmatpush1.bf16.msra.mxu0 %v1524_v10  ;;  %1139 = vmatpush1.bf16.msra.mxu1 %v1526_v11 }
 0x276   : > { %1097 = vmatprep.subr.bf16.mxu0 %v1533_v12  ;;  %1140 = vmatprep.subr.bf16.mxu1 %v1535_v13 }
 0x279   : > { %1098 = vmatpush1.bf16.msra.mxu0 %v1532_v18  ;;  %1141 = vmatpush1.bf16.msra.mxu1 %v1534_v19 }
 0x27a   : > { %1099 = vmatprep.subr.bf16.mxu0 %v1541_v20  ;;  %1142 = vmatprep.subr.bf16.mxu1 %v1543_v21 }
 0x27d   : > { %1100 = vmatpush1.bf16.msra.mxu0 %v1540_v26  ;;  %1143 = vmatpush1.bf16.msra.mxu1 %v1542_v27 }
 0x27e   : > { %1101 = vmatprep.subr.bf16.mxu0 %v1549_v28  ;;  %1144 = vmatprep.subr.bf16.mxu1 %v1551_v29 }
 0x281   : > { %1102 = vmatpush1.bf16.msra.mxu0 %v1548_v30  ;;  %1145 = vmatpush1.bf16.msra.mxu1 %v1550_v31 }
 0x284   : > { %1120 = vmatmul.mubr.bf16.vlgmr.msra.gmra.mrb[8].mxu0 %v2148_v43  ;;  %1163 = vmatmul.mubr.bf16.vlgmr.msra.gmra.mrb[8].mxu1 %v2148_v43 }
 0x337   : > { %v1035_v43 = vpop.f32.mrb[4].mxu0  ;;  %v1078_v44 = vpop.f32.mrb[4].mxu1 }
 0x338   : > { %v1036_v45 = vadd.f32 %v1035_v43, %v644_v39  ;;  %v1079_v46 = vadd.f32 %v1078_v44, %v652_v40  ;;  %v1037_v47 = vpop.f32.mrb[5].mxu0  ;;  %v1080_v48 = vpop.f32.mrb[5].mxu1  ;;  %v663_v44 = vsub.s32 5, %v2154_v33 }
 0x339   : > { %v1038_v49 = vadd.f32 %v1037_v47, %v648_v41  ;;  %v1081_v50 = vadd.f32 %v1080_v48, %v656_v42  ;;  %v1039_v51 = vpop.f32.mrb[6].mxu0  ;;  %v1082_v52 = vpop.f32.mrb[6].mxu1 }
 0x33a   : > { %v1040_v53 = vadd.f32 %v1039_v51, %v644_v39  ;;  %v1083_v54 = vadd.f32 %v1082_v52, %v652_v40  ;;  %v1041_v55 = vpop.f32.mrb[7].mxu0  ;;  %v1084_v56 = vpop.f32.mrb[7].mxu1  ;;  %v1173_v59 = vmax.f32 %v1036_v45, 0.0  ;;  %v1175_v60 = vmax.f32 %v1079_v46, 0.0 }
 0x33b   : > { %v1042_v57 = vadd.f32 %v1041_v55, %v648_v41  ;;  %v1085_v58 = vadd.f32 %v1084_v56, %v656_v42  ;;  %v1174_v63 = vmax.f32 %v1038_v49, 0.0  ;;  %v1176_v0 = vmax.f32 %v1081_v50, 0.0 }
 0x33c   : > { %v1181_v61 = vmax.f32 %v1040_v53, 0.0  ;;  %v1183_v62 = vmax.f32 %v1083_v54, 0.0  ;;  %v659_v41 = vsub.s32 4, %v2154_v33  ;;  %v667_v42 = vsub.s32 6, %v2154_v33 }
 0x33d   : > { %v1182_v1 = vmax.f32 %v1042_v57, 0.0  ;;  %v1184_v2 = vmax.f32 %v1085_v58, 0.0  ;;  %v671_v45 = vsub.s32 7, %v2154_v33  ;;  %v664_v48 = vrot.slane %v2158_v36, %v663_v44 }
 0x33e   : > { %v1189_v3 = vmax.f32 %v1173_v59, %v1181_v61  ;;  %v1203_v4 = vmax.f32 %v1175_v60, %v1183_v62  ;;  %v660_v46 = vrot.slane %v2158_v36, %v659_v41  ;;  %v668_v47 = vrot.slane %v2158_v36, %v667_v42 }
 0x33f   : > { %v1196_v5 = vmax.f32 %v1174_v63, %v1182_v1  ;;  %v1210_v6 = vmax.f32 %v1176_v0, %v1184_v2  ;;  %v672_v49 = vrot.slane %v2158_v36, %v671_v45 }
 0x340   : > { %v1190_v7 = vrot.slane %v1189_v3, 4  ;;  %v1204_v8 = vrot.slane %v1203_v4, 4 }
 0x341   : > { %v1197_v9 = vrot.slane %v1196_v5, 4  ;;  %v1211_v10 = vrot.slane %v1210_v6, 4 }
 0x342   : > { %v1191_v11 = vmax.f32 %v1189_v3, %v1190_v7  ;;  %v1205_v12 = vmax.f32 %v1203_v4, %v1204_v8 }
 0x343   : > { %v1198_v13 = vmax.f32 %v1196_v5, %v1197_v9  ;;  %v1212_v16 = vmax.f32 %v1210_v6, %v1211_v10 }
 0x344   : > { %v1192_v17 = vrot.slane %v1191_v11, 2  ;;  %v1206_v18 = vrot.slane %v1205_v12, 2 }
 0x345   : > { %v1199_v19 = vrot.slane %v1198_v13, 2  ;;  %v1213_v20 = vrot.slane %v1212_v16, 2 }
 0x346   : > { %v1193_v21 = vmax.f32 %v1191_v11, %v1192_v17  ;;  %v1207_v22 = vmax.f32 %v1205_v12, %v1206_v18 }
 0x347   : > { %v1200_v23 = vmax.f32 %v1198_v13, %v1199_v19  ;;  %v1214_v25 = vmax.f32 %v1212_v16, %v1213_v20 }
 0x348   : > { %v1194_v26 = vrot.slane %v1193_v21, 1  ;;  %v1208_v27 = vrot.slane %v1207_v22, 1 }
 0x349   : > { %v1201_v28 = vrot.slane %v1200_v23, 1  ;;  %v1215_v29 = vrot.slane %v1214_v25, 1 }
 0x34a   : > { %v1195_v30 = vmax.f32 %v1193_v21, %v1194_v26  ;;  %v1209_v31 = vmax.f32 %v1207_v22, %v1208_v27 }
 0x34b   : > { %v1202_v32 = vmax.f32 %v1200_v23, %v1201_v28  ;;  %v1216_v35 = vmax.f32 %v1214_v25, %v1215_v29 }
 0x34d   : > { %v1259_v37 = vcombine.low %v1195_v30, %v1202_v32  ;;  %v1260_v38 = vcombine.low %v1209_v31, %v1216_v35 }
 0x34f   : > { %v2170_v39 = vrot.slane %v1259_v37, %v2167_v34  ;;  %v2173_v40 = vrot.slane %v1260_v38, %v2167_v34 }
 0x351   : > { %v1291_v43 = vcombine.low %v2170_v39, %v2173_v40 }
 0x357   : > { %v1121_v50 = vpop.f32.mrb[8].mxu0  ;;  %v1164_v51 = vpop.f32.mrb[8].mxu1 }
 0x358   : > { %v1122_v52 = vadd.f32 %v1121_v50, %v660_v46  ;;  %v1165_v53 = vadd.f32 %v1164_v51, %v668_v47  ;;  %v1123_v54 = vpop.f32.mrb[9].mxu0  ;;  %v1166_v55 = vpop.f32.mrb[9].mxu1 }
 0x359   : > { %v1124_v56 = vadd.f32 %v1123_v54, %v664_v48  ;;  %v1167_v57 = vadd.f32 %v1166_v55, %v672_v49  ;;  %v1125_v58 = vpop.f32.mrb[10].mxu0  ;;  %v1168_v59 = vpop.f32.mrb[10].mxu1 }
 0x35a   : > { %v1126_v60 = vadd.f32 %v1125_v58, %v660_v46  ;;  %v1169_v33 = vadd.f32 %v1168_v59, %v668_v47  ;;  %v1127_v61 = vpop.f32.mrb[11].mxu0  ;;  %v1170_v62 = vpop.f32.mrb[11].mxu1  ;;  %v1177_v1 = vmax.f32 %v1122_v52, 0.0  ;;  %v1179_v2 = vmax.f32 %v1165_v53, 0.0 }
 0x35b   : > { %v1128_v63 = vadd.f32 %v1127_v61, %v664_v48  ;;  %v1171_v0 = vadd.f32 %v1170_v62, %v672_v49  ;;  %v1178_v4 = vmax.f32 %v1124_v56, 0.0  ;;  %v1180_v5 = vmax.f32 %v1167_v57, 0.0 }
 0x35c   : > { %v1185_v3 = vmax.f32 %v1126_v60, 0.0  ;;  %v1187_v36 = vmax.f32 %v1169_v33, 0.0  ;;  %v1299_v47 = vrot.slane %v1291_v43, %v2167_v34 }
 0x35d   : > { %v1186_v6 = vmax.f32 %v1128_v63, 0.0  ;;  %v1188_v7 = vmax.f32 %v1171_v0, 0.0 }
 0x35e   : > { %v1217_v8 = vmax.f32 %v1177_v1, %v1185_v3  ;;  %v1231_v9 = vmax.f32 %v1179_v2, %v1187_v36 }
 0x35f   : > { %v1224_v10 = vmax.f32 %v1178_v4, %v1186_v6  ;;  %v1238_v11 = vmax.f32 %v1180_v5, %v1188_v7 }
 0x360   : > { %v1218_v12 = vrot.slane %v1217_v8, 4  ;;  %v1232_v13 = vrot.slane %v1231_v9, 4 }
 0x361   : > { %v1225_v14 = vrot.slane %v1224_v10, 4  ;;  %v1239_v15 = vrot.slane %v1238_v11, 4 }
 0x362   : > { %v1219_v16 = vmax.f32 %v1217_v8, %v1218_v12  ;;  %v1233_v17 = vmax.f32 %v1231_v9, %v1232_v13 }
 0x363   : > { %v1226_v18 = vmax.f32 %v1224_v10, %v1225_v14  ;;  %v1240_v19 = vmax.f32 %v1238_v11, %v1239_v15 }
 0x364   : > { %v1220_v20 = vrot.slane %v1219_v16, 2  ;;  %v1234_v21 = vrot.slane %v1233_v17, 2 }
 0x365   : > { %v1227_v22 = vrot.slane %v1226_v18, 2  ;;  %v1241_v23 = vrot.slane %v1240_v19, 2 }
 0x366   : > { %v1221_v24 = vmax.f32 %v1219_v16, %v1220_v20  ;;  %v1235_v25 = vmax.f32 %v1233_v17, %v1234_v21 }
 0x367   : > { %v1228_v26 = vmax.f32 %v1226_v18, %v1227_v22  ;;  %v1242_v27 = vmax.f32 %v1240_v19, %v1241_v23 }
 0x368   : > { %v1222_v28 = vrot.slane %v1221_v24, 1  ;;  %v1236_v29 = vrot.slane %v1235_v25, 1 }
 0x369   : > { %v1229_v30 = vrot.slane %v1228_v26, 1  ;;  %v1243_v31 = vrot.slane %v1242_v27, 1 }
 0x36a   : > { %v1223_v32 = vmax.f32 %v1221_v24, %v1222_v28  ;;  %v1237_v35 = vmax.f32 %v1235_v25, %v1236_v29 }
 0x36b   : > { %v1230_v37 = vmax.f32 %v1228_v26, %v1229_v30  ;;  %v1244_v38 = vmax.f32 %v1242_v27, %v1243_v31 }
 0x36d   : > { %v1261_v41 = vcombine.low %v1223_v32, %v1230_v37  ;;  %v1262_v42 = vcombine.low %v1237_v35, %v1244_v38 }
 0x36f   : > { %v1283_v44 = vrot.slane %v1261_v41, %v2167_v34  ;;  %v1290_v45 = vrot.slane %v1262_v42, %v2167_v34 }
 0x371   : > { %v1292_v46 = vcombine.low %v1283_v44, %v1290_v45 }
 0x373   : > { %v1306_v48 = vrot.slane %v1292_v46, %v2167_v34 }
 0x375   : > { %v1307_v49 = vcombine.low %v1299_v47, %v1306_v48 }
 0x377   : > { %1310 = vst [vmem:[%s410_s21] sm:$0xff] %v1307_v49 }
 0x378 PF: > { %s21_s26 = sadd.s32 1, %s1887_s26   ;;  %s2225_s24 = smov %s1883_s25 }
 0x379   : > { %p18_p8 = scmp.ge.s32.totalorder %s21_s26, 4   ;;  %s2226_s25 = smov %s2228_s12 }
 0x37b   :  { %20 = sbr.rel (!%p18_p8) target bundleno = 5 (0x5), region = 107 }
 0x382   :  { %1338 = vsyncpa [#allocation3], 1 }
 0x383   :  { %1340 = vsyncpa [#allocation3 + $0x1], 1 }
 0x384   :  { %1341 = vsyncpa [#allocation5], 1 }
 0x385   :  { %1342 = vsyncpa [#allocation8], 1 }
 0x386   :  { %1343 = vsyncpa [#allocation11], 1 }

// kernel: segmentation_pointnet.7
= control target key start
LH: loop header
LB: loop body
LE: loop exit
PB: predicated region body
PF: predicated region fallthrough
CT: control target
= control target key end

     0   :  { %s1560_s24 = smov 0   ;;  %s1562_s25 = smov 0   ;;  %s1871_s0 = inlined_call_operand.vmem [shape: bf16[2,16,64], index: 0, kind: input, shape index: {}]   ;;  %s1872_s1 = inlined_call_operand.vmem [shape: bf16[64,64], index: 1, kind: input, shape index: {}]   ;;  %s1873_s2 = inlined_call_operand.vmem [shape: f32[1,64], index: 2, kind: input, shape index: {}]   ;;  %s1874_s3 = inlined_call_operand.vmem [shape: bf16[64,128], index: 3, kind: input, shape index: {}]   ;;  %s1875_s4 = inlined_call_operand.vmem [shape: f32[1,128], index: 4, kind: input, shape index: {}]   ;;  %s1876_s5 = inlined_call_operand.vmem [shape: bf16[128,1024], index: 5, kind: input, shape index: {}]   ;;  %s1877_s6 = inlined_call_operand.vmem [shape: f32[1,1024], index: 6, kind: input, shape index: {}]   ;;  %s1878_s7 = inlined_call_operand.vmem [shape: f32[2,1,1,1024], index: 7, kind: output, shape index: {}]  }
   0x1   :  { %s1564_s26 = smov 0  }
   0x2 LB: > { %s36_s27 = sadd.s32 1, %s1510_s25  ;;  %p1336_p0 = scmp.ge.s32.totalorder %s1514_s26, 1  ;;  %s1514_s26 = sphi %s1564_s26, %s17_s26   ;;  %s1510_s25 = sphi %s1562_s25, %s1880_s25   ;;  %s1506_s24 = sphi %s1560_s24, %s1879_s24  }
   0x3   : > { %p38_p1 = scmp.ge.s32.totalorder %s36_s27, 2  ;;  %p269_p2 = scmp.lt.s32.totalorder %s1514_s26, 3 }
   0x5   : > { %s1882_s27 = smov (%p38_p1, %s36_s27), 0  ;;  %p270_p3 = pnand %p1336_p0, %p269_p2 }
   0x6   : > { %v1483_v0 = vld [vmem:[%s1872_s1] sm:$0xff] (!%p270_p3)   ;;  %v1516_v1 = vmov (!%p270_p3), 0.0   ;;  %v1484_v2 = vld [vmem:[%s1872_s1 + $0x8] sm:$0xff] (!%p270_p3)   ;;  %vm1517_vm0 = vmmov (!%p270_p3), 0   ;;  %p311_p4 = scmp.lt.s32.totalorder (!%p270_p3), %s1506_s24, 1  ;;  %v1485_v4 = vld [vmem:[%s1872_s1 + $0x10] sm:$0xff] (!%p270_p3)  }
   0x7   : > { %273 = sbr.rel (%p270_p3) target bundleno = 739 (0x2e3), region = 48  ;;  %1430 = vmatprep.subr.bf16.mxu0 (!%p270_p3), %v1516_v1  ;;  %1442 = vmatprep.subr.bf16.mxu1 (!%p270_p3), %v1516_v1  ;;  %v1488_v3 = vld [vmem:[%s1874_s3] sm:$0xff] (!%p270_p3)   ;;  %v1489_v5 = vld [vmem:[%s1874_s3 + $0x8] sm:$0xff] (!%p270_p3)   ;;  %v1486_v6 = vld [vmem:[%s1872_s1 + $0x18] sm:$0xff] (!%p270_p3)   ;;  %vm376_vm1 = vcmask (!%p270_p3), 523264  }
   0x8   : > { %1431 = vmatpush3.bf16.msra.mxu0 (!%p270_p3), %v1483_v0  ;;  %1438 = vmatprep.mubr.msk.bf16.mxu0 (!%p270_p3), %vm1517_vm0, %v1516_v1  ;;  %v1490_v8 = vld [vmem:[%s1874_s3 + $0x10] sm:$0xff] (!%p270_p3)   ;;  %v1491_v9 = vld [vmem:[%s1874_s3 + $0x18] sm:$0xff] (!%p270_p3)   ;;  %v510_v10 = vld [vmem:[%s1876_s5] sm:$0xff] (!%p270_p3) }
   0x9   : > { %1432 = vmatprep.subr.bf16.mxu0 (!%p270_p3), %v1516_v1  ;;  %1450 = vmatprep.mubr.msk.bf16.mxu1 (!%p270_p3), %vm1517_vm0, %v1516_v1  ;;  %v514_v11 = vld [vmem:[%s1876_s5 + $0x20] sm:$0xff] (!%p270_p3)  ;;  %v511_v12 = vld [vmem:[%s1876_s5 + $0x8] sm:$0xff] (!%p270_p3) }
   0xa   : > { %1443 = vmatpush3.bf16.msra.mxu1 (!%p270_p3), %v1488_v3  ;;  %v1353_v13 = vcombine.low (!%p270_p3), %v510_v10, %v514_v11  ;;  %v1354_v14 = vcombine.high (!%p270_p3), %v510_v10, %v514_v11  ;;  %v515_v15 = vld [vmem:[%s1876_s5 + $0x28] sm:$0xff] (!%p270_p3)  ;;  %v518_v16 = vld [vmem:[%s1876_s5 + $0x40] sm:$0xff] (!%p270_p3) }
   0xb   : > { %1444 = vmatprep.subr.bf16.mxu1 (!%p270_p3), %v1516_v1  ;;  %v522_v17 = vld [vmem:[%s1876_s5 + $0x60] sm:$0xff] (!%p270_p3)  ;;  %v1355_v18 = vcombine.low (!%p270_p3), %v511_v12, %v515_v15  ;;  %v1356_v19 = vcombine.high (!%p270_p3), %v511_v12, %v515_v15  ;;  %v519_v45 = vld [vmem:[%s1876_s5 + $0x48] sm:$0xff] (!%p270_p3) }
   0xc   : > { %1433 = vmatpush3.bf16.msra.mxu0 (!%p270_p3), %v1484_v2  ;;  %v1362_v20 = vcombine.high (!%p270_p3), %v518_v16, %v522_v17  ;;  %v1361_v21 = vcombine.low (!%p270_p3), %v518_v16, %v522_v17  ;;  %v526_v22 = vld [vmem:[%s1876_s5 + $0x80] sm:$0xff] (!%p270_p3)  ;;  %v523_v46 = vld [vmem:[%s1876_s5 + $0x68] sm:$0xff] (!%p270_p3) }
   0xd   : > { %1434 = vmatprep.subr.bf16.mxu0 (!%p270_p3), %v1516_v1  ;;  %v530_v23 = vld [vmem:[%s1876_s5 + $0xa0] sm:$0xff] (!%p270_p3)  ;;  %v1364_v50 = vcombine.high (!%p270_p3), %v519_v45, %v523_v46  ;;  %v527_v51 = vld [vmem:[%s1876_s5 + $0x88] sm:$0xff] (!%p270_p3)  ;;  %v1363_v53 = vcombine.low (!%p270_p3), %v519_v45, %v523_v46  ;;  %v528_v45 = vld [vmem:[%s1876_s5 + $0x90] sm:$0xff] (!%p270_p3) }
   0xe   : > { %s1884_s24 = smov (!%p311_p4, %s1506_s24), 1  ;;  %1445 = vmatpush3.bf16.msra.mxu1 %v1489_v5  ;;  %v1370_v24 = vcombine.high %v526_v22, %v530_v23  ;;  %v1369_v25 = vcombine.low %v526_v22, %v530_v23  ;;  %v534_v26 = vld [vmem:[%s1876_s5 + $0xc0] sm:$0xff]  ;;  %v531_v52 = vld [vmem:[%s1876_s5 + $0xa8] sm:$0xff]  ;;  %v513_v22 = vld [vmem:[%s1876_s5 + $0x18] sm:$0xff] }
   0xf   : > { %s1419_s13 = sshll.u32 %s1884_s24, 3  ;;  %1446 = vmatprep.subr.bf16.mxu1 %v1516_v1  ;;  %v538_v27 = vld [vmem:[%s1876_s5 + $0xe0] sm:$0xff]  ;;  %v1372_v54 = vcombine.high %v527_v51, %v531_v52  ;;  %v535_v55 = vld [vmem:[%s1876_s5 + $0xc8] sm:$0xff]  ;;  %v1371_v57 = vcombine.low %v527_v51, %v531_v52  ;;  %v532_v46 = vld [vmem:[%s1876_s5 + $0xb0] sm:$0xff] }
  0x10   : > { %s318_s18 = scalar_lea.vmem %s1871_s0, %s1419_s13  ;;  %1435 = vmatpush3.bf16.msra.mxu0 %v1485_v4  ;;  %v1378_v28 = vcombine.high %v534_v26, %v538_v27  ;;  %v1377_v29 = vcombine.low %v534_v26, %v538_v27  ;;  %v542_v30 = vld [vmem:[%s1876_s5 + $0x100] sm:$0xff]  ;;  %v539_v56 = vld [vmem:[%s1876_s5 + $0xe8] sm:$0xff]  ;;  %v1374_v51 = vcombine.high %v528_v45, %v532_v46  ;;  %s328_s17 = scalar_lea.vmem %s1878_s7, %s1419_s13 }
  0x11   : > { %1436 = vmatprep.subr.bf16.mxu0 %v1516_v1  ;;  %v1487_v7 = vld [vmem:[%s318_s18] sm:$0xff]   ;;  %v1380_v58 = vcombine.high %v535_v55, %v539_v56  ;;  %v543_v59 = vld [vmem:[%s1876_s5 + $0x108] sm:$0xff]  ;;  %v1379_v61 = vcombine.low %v535_v55, %v539_v56  ;;  %v537_v55 = vld [vmem:[%s1876_s5 + $0xd8] sm:$0xff] }
  0x12   : > { %1447 = vmatpush3.bf16.msra.mxu1 %v1490_v8  ;;  %v546_v31 = vld [vmem:[%s1876_s5 + $0x120] sm:$0xff]  ;;  %v547_v60 = vld [vmem:[%s1876_s5 + $0x128] sm:$0xff]  ;;  %v541_v56 = vld [vmem:[%s1876_s5 + $0xf8] sm:$0xff] }
  0x13   : > { %1448 = vmatprep.subr.bf16.mxu1 %v1516_v1  ;;  %v1386_v32 = vcombine.high %v542_v30, %v546_v31  ;;  %v1385_v33 = vcombine.low %v542_v30, %v546_v31  ;;  %v550_v34 = vld [vmem:[%s1876_s5 + $0x140] sm:$0xff]  ;;  %v1388_v62 = vcombine.high %v543_v59, %v547_v60  ;;  %v551_v63 = vld [vmem:[%s1876_s5 + $0x148] sm:$0xff]  ;;  %v1387_v1 = vcombine.low %v543_v59, %v547_v60 }
  0x14   : > { %1437 = vmatpush3.bf16.msra.mxu0 %v1486_v6  ;;  %v554_v35 = vld [vmem:[%s1876_s5 + $0x160] sm:$0xff]  ;;  %v555_v0 = vld [vmem:[%s1876_s5 + $0x168] sm:$0xff]  ;;  %v1384_v60 = vcombine.high %v537_v55, %v541_v56 }
  0x15   : > { %936 = vmatprep.subr.bf16.mxu0 %v1354_v14  ;;  %v1394_v36 = vcombine.high %v550_v34, %v554_v35  ;;  %v1393_v37 = vcombine.low %v550_v34, %v554_v35  ;;  %v1340_v38 = vld [vmem:[%s1873_s2] ss:$0 sm:$0xff]  ;;  %v1396_v2 = vcombine.high %v551_v63, %v555_v0  ;;  %v1395_v3 = vcombine.low %v551_v63, %v555_v0  ;;  %v559_v6 = vld [vmem:[%s1876_s5 + $0x188] sm:$0xff]  ;;  %v545_v63 = vld [vmem:[%s1876_s5 + $0x118] sm:$0xff] }
  0x16   : > { %1449 = vmatpush3.bf16.msra.mxu1 %v1491_v9  ;;  %v558_v4 = vld [vmem:[%s1876_s5 + $0x180] sm:$0xff]  ;;  %v563_v8 = vld [vmem:[%s1876_s5 + $0x1a8] sm:$0xff]  ;;  %v549_v0 = vld [vmem:[%s1876_s5 + $0x138] sm:$0xff] }
  0x17   : > { %1439 = vmatmul.mubr.msk.bf16.vlgmr.msra.gmra.mrb[0].mxu0 %vm376_vm1, %v1487_v7  ;;  %979 = vmatprep.subr.bf16.mxu1 %v1356_v19  ;;  %v562_v5 = vld [vmem:[%s1876_s5 + $0x1a0] sm:$0xff]  ;;  %v1403_v10 = vcombine.low %v559_v6, %v563_v8  ;;  %v1404_v11 = vcombine.high %v559_v6, %v563_v8  ;;  %v567_v14 = vld [vmem:[%s1876_s5 + $0x1c8] sm:$0xff]  ;;  %v556_v6 = vld [vmem:[%s1876_s5 + $0x170] sm:$0xff] }
  0x18   : > { %937 = vmatpush1.bf16.msra.mxu0 %v1353_v13  ;;  %v1402_v7 = vcombine.high %v558_v4, %v562_v5  ;;  %v1401_v9 = vcombine.low %v558_v4, %v562_v5  ;;  %v566_v12 = vld [vmem:[%s1876_s5 + $0x1c0] sm:$0xff]  ;;  %v571_v16 = vld [vmem:[%s1876_s5 + $0x1e8] sm:$0xff]  ;;  %v1392_v4 = vcombine.high %v545_v63, %v549_v0  ;;  %v552_v5 = vld [vmem:[%s1876_s5 + $0x150] sm:$0xff] }
  0x19   : > { %938 = vmatprep.subr.bf16.mxu0 %v1362_v20  ;;  %v570_v13 = vld [vmem:[%s1876_s5 + $0x1e0] sm:$0xff]  ;;  %v1412_v19 = vcombine.high %v567_v14, %v571_v16  ;;  %v512_v20 = vld [vmem:[%s1876_s5 + $0x10] sm:$0xff]  ;;  %v557_v8 = vld [vmem:[%s1876_s5 + $0x178] sm:$0xff] }
  0x1a   : > { %v1410_v15 = vcombine.high %v566_v12, %v570_v13  ;;  %v1409_v17 = vcombine.low %v566_v12, %v570_v13  ;;  %v560_v13 = vld [vmem:[%s1876_s5 + $0x190] sm:$0xff] }
  0x1c   : > { %939 = vmatpush1.bf16.msra.mxu0 %v1361_v21  ;;  %v516_v21 = vld [vmem:[%s1876_s5 + $0x30] sm:$0xff] }
  0x1d   : > { %940 = vmatprep.subr.bf16.mxu0 %v1370_v24  ;;  %v1358_v23 = vcombine.high %v512_v20, %v516_v21  ;;  %v517_v24 = vld [vmem:[%s1876_s5 + $0x38] sm:$0xff] }
  0x1e   : > { %v1359_v26 = vcombine.low %v513_v22, %v517_v24  ;;  %v1360_v27 = vcombine.high %v513_v22, %v517_v24  ;;  %v572_v22 = vld [vmem:[%s1876_s5 + $0x1f0] sm:$0xff]  ;;  %v573_v24 = vld [vmem:[%s1876_s5 + $0x1f8] sm:$0xff] }
  0x20   : > { %941 = vmatpush1.bf16.msra.mxu0 %v1369_v25  ;;  %v1357_v25 = vcombine.low %v512_v20, %v516_v21  ;;  %v568_v21 = vld [vmem:[%s1876_s5 + $0x1d0] sm:$0xff] }
  0x21   : > { %942 = vmatprep.subr.bf16.mxu0 %v1378_v28  ;;  %v1518_v28 = vmov 0  }
  0x22   : > { %968 = vmatprep.mubr.bf16.mxu0 %v1518_v28 }
  0x24   : > { %943 = vmatpush1.bf16.msra.mxu0 %v1377_v29  ;;  %v1347_v29 = vld [vmem:[%s1875_s4] ss:$0 sm:$0xff] }
  0x25   : > { %944 = vmatprep.subr.bf16.mxu0 %v1386_v32 }
  0x28   : > { %945 = vmatpush1.bf16.msra.mxu0 %v1385_v33 }
  0x29   : > { %946 = vmatprep.subr.bf16.mxu0 %v1394_v36  ;;  %v520_v36 = vld [vmem:[%s1876_s5 + $0x50] sm:$0xff] }
  0x2c   : > { %947 = vmatpush1.bf16.msra.mxu0 %v1393_v37  ;;  %v524_v37 = vld [vmem:[%s1876_s5 + $0x70] sm:$0xff] }
  0x2d   : > { %948 = vmatprep.subr.bf16.mxu0 %v1402_v7  ;;  %v553_v7 = vld [vmem:[%s1876_s5 + $0x158] sm:$0xff] }
  0x2e   : > { %v1400_v12 = vcombine.high %v553_v7, %v557_v8 }
  0x30   : > { %949 = vmatpush1.bf16.msra.mxu0 %v1401_v9 }
  0x31   : > { %950 = vmatprep.subr.bf16.mxu0 %v1410_v15  ;;  %v561_v15 = vld [vmem:[%s1876_s5 + $0x198] sm:$0xff] }
  0x34   : > { %951 = vmatpush1.bf16.msra.mxu0 %v1409_v17  ;;  %v1397_v17 = vcombine.low %v552_v5, %v556_v6 }
  0x35   : > { %1022 = vmatprep.subr.bf16.mxu0 %v1358_v23  ;;  %v569_v23 = vld [vmem:[%s1876_s5 + $0x1d8] sm:$0xff] }
  0xea   : > { %v414_v39 = vpop.f32.mrb[0].mxu0 }
  0xeb   : > { %v415_v40 = vadd.f32 %v1340_v38, %v414_v39  ;;  %v1440_v41 = vpop.f32.mrb[1].mxu0  ;;  %v525_v39 = vld [vmem:[%s1876_s5 + $0x78] sm:$0xff] }
  0xec   : > { %v417_v42 = vpop.f32.mrb[2].mxu0 }
  0xed   : > { %v418_v43 = vadd.f32 %v1340_v38, %v417_v42  ;;  %v1441_v44 = vpop.f32.mrb[3].mxu0  ;;  %v421_v47 = vmax.f32 %v415_v40, 0.0  ;;  %v521_v38 = vld [vmem:[%s1876_s5 + $0x58] sm:$0xff] }
  0xee   : > { %v1368_v44 = vcombine.high %v521_v38, %v525_v39 }
  0xef   : > { %v422_v48 = vmax.f32 %v418_v43, 0.0  ;;  %v1366_v43 = vcombine.high %v520_v36, %v524_v37 }
  0xf1   : > { %v423_v49 = vpack.c.bf16 %v422_v48, %v421_v47  ;;  %v529_v47 = vld [vmem:[%s1876_s5 + $0x98] sm:$0xff] }
  0xf2   : > { %v533_v48 = vld [vmem:[%s1876_s5 + $0xb8] sm:$0xff] }
  0xf3   : > { %1451 = vmatmul.mubr.msk.bf16.vlgmr.msra.gmra.mrb[0].mxu1 %vm376_vm1, %v423_v49  ;;  %v1365_v49 = vcombine.low %v520_v36, %v524_v37  ;;  %v1376_v52 = vcombine.high %v529_v47, %v533_v48 }
  0xf4   : > { %980 = vmatpush1.bf16.msra.mxu1 %v1355_v18  ;;  %v1411_v18 = vcombine.low %v567_v14, %v571_v16  ;;  %1011 = vmatprep.mubr.bf16.mxu1 %v1518_v28  ;;  %v564_v14 = vld [vmem:[%s1876_s5 + $0x1b0] sm:$0xff]  ;;  %v565_v16 = vld [vmem:[%s1876_s5 + $0x1b8] sm:$0xff] }
  0xf5   : > { %981 = vmatprep.subr.bf16.mxu1 %v1364_v50  ;;  %v1367_v50 = vcombine.low %v521_v38, %v525_v39  ;;  %v1408_v20 = vcombine.high %v561_v15, %v565_v16 }
  0xf8   : > { %982 = vmatpush1.bf16.msra.mxu1 %v1363_v53  ;;  %v536_v53 = vld [vmem:[%s1876_s5 + $0xd0] sm:$0xff] }
  0xf9   : > { %983 = vmatprep.subr.bf16.mxu1 %v1372_v54  ;;  %v540_v54 = vld [vmem:[%s1876_s5 + $0xf0] sm:$0xff] }
  0xfa   : > { %v1382_v59 = vcombine.high %v536_v53, %v540_v54 }
  0xfc   : > { %984 = vmatpush1.bf16.msra.mxu1 %v1371_v57  ;;  %v1373_v57 = vcombine.low %v528_v45, %v532_v46 }
  0xfd   : > { %985 = vmatprep.subr.bf16.mxu1 %v1380_v58  ;;  %v1375_v58 = vcombine.low %v529_v47, %v533_v48 }
 0x100   : > { %986 = vmatpush1.bf16.msra.mxu1 %v1379_v61  ;;  %v544_v61 = vld [vmem:[%s1876_s5 + $0x110] sm:$0xff] }
 0x101   : > { %987 = vmatprep.subr.bf16.mxu1 %v1388_v62  ;;  %v548_v62 = vld [vmem:[%s1876_s5 + $0x130] sm:$0xff] }
 0x102   : > { %v1389_v9 = vcombine.low %v544_v61, %v548_v62 }
 0x104   : > { %988 = vmatpush1.bf16.msra.mxu1 %v1387_v1  ;;  %v1381_v1 = vcombine.low %v536_v53, %v540_v54 }
 0x105   : > { %989 = vmatprep.subr.bf16.mxu1 %v1396_v2  ;;  %v1383_v2 = vcombine.low %v537_v55, %v541_v56 }
 0x108   : > { %990 = vmatpush1.bf16.msra.mxu1 %v1395_v3  ;;  %v1390_v3 = vcombine.high %v544_v61, %v548_v62 }
 0x109   : > { %991 = vmatprep.subr.bf16.mxu1 %v1404_v11  ;;  %v1398_v11 = vcombine.high %v552_v5, %v556_v6 }
 0x10c   : > { %992 = vmatpush1.bf16.msra.mxu1 %v1403_v10  ;;  %v1391_v10 = vcombine.low %v545_v63, %v549_v0 }
 0x10d   : > { %993 = vmatprep.subr.bf16.mxu1 %v1412_v19  ;;  %v1406_v19 = vcombine.high %v560_v13, %v564_v14 }
 0x110   : > { %994 = vmatpush1.bf16.msra.mxu1 %v1411_v18  ;;  %v1399_v18 = vcombine.low %v553_v7, %v557_v8 }
 0x111   : > { %1065 = vmatprep.subr.bf16.mxu1 %v1360_v27  ;;  %v1414_v27 = vcombine.high %v568_v21, %v572_v22 }
 0x1c6   : > { %v500_v30 = vpop.f32.mrb[0].mxu1 }
 0x1c7   : > { %v501_v31 = vadd.f32 %v1347_v29, %v500_v30  ;;  %v1452_v32 = vpop.f32.mrb[1].mxu1  ;;  %v1415_v30 = vcombine.low %v569_v23, %v573_v24 }
 0x1c8   : > { %v503_v33 = vpop.f32.mrb[2].mxu1 }
 0x1c9   : > { %v504_v34 = vadd.f32 %v1347_v29, %v503_v33  ;;  %v1453_v35 = vpop.f32.mrb[3].mxu1  ;;  %v507_v40 = vmax.f32 %v501_v31, 0.0  ;;  %v1413_v29 = vcombine.low %v568_v21, %v572_v22  ;;  %v576_v31 = vlaneseq }
 0x1ca   : > { %v1823_v35 = vld [vmem:[%s1877_s6] sm:$0xff] }
 0x1cb   : > { %v508_v41 = vmax.f32 %v504_v34, 0.0  ;;  %v1816_v32 = vshrl.u32 %v576_v31, 7 }
 0x1cd   : > { %v1738_v42 = vpack.c.bf16 %v508_v41, %v507_v40  ;;  %v578_v33 = vsub.s32 0, %v1816_v32  ;;  %v586_v34 = vsub.s32 2, %v1816_v32  ;;  %v582_v36 = vsub.s32 1, %v1816_v32 }
 0x1ce   : > { %v590_v37 = vsub.s32 3, %v1816_v32 }
 0x1cf   : > { %969 = vmatmul.mubr.bf16.vlgmr.msra.gmra.mrb[4].mxu0 %v1738_v42  ;;  %1012 = vmatmul.mubr.bf16.vlgmr.msra.gmra.mrb[4].mxu1 %v1738_v42  ;;  %v579_v38 = vrot.slane %v1823_v35, %v578_v33  ;;  %v587_v39 = vrot.slane %v1823_v35, %v586_v34  ;;  %v583_v40 = vrot.slane %v1823_v35, %v582_v36 }
 0x1d0   : > { %1023 = vmatpush1.bf16.msra.mxu0 %v1357_v25  ;;  %1066 = vmatpush1.bf16.msra.mxu1 %v1359_v26  ;;  %v1405_v25 = vcombine.low %v560_v13, %v564_v14  ;;  %v1407_v26 = vcombine.low %v561_v15, %v565_v16  ;;  %v591_v41 = vrot.slane %v1823_v35, %v590_v37  ;;  %v1519_v13 = vmov 1966171168  }
 0x1d1   : > { %1024 = vmatprep.subr.bf16.mxu0 %v1366_v43  ;;  %1067 = vmatprep.subr.bf16.mxu1 %v1368_v44  ;;  %v1199_v14 = vunpack.c.l.s4 %v1519_v13 }
 0x1d2   : > { %1054 = vmatprep.mubr.bf16.mxu0 %v1518_v28  ;;  %1097 = vmatprep.mubr.bf16.mxu1 %v1518_v28  ;;  %v1416_v28 = vcombine.high %v569_v23, %v573_v24 }
 0x1d3   : > { %v1200_v23 = vunpack.c.0.s8 %v1199_v14 }
 0x1d4   : > { %1025 = vmatpush1.bf16.msra.mxu0 %v1365_v49  ;;  %1068 = vmatpush1.bf16.msra.mxu1 %v1367_v50 }
 0x1d5   : > { %1026 = vmatprep.subr.bf16.mxu0 %v1374_v51  ;;  %1069 = vmatprep.subr.bf16.mxu1 %v1376_v52  ;;  %v1832_v33 = vsub.s32 %v1200_v23, %v1816_v32 }
 0x1d8   : > { %1027 = vmatpush1.bf16.msra.mxu0 %v1373_v57  ;;  %1070 = vmatpush1.bf16.msra.mxu1 %v1375_v58 }
 0x1d9   : > { %1028 = vmatprep.subr.bf16.mxu0 %v1382_v59  ;;  %1071 = vmatprep.subr.bf16.mxu1 %v1384_v60 }
 0x1dc   : > { %1029 = vmatpush1.bf16.msra.mxu0 %v1381_v1  ;;  %1072 = vmatpush1.bf16.msra.mxu1 %v1383_v2 }
 0x1dd   : > { %1030 = vmatprep.subr.bf16.mxu0 %v1390_v3  ;;  %1073 = vmatprep.subr.bf16.mxu1 %v1392_v4 }
 0x1e0   : > { %1031 = vmatpush1.bf16.msra.mxu0 %v1389_v9  ;;  %1074 = vmatpush1.bf16.msra.mxu1 %v1391_v10 }
 0x1e1   : > { %1032 = vmatprep.subr.bf16.mxu0 %v1398_v11  ;;  %1075 = vmatprep.subr.bf16.mxu1 %v1400_v12 }
 0x1e4   : > { %1033 = vmatpush1.bf16.msra.mxu0 %v1397_v17  ;;  %1076 = vmatpush1.bf16.msra.mxu1 %v1399_v18 }
 0x1e5   : > { %1034 = vmatprep.subr.bf16.mxu0 %v1406_v19  ;;  %1077 = vmatprep.subr.bf16.mxu1 %v1408_v20 }
 0x1e8   : > { %1035 = vmatpush1.bf16.msra.mxu0 %v1405_v25  ;;  %1078 = vmatpush1.bf16.msra.mxu1 %v1407_v26 }
 0x1e9   : > { %1036 = vmatprep.subr.bf16.mxu0 %v1414_v27  ;;  %1079 = vmatprep.subr.bf16.mxu1 %v1416_v28 }
 0x1ec   : > { %1037 = vmatpush1.bf16.msra.mxu0 %v1413_v29  ;;  %1080 = vmatpush1.bf16.msra.mxu1 %v1415_v30 }
 0x1ef   : > { %1055 = vmatmul.mubr.bf16.vlgmr.msra.gmra.mrb[8].mxu0 %v1738_v42  ;;  %1098 = vmatmul.mubr.bf16.vlgmr.msra.gmra.mrb[8].mxu1 %v1738_v42 }
 0x2a2   : > { %v970_v42 = vpop.f32.mrb[4].mxu0  ;;  %v1013_v43 = vpop.f32.mrb[4].mxu1 }
 0x2a3   : > { %v971_v44 = vadd.f32 %v970_v42, %v579_v38  ;;  %v1014_v45 = vadd.f32 %v1013_v43, %v587_v39  ;;  %v972_v46 = vpop.f32.mrb[5].mxu0  ;;  %v1015_v47 = vpop.f32.mrb[5].mxu1  ;;  %v598_v43 = vsub.s32 5, %v1816_v32 }
 0x2a4   : > { %v973_v48 = vadd.f32 %v972_v46, %v583_v40  ;;  %v1016_v49 = vadd.f32 %v1015_v47, %v591_v41  ;;  %v974_v50 = vpop.f32.mrb[6].mxu0  ;;  %v1017_v51 = vpop.f32.mrb[6].mxu1 }
 0x2a5   : > { %v975_v52 = vadd.f32 %v974_v50, %v579_v38  ;;  %v1018_v53 = vadd.f32 %v1017_v51, %v587_v39  ;;  %v976_v54 = vpop.f32.mrb[7].mxu0  ;;  %v1019_v55 = vpop.f32.mrb[7].mxu1  ;;  %v1108_v58 = vmax.f32 %v971_v44, 0.0  ;;  %v1110_v59 = vmax.f32 %v1014_v45, 0.0 }
 0x2a6   : > { %v977_v56 = vadd.f32 %v976_v54, %v583_v40  ;;  %v1020_v57 = vadd.f32 %v1019_v55, %v591_v41  ;;  %v1109_v62 = vmax.f32 %v973_v48, 0.0  ;;  %v1111_v63 = vmax.f32 %v1016_v49, 0.0 }
 0x2a7   : > { %v1116_v60 = vmax.f32 %v975_v52, 0.0  ;;  %v1118_v61 = vmax.f32 %v1018_v53, 0.0  ;;  %v594_v40 = vsub.s32 4, %v1816_v32  ;;  %v602_v41 = vsub.s32 6, %v1816_v32 }
 0x2a8   : > { %v1117_v0 = vmax.f32 %v977_v56, 0.0  ;;  %v1119_v1 = vmax.f32 %v1020_v57, 0.0  ;;  %v606_v44 = vsub.s32 7, %v1816_v32  ;;  %v599_v47 = vrot.slane %v1823_v35, %v598_v43 }
 0x2a9   : > { %v1124_v2 = vmax.f32 %v1108_v58, %v1116_v60  ;;  %v1138_v3 = vmax.f32 %v1110_v59, %v1118_v61  ;;  %v595_v45 = vrot.slane %v1823_v35, %v594_v40  ;;  %v603_v46 = vrot.slane %v1823_v35, %v602_v41 }
 0x2aa   : > { %v1131_v4 = vmax.f32 %v1109_v62, %v1117_v0  ;;  %v1145_v5 = vmax.f32 %v1111_v63, %v1119_v1  ;;  %v607_v48 = vrot.slane %v1823_v35, %v606_v44 }
 0x2ab   : > { %v1125_v6 = vrot.slane %v1124_v2, 4  ;;  %v1139_v7 = vrot.slane %v1138_v3, 4 }
 0x2ac   : > { %v1132_v8 = vrot.slane %v1131_v4, 4  ;;  %v1146_v9 = vrot.slane %v1145_v5, 4 }
 0x2ad   : > { %v1126_v10 = vmax.f32 %v1124_v2, %v1125_v6  ;;  %v1140_v11 = vmax.f32 %v1138_v3, %v1139_v7 }
 0x2ae   : > { %v1133_v12 = vmax.f32 %v1131_v4, %v1132_v8  ;;  %v1147_v15 = vmax.f32 %v1145_v5, %v1146_v9 }
 0x2af   : > { %v1127_v16 = vrot.slane %v1126_v10, 2  ;;  %v1141_v17 = vrot.slane %v1140_v11, 2 }
 0x2b0   : > { %v1134_v18 = vrot.slane %v1133_v12, 2  ;;  %v1148_v19 = vrot.slane %v1147_v15, 2 }
 0x2b1   : > { %v1128_v20 = vmax.f32 %v1126_v10, %v1127_v16  ;;  %v1142_v21 = vmax.f32 %v1140_v11, %v1141_v17 }
 0x2b2   : > { %v1135_v22 = vmax.f32 %v1133_v12, %v1134_v18  ;;  %v1149_v24 = vmax.f32 %v1147_v15, %v1148_v19 }
 0x2b3   : > { %v1129_v25 = vrot.slane %v1128_v20, 1  ;;  %v1143_v26 = vrot.slane %v1142_v21, 1 }
 0x2b4   : > { %v1136_v27 = vrot.slane %v1135_v22, 1  ;;  %v1150_v28 = vrot.slane %v1149_v24, 1 }
 0x2b5   : > { %v1130_v29 = vmax.f32 %v1128_v20, %v1129_v25  ;;  %v1144_v30 = vmax.f32 %v1142_v21, %v1143_v26 }
 0x2b6   : > { %v1137_v31 = vmax.f32 %v1135_v22, %v1136_v27  ;;  %v1151_v34 = vmax.f32 %v1149_v24, %v1150_v28 }
 0x2b8   : > { %v1194_v36 = vcombine.low %v1130_v29, %v1137_v31  ;;  %v1195_v37 = vcombine.low %v1144_v30, %v1151_v34 }
 0x2ba   : > { %v1835_v38 = vrot.slane %v1194_v36, %v1832_v33  ;;  %v1838_v39 = vrot.slane %v1195_v37, %v1832_v33 }
 0x2bc   : > { %v1226_v42 = vcombine.low %v1835_v38, %v1838_v39 }
 0x2c2   : > { %v1056_v49 = vpop.f32.mrb[8].mxu0  ;;  %v1099_v50 = vpop.f32.mrb[8].mxu1 }
 0x2c3   : > { %v1057_v51 = vadd.f32 %v1056_v49, %v595_v45  ;;  %v1100_v52 = vadd.f32 %v1099_v50, %v603_v46  ;;  %v1058_v53 = vpop.f32.mrb[9].mxu0  ;;  %v1101_v54 = vpop.f32.mrb[9].mxu1 }
 0x2c4   : > { %v1059_v55 = vadd.f32 %v1058_v53, %v599_v47  ;;  %v1102_v56 = vadd.f32 %v1101_v54, %v607_v48  ;;  %v1060_v57 = vpop.f32.mrb[10].mxu0  ;;  %v1103_v58 = vpop.f32.mrb[10].mxu1 }
 0x2c5   : > { %v1061_v59 = vadd.f32 %v1060_v57, %v595_v45  ;;  %v1104_v32 = vadd.f32 %v1103_v58, %v603_v46  ;;  %v1062_v60 = vpop.f32.mrb[11].mxu0  ;;  %v1105_v61 = vpop.f32.mrb[11].mxu1  ;;  %v1112_v0 = vmax.f32 %v1057_v51, 0.0  ;;  %v1114_v1 = vmax.f32 %v1100_v52, 0.0 }
 0x2c6   : > { %v1063_v62 = vadd.f32 %v1062_v60, %v599_v47  ;;  %v1106_v63 = vadd.f32 %v1105_v61, %v607_v48  ;;  %v1113_v3 = vmax.f32 %v1059_v55, 0.0  ;;  %v1115_v4 = vmax.f32 %v1102_v56, 0.0 }
 0x2c7   : > { %v1120_v2 = vmax.f32 %v1061_v59, 0.0  ;;  %v1122_v35 = vmax.f32 %v1104_v32, 0.0  ;;  %v1234_v46 = vrot.slane %v1226_v42, %v1832_v33 }
 0x2c8   : > { %v1121_v5 = vmax.f32 %v1063_v62, 0.0  ;;  %v1123_v6 = vmax.f32 %v1106_v63, 0.0 }
 0x2c9   : > { %v1152_v7 = vmax.f32 %v1112_v0, %v1120_v2  ;;  %v1166_v8 = vmax.f32 %v1114_v1, %v1122_v35 }
 0x2ca   : > { %v1159_v9 = vmax.f32 %v1113_v3, %v1121_v5  ;;  %v1173_v10 = vmax.f32 %v1115_v4, %v1123_v6 }
 0x2cb   : > { %v1153_v11 = vrot.slane %v1152_v7, 4  ;;  %v1167_v12 = vrot.slane %v1166_v8, 4 }
 0x2cc   : > { %v1160_v13 = vrot.slane %v1159_v9, 4  ;;  %v1174_v14 = vrot.slane %v1173_v10, 4 }
 0x2cd   : > { %v1154_v15 = vmax.f32 %v1152_v7, %v1153_v11  ;;  %v1168_v16 = vmax.f32 %v1166_v8, %v1167_v12 }
 0x2ce   : > { %v1161_v17 = vmax.f32 %v1159_v9, %v1160_v13  ;;  %v1175_v18 = vmax.f32 %v1173_v10, %v1174_v14 }
 0x2cf   : > { %v1155_v19 = vrot.slane %v1154_v15, 2  ;;  %v1169_v20 = vrot.slane %v1168_v16, 2 }
 0x2d0   : > { %v1162_v21 = vrot.slane %v1161_v17, 2  ;;  %v1176_v22 = vrot.slane %v1175_v18, 2 }
 0x2d1   : > { %v1156_v23 = vmax.f32 %v1154_v15, %v1155_v19  ;;  %v1170_v24 = vmax.f32 %v1168_v16, %v1169_v20 }
 0x2d2   : > { %v1163_v25 = vmax.f32 %v1161_v17, %v1162_v21  ;;  %v1177_v26 = vmax.f32 %v1175_v18, %v1176_v22 }
 0x2d3   : > { %v1157_v27 = vrot.slane %v1156_v23, 1  ;;  %v1171_v28 = vrot.slane %v1170_v24, 1 }
 0x2d4   : > { %v1164_v29 = vrot.slane %v1163_v25, 1  ;;  %v1178_v30 = vrot.slane %v1177_v26, 1 }
 0x2d5   : > { %v1158_v31 = vmax.f32 %v1156_v23, %v1157_v27  ;;  %v1172_v34 = vmax.f32 %v1170_v24, %v1171_v28 }
 0x2d6   : > { %v1165_v36 = vmax.f32 %v1163_v25, %v1164_v29  ;;  %v1179_v37 = vmax.f32 %v1177_v26, %v1178_v30 }
 0x2d8   : > { %v1196_v40 = vcombine.low %v1158_v31, %v1165_v36  ;;  %v1197_v41 = vcombine.low %v1172_v34, %v1179_v37 }
 0x2da   : > { %v1218_v43 = vrot.slane %v1196_v40, %v1832_v33  ;;  %v1225_v44 = vrot.slane %v1197_v41, %v1832_v33 }
 0x2dc   : > { %v1227_v45 = vcombine.low %v1218_v43, %v1225_v44 }
 0x2de   : > { %v1241_v47 = vrot.slane %v1227_v45, %v1832_v33 }
 0x2e0   : > { %v1242_v48 = vcombine.low %v1234_v46, %v1241_v47 }
 0x2e2   : > { %1245 = vst [vmem:[%s328_s17] sm:$0xff] %v1242_v48 }
 0x2e3 PF: > { %s17_s26 = sadd.s32 1, %s1514_s26   ;;  %s1879_s24 = smov %s1510_s25 }
 0x2e4   : > { %p14_p5 = scmp.ge.s32.totalorder %s17_s26, 4   ;;  %s1880_s25 = smov %s1882_s27 }
 0x2e6   :  { %16 = sbr.rel (!%p14_p5) target bundleno = 2 (0x2), region = 82 }

// kernel: segmentation_pointnet.8
= control target key start
LH: loop header
LB: loop body
LE: loop exit
PB: predicated region body
PF: predicated region fallthrough
CT: control target
= control target key end

     0   :  { %s1595_s24 = smov 0   ;;  %s1597_s25 = smov 0   ;;  %s1898_s0 = inlined_call_operand.vmem [shape: bf16[2,16,64], index: 0, kind: input, shape index: {}]   ;;  %s1899_s1 = inlined_call_operand.vmem [shape: bf16[2,64,64], index: 1, kind: input, shape index: {}]   ;;  %s1900_s2 = inlined_call_operand.vmem [shape: f32[1,64], index: 2, kind: input, shape index: {}]   ;;  %s1901_s3 = inlined_call_operand.vmem [shape: bf16[64,128], index: 3, kind: input, shape index: {}]   ;;  %s1902_s4 = inlined_call_operand.vmem [shape: f32[1,128], index: 4, kind: input, shape index: {}]   ;;  %s1903_s5 = inlined_call_operand.vmem [shape: bf16[128,1024], index: 5, kind: input, shape index: {}]   ;;  %s1904_s6 = inlined_call_operand.vmem [shape: f32[1,1024], index: 6, kind: input, shape index: {}]   ;;  %s1905_s7 = inlined_call_operand.vmem [shape: f32[2,1,1,1024], index: 7, kind: output, shape index: {}]  }
   0x1   :  { %s1599_s26 = smov 0  }
   0x2 LB: > { %s36_s27 = sadd.s32 1, %s1545_s25  ;;  %p1368_p0 = scmp.ge.s32.totalorder %s1549_s26, 1  ;;  %s1549_s26 = sphi %s1599_s26, %s17_s26   ;;  %s1545_s25 = sphi %s1597_s25, %s1907_s25   ;;  %s1541_s24 = sphi %s1595_s24, %s1906_s24  }
   0x3   : > { %p38_p1 = scmp.ge.s32.totalorder %s36_s27, 2  ;;  %p279_p2 = scmp.lt.s32.totalorder %s1549_s26, 3 }
   0x5   : > { %s1909_s27 = smov (%p38_p1, %s36_s27), 0  ;;  %p280_p3 = pnand %p1368_p0, %p279_p2 }
   0x6   : > { %p326_p4 = scmp.lt.s32.totalorder (!%p280_p3), %s1541_s24, 1  ;;  %v1523_v0 = vld [vmem:[%s1901_s3] sm:$0xff] (!%p280_p3)   ;;  %v1551_v1 = vmov (!%p280_p3), 0.0   ;;  %vm1552_vm0 = vmmov (!%p280_p3), 0   ;;  %v1524_v2 = vld [vmem:[%s1901_s3 + $0x8] sm:$0xff] (!%p280_p3)   ;;  %vm396_vm1 = vcmask (!%p280_p3), 523264  }
   0x7   : > { %283 = sbr.rel (%p280_p3) target bundleno = 749 (0x2ed), region = 48  ;;  %1465 = vmatprep.subr.bf16.mxu0 (!%p280_p3), %v1551_v1  ;;  %1473 = vmatprep.mubr.msk.bf16.mxu0 (!%p280_p3), %vm1552_vm0, %v1551_v1  ;;  %v1525_v8 = vld [vmem:[%s1901_s3 + $0x10] sm:$0xff] (!%p280_p3)   ;;  %v1526_v9 = vld [vmem:[%s1901_s3 + $0x18] sm:$0xff] (!%p280_p3)   ;;  %v530_v10 = vld [vmem:[%s1903_s5] sm:$0xff] (!%p280_p3) }
   0x8   : > { %1477 = vmatprep.subr.bf16.mxu1 (!%p280_p3), %v1551_v1  ;;  %1485 = vmatprep.mubr.msk.bf16.mxu1 (!%p280_p3), %vm1552_vm0, %v1551_v1  ;;  %v534_v11 = vld [vmem:[%s1903_s5 + $0x20] sm:$0xff] (!%p280_p3)  ;;  %v531_v12 = vld [vmem:[%s1903_s5 + $0x8] sm:$0xff] (!%p280_p3) }
   0x9   : > { %1478 = vmatpush3.bf16.msra.mxu1 (!%p280_p3), %v1523_v0  ;;  %v1387_v13 = vcombine.low (!%p280_p3), %v530_v10, %v534_v11  ;;  %v1388_v14 = vcombine.high (!%p280_p3), %v530_v10, %v534_v11  ;;  %v535_v15 = vld [vmem:[%s1903_s5 + $0x28] sm:$0xff] (!%p280_p3)  ;;  %v538_v16 = vld [vmem:[%s1903_s5 + $0x40] sm:$0xff] (!%p280_p3) }
   0xa   : > { %1479 = vmatprep.subr.bf16.mxu1 (!%p280_p3), %v1551_v1  ;;  %v542_v17 = vld [vmem:[%s1903_s5 + $0x60] sm:$0xff] (!%p280_p3)  ;;  %v1389_v18 = vcombine.low (!%p280_p3), %v531_v12, %v535_v15  ;;  %v1390_v19 = vcombine.high (!%p280_p3), %v531_v12, %v535_v15  ;;  %v539_v45 = vld [vmem:[%s1903_s5 + $0x48] sm:$0xff] (!%p280_p3) }
   0xb   : > { %v1396_v20 = vcombine.high (!%p280_p3), %v538_v16, %v542_v17  ;;  %v1395_v21 = vcombine.low (!%p280_p3), %v538_v16, %v542_v17  ;;  %v546_v22 = vld [vmem:[%s1903_s5 + $0x80] sm:$0xff] (!%p280_p3)  ;;  %v543_v46 = vld [vmem:[%s1903_s5 + $0x68] sm:$0xff] (!%p280_p3) }
   0xc   : > { %v550_v23 = vld [vmem:[%s1903_s5 + $0xa0] sm:$0xff] (!%p280_p3)  ;;  %v1398_v50 = vcombine.high (!%p280_p3), %v539_v45, %v543_v46  ;;  %v547_v51 = vld [vmem:[%s1903_s5 + $0x88] sm:$0xff] (!%p280_p3)  ;;  %v1397_v53 = vcombine.low (!%p280_p3), %v539_v45, %v543_v46  ;;  %v548_v45 = vld [vmem:[%s1903_s5 + $0x90] sm:$0xff] (!%p280_p3) }
   0xd   : > { %1480 = vmatpush3.bf16.msra.mxu1 (!%p280_p3), %v1524_v2  ;;  %v1404_v24 = vcombine.high (!%p280_p3), %v546_v22, %v550_v23  ;;  %v1403_v25 = vcombine.low (!%p280_p3), %v546_v22, %v550_v23  ;;  %v554_v26 = vld [vmem:[%s1903_s5 + $0xc0] sm:$0xff] (!%p280_p3)  ;;  %v551_v52 = vld [vmem:[%s1903_s5 + $0xa8] sm:$0xff] (!%p280_p3)  ;;  %v533_v22 = vld [vmem:[%s1903_s5 + $0x18] sm:$0xff] (!%p280_p3) }
   0xe   : > { %s1911_s24 = smov (!%p326_p4, %s1541_s24), 1  ;;  %1481 = vmatprep.subr.bf16.mxu1 %v1551_v1  ;;  %v558_v27 = vld [vmem:[%s1903_s5 + $0xe0] sm:$0xff]  ;;  %v1406_v54 = vcombine.high %v547_v51, %v551_v52  ;;  %v555_v55 = vld [vmem:[%s1903_s5 + $0xc8] sm:$0xff]  ;;  %v1405_v57 = vcombine.low %v547_v51, %v551_v52  ;;  %v552_v46 = vld [vmem:[%s1903_s5 + $0xb0] sm:$0xff] }
   0xf   : > { %s1454_s9 = sshll.u32 %s1911_s24, 5  ;;  %s1453_s13 = sshll.u32 %s1911_s24, 3  ;;  %v1412_v28 = vcombine.high %v554_v26, %v558_v27  ;;  %v1411_v29 = vcombine.low %v554_v26, %v558_v27  ;;  %v562_v30 = vld [vmem:[%s1903_s5 + $0x100] sm:$0xff]  ;;  %v559_v56 = vld [vmem:[%s1903_s5 + $0xe8] sm:$0xff]  ;;  %v1408_v51 = vcombine.high %v548_v45, %v552_v46 }
  0x10   : > { %s340_s12 = scalar_lea.vmem %s1899_s1, %s1454_s9  ;;  %s333_s16 = scalar_lea.vmem %s1898_s0, %s1453_s13  ;;  %v566_v31 = vld [vmem:[%s1903_s5 + $0x120] sm:$0xff]  ;;  %v1414_v58 = vcombine.high %v555_v55, %v559_v56  ;;  %v563_v59 = vld [vmem:[%s1903_s5 + $0x108] sm:$0xff]  ;;  %v1413_v61 = vcombine.low %v555_v55, %v559_v56  ;;  %v557_v55 = vld [vmem:[%s1903_s5 + $0xd8] sm:$0xff] }
  0x11   : > { %v1518_v3 = vld [vmem:[%s340_s12] sm:$0xff]   ;;  %v1519_v4 = vld [vmem:[%s340_s12 + $0x8] sm:$0xff]   ;;  %v1520_v5 = vld [vmem:[%s340_s12 + $0x10] sm:$0xff]   ;;  %1482 = vmatpush3.bf16.msra.mxu1 %v1525_v8  ;;  %v1420_v32 = vcombine.high %v562_v30, %v566_v31  ;;  %v1419_v33 = vcombine.low %v562_v30, %v566_v31 }
  0x12   : > { %1466 = vmatpush3.bf16.msra.mxu0 %v1518_v3  ;;  %v1521_v6 = vld [vmem:[%s340_s12 + $0x18] sm:$0xff]   ;;  %v1522_v7 = vld [vmem:[%s333_s16] sm:$0xff]   ;;  %1483 = vmatprep.subr.bf16.mxu1 %v1551_v1  ;;  %v567_v60 = vld [vmem:[%s1903_s5 + $0x128] sm:$0xff]  ;;  %s348_s12 = scalar_lea.vmem %s1905_s7, %s1453_s13 }
  0x13   : > { %1467 = vmatprep.subr.bf16.mxu0 %v1551_v1  ;;  %v570_v34 = vld [vmem:[%s1903_s5 + $0x140] sm:$0xff]  ;;  %v1422_v62 = vcombine.high %v563_v59, %v567_v60  ;;  %v571_v63 = vld [vmem:[%s1903_s5 + $0x148] sm:$0xff]  ;;  %v561_v56 = vld [vmem:[%s1903_s5 + $0xf8] sm:$0xff] }
  0x14   : > { %v574_v35 = vld [vmem:[%s1903_s5 + $0x160] sm:$0xff]  ;;  %v575_v0 = vld [vmem:[%s1903_s5 + $0x168] sm:$0xff] }
  0x15   : > { %1484 = vmatpush3.bf16.msra.mxu1 %v1526_v9  ;;  %v1428_v36 = vcombine.high %v570_v34, %v574_v35  ;;  %v1427_v37 = vcombine.low %v570_v34, %v574_v35  ;;  %v1374_v38 = vld [vmem:[%s1900_s2] ss:$0 sm:$0xff]  ;;  %v1430_v2 = vcombine.high %v571_v63, %v575_v0  ;;  %v1429_v3 = vcombine.low %v571_v63, %v575_v0  ;;  %v583_v8 = vld [vmem:[%s1903_s5 + $0x1a8] sm:$0xff]  ;;  %v565_v63 = vld [vmem:[%s1903_s5 + $0x118] sm:$0xff] }
  0x16   : > { %1468 = vmatpush3.bf16.msra.mxu0 %v1519_v4  ;;  %999 = vmatprep.subr.bf16.mxu1 %v1390_v19  ;;  %v578_v4 = vld [vmem:[%s1903_s5 + $0x180] sm:$0xff]  ;;  %v591_v16 = vld [vmem:[%s1903_s5 + $0x1e8] sm:$0xff]  ;;  %v569_v0 = vld [vmem:[%s1903_s5 + $0x138] sm:$0xff] }
  0x17   : > { %1469 = vmatprep.subr.bf16.mxu0 %v1551_v1  ;;  %v586_v12 = vld [vmem:[%s1903_s5 + $0x1c0] sm:$0xff] }
  0x1a   : > { %1470 = vmatpush3.bf16.msra.mxu0 %v1520_v5  ;;  %v582_v5 = vld [vmem:[%s1903_s5 + $0x1a0] sm:$0xff] }
  0x1b   : > { %1471 = vmatprep.subr.bf16.mxu0 %v1551_v1  ;;  %v1421_v1 = vcombine.low %v563_v59, %v567_v60  ;;  %v1435_v9 = vcombine.low %v578_v4, %v582_v5  ;;  %v1418_v60 = vcombine.high %v557_v55, %v561_v56 }
  0x1e   : > { %1472 = vmatpush3.bf16.msra.mxu0 %v1521_v6  ;;  %v579_v6 = vld [vmem:[%s1903_s5 + $0x188] sm:$0xff] }
  0x1f   : > { %956 = vmatprep.subr.bf16.mxu0 %v1388_v14  ;;  %v1437_v10 = vcombine.low %v579_v6, %v583_v8  ;;  %v1438_v11 = vcombine.high %v579_v6, %v583_v8  ;;  %v587_v14 = vld [vmem:[%s1903_s5 + $0x1c8] sm:$0xff]  ;;  %v576_v6 = vld [vmem:[%s1903_s5 + $0x170] sm:$0xff]  ;;  %v577_v8 = vld [vmem:[%s1903_s5 + $0x178] sm:$0xff] }
  0x20   : > { %v1446_v19 = vcombine.high %v587_v14, %v591_v16 }
  0x21   : > { %1474 = vmatmul.mubr.msk.bf16.vlgmr.msra.gmra.mrb[0].mxu0 %vm396_vm1, %v1522_v7  ;;  %v1436_v7 = vcombine.high %v578_v4, %v582_v5  ;;  %v1426_v4 = vcombine.high %v565_v63, %v569_v0  ;;  %v572_v5 = vld [vmem:[%s1903_s5 + $0x150] sm:$0xff] }
  0x22   : > { %957 = vmatpush1.bf16.msra.mxu0 %v1387_v13  ;;  %v590_v13 = vld [vmem:[%s1903_s5 + $0x1e0] sm:$0xff] }
  0x23   : > { %958 = vmatprep.subr.bf16.mxu0 %v1396_v20  ;;  %v1444_v15 = vcombine.high %v586_v12, %v590_v13  ;;  %v1443_v17 = vcombine.low %v586_v12, %v590_v13  ;;  %v532_v20 = vld [vmem:[%s1903_s5 + $0x10] sm:$0xff] }
  0x24   : > { %v580_v13 = vld [vmem:[%s1903_s5 + $0x190] sm:$0xff] }
  0x26   : > { %959 = vmatpush1.bf16.msra.mxu0 %v1395_v21  ;;  %v536_v21 = vld [vmem:[%s1903_s5 + $0x30] sm:$0xff] }
  0x27   : > { %960 = vmatprep.subr.bf16.mxu0 %v1404_v24  ;;  %v1392_v23 = vcombine.high %v532_v20, %v536_v21  ;;  %v537_v24 = vld [vmem:[%s1903_s5 + $0x38] sm:$0xff] }
  0x28   : > { %v1393_v26 = vcombine.low %v533_v22, %v537_v24  ;;  %v1394_v27 = vcombine.high %v533_v22, %v537_v24  ;;  %v592_v22 = vld [vmem:[%s1903_s5 + $0x1f0] sm:$0xff]  ;;  %v593_v24 = vld [vmem:[%s1903_s5 + $0x1f8] sm:$0xff] }
  0x2a   : > { %961 = vmatpush1.bf16.msra.mxu0 %v1403_v25  ;;  %v1391_v25 = vcombine.low %v532_v20, %v536_v21  ;;  %v588_v21 = vld [vmem:[%s1903_s5 + $0x1d0] sm:$0xff] }
  0x2b   : > { %962 = vmatprep.subr.bf16.mxu0 %v1412_v28  ;;  %v1553_v28 = vmov 0  }
  0x2c   : > { %988 = vmatprep.mubr.bf16.mxu0 %v1553_v28 }
  0x2e   : > { %963 = vmatpush1.bf16.msra.mxu0 %v1411_v29  ;;  %v1381_v29 = vld [vmem:[%s1902_s4] ss:$0 sm:$0xff] }
  0x2f   : > { %964 = vmatprep.subr.bf16.mxu0 %v1420_v32 }
  0x32   : > { %965 = vmatpush1.bf16.msra.mxu0 %v1419_v33 }
  0x33   : > { %966 = vmatprep.subr.bf16.mxu0 %v1428_v36  ;;  %v540_v36 = vld [vmem:[%s1903_s5 + $0x50] sm:$0xff] }
  0x36   : > { %967 = vmatpush1.bf16.msra.mxu0 %v1427_v37  ;;  %v544_v37 = vld [vmem:[%s1903_s5 + $0x70] sm:$0xff] }
  0x37   : > { %968 = vmatprep.subr.bf16.mxu0 %v1436_v7  ;;  %v573_v7 = vld [vmem:[%s1903_s5 + $0x158] sm:$0xff] }
  0x38   : > { %v1434_v12 = vcombine.high %v573_v7, %v577_v8 }
  0x3a   : > { %969 = vmatpush1.bf16.msra.mxu0 %v1435_v9 }
  0x3b   : > { %970 = vmatprep.subr.bf16.mxu0 %v1444_v15  ;;  %v581_v15 = vld [vmem:[%s1903_s5 + $0x198] sm:$0xff] }
  0x3e   : > { %971 = vmatpush1.bf16.msra.mxu0 %v1443_v17  ;;  %v1431_v17 = vcombine.low %v572_v5, %v576_v6 }
  0x3f   : > { %1042 = vmatprep.subr.bf16.mxu0 %v1392_v23  ;;  %v589_v23 = vld [vmem:[%s1903_s5 + $0x1d8] sm:$0xff] }
  0xf4   : > { %v434_v39 = vpop.f32.mrb[0].mxu0 }
  0xf5   : > { %v435_v40 = vadd.f32 %v1374_v38, %v434_v39  ;;  %v1475_v41 = vpop.f32.mrb[1].mxu0  ;;  %v545_v39 = vld [vmem:[%s1903_s5 + $0x78] sm:$0xff] }
  0xf6   : > { %v437_v42 = vpop.f32.mrb[2].mxu0 }
  0xf7   : > { %v438_v43 = vadd.f32 %v1374_v38, %v437_v42  ;;  %v1476_v44 = vpop.f32.mrb[3].mxu0  ;;  %v441_v47 = vmax.f32 %v435_v40, 0.0  ;;  %v541_v38 = vld [vmem:[%s1903_s5 + $0x58] sm:$0xff] }
  0xf8   : > { %v1402_v44 = vcombine.high %v541_v38, %v545_v39 }
  0xf9   : > { %v442_v48 = vmax.f32 %v438_v43, 0.0  ;;  %v1400_v43 = vcombine.high %v540_v36, %v544_v37 }
  0xfb   : > { %v443_v49 = vpack.c.bf16 %v442_v48, %v441_v47  ;;  %v549_v47 = vld [vmem:[%s1903_s5 + $0x98] sm:$0xff] }
  0xfc   : > { %v553_v48 = vld [vmem:[%s1903_s5 + $0xb8] sm:$0xff] }
  0xfd   : > { %1486 = vmatmul.mubr.msk.bf16.vlgmr.msra.gmra.mrb[0].mxu1 %vm396_vm1, %v443_v49  ;;  %v1399_v49 = vcombine.low %v540_v36, %v544_v37  ;;  %v1410_v52 = vcombine.high %v549_v47, %v553_v48 }
  0xfe   : > { %1000 = vmatpush1.bf16.msra.mxu1 %v1389_v18  ;;  %v1445_v18 = vcombine.low %v587_v14, %v591_v16  ;;  %1031 = vmatprep.mubr.bf16.mxu1 %v1553_v28  ;;  %v584_v14 = vld [vmem:[%s1903_s5 + $0x1b0] sm:$0xff]  ;;  %v585_v16 = vld [vmem:[%s1903_s5 + $0x1b8] sm:$0xff] }
  0xff   : > { %1001 = vmatprep.subr.bf16.mxu1 %v1398_v50  ;;  %v1401_v50 = vcombine.low %v541_v38, %v545_v39  ;;  %v1442_v20 = vcombine.high %v581_v15, %v585_v16 }
 0x102   : > { %1002 = vmatpush1.bf16.msra.mxu1 %v1397_v53  ;;  %v556_v53 = vld [vmem:[%s1903_s5 + $0xd0] sm:$0xff] }
 0x103   : > { %1003 = vmatprep.subr.bf16.mxu1 %v1406_v54  ;;  %v560_v54 = vld [vmem:[%s1903_s5 + $0xf0] sm:$0xff] }
 0x104   : > { %v1416_v59 = vcombine.high %v556_v53, %v560_v54 }
 0x106   : > { %1004 = vmatpush1.bf16.msra.mxu1 %v1405_v57  ;;  %v1407_v57 = vcombine.low %v548_v45, %v552_v46 }
 0x107   : > { %1005 = vmatprep.subr.bf16.mxu1 %v1414_v58  ;;  %v1409_v58 = vcombine.low %v549_v47, %v553_v48 }
 0x10a   : > { %1006 = vmatpush1.bf16.msra.mxu1 %v1413_v61  ;;  %v564_v61 = vld [vmem:[%s1903_s5 + $0x110] sm:$0xff] }
 0x10b   : > { %1007 = vmatprep.subr.bf16.mxu1 %v1422_v62  ;;  %v568_v62 = vld [vmem:[%s1903_s5 + $0x130] sm:$0xff] }
 0x10c   : > { %v1423_v9 = vcombine.low %v564_v61, %v568_v62 }
 0x10e   : > { %1008 = vmatpush1.bf16.msra.mxu1 %v1421_v1  ;;  %v1415_v1 = vcombine.low %v556_v53, %v560_v54 }
 0x10f   : > { %1009 = vmatprep.subr.bf16.mxu1 %v1430_v2  ;;  %v1417_v2 = vcombine.low %v557_v55, %v561_v56 }
 0x112   : > { %1010 = vmatpush1.bf16.msra.mxu1 %v1429_v3  ;;  %v1424_v3 = vcombine.high %v564_v61, %v568_v62 }
 0x113   : > { %1011 = vmatprep.subr.bf16.mxu1 %v1438_v11  ;;  %v1432_v11 = vcombine.high %v572_v5, %v576_v6 }
 0x116   : > { %1012 = vmatpush1.bf16.msra.mxu1 %v1437_v10  ;;  %v1425_v10 = vcombine.low %v565_v63, %v569_v0 }
 0x117   : > { %1013 = vmatprep.subr.bf16.mxu1 %v1446_v19  ;;  %v1440_v19 = vcombine.high %v580_v13, %v584_v14 }
 0x11a   : > { %1014 = vmatpush1.bf16.msra.mxu1 %v1445_v18  ;;  %v1433_v18 = vcombine.low %v573_v7, %v577_v8 }
 0x11b   : > { %1085 = vmatprep.subr.bf16.mxu1 %v1394_v27  ;;  %v1448_v27 = vcombine.high %v588_v21, %v592_v22 }
 0x1d0   : > { %v520_v30 = vpop.f32.mrb[0].mxu1 }
 0x1d1   : > { %v521_v31 = vadd.f32 %v1381_v29, %v520_v30  ;;  %v1487_v32 = vpop.f32.mrb[1].mxu1  ;;  %v1449_v30 = vcombine.low %v589_v23, %v593_v24 }
 0x1d2   : > { %v523_v33 = vpop.f32.mrb[2].mxu1 }
 0x1d3   : > { %v524_v34 = vadd.f32 %v1381_v29, %v523_v33  ;;  %v1488_v35 = vpop.f32.mrb[3].mxu1  ;;  %v527_v40 = vmax.f32 %v521_v31, 0.0  ;;  %v1447_v29 = vcombine.low %v588_v21, %v592_v22  ;;  %v596_v31 = vlaneseq }
 0x1d4   : > { %v1850_v35 = vld [vmem:[%s1904_s6] sm:$0xff] }
 0x1d5   : > { %v528_v41 = vmax.f32 %v524_v34, 0.0  ;;  %v1843_v32 = vshrl.u32 %v596_v31, 7 }
 0x1d7   : > { %v1765_v42 = vpack.c.bf16 %v528_v41, %v527_v40  ;;  %v598_v33 = vsub.s32 0, %v1843_v32  ;;  %v606_v34 = vsub.s32 2, %v1843_v32  ;;  %v602_v36 = vsub.s32 1, %v1843_v32 }
 0x1d8   : > { %v610_v37 = vsub.s32 3, %v1843_v32 }
 0x1d9   : > { %989 = vmatmul.mubr.bf16.vlgmr.msra.gmra.mrb[4].mxu0 %v1765_v42  ;;  %1032 = vmatmul.mubr.bf16.vlgmr.msra.gmra.mrb[4].mxu1 %v1765_v42  ;;  %v599_v38 = vrot.slane %v1850_v35, %v598_v33  ;;  %v607_v39 = vrot.slane %v1850_v35, %v606_v34  ;;  %v603_v40 = vrot.slane %v1850_v35, %v602_v36 }
 0x1da   : > { %1043 = vmatpush1.bf16.msra.mxu0 %v1391_v25  ;;  %1086 = vmatpush1.bf16.msra.mxu1 %v1393_v26  ;;  %v1439_v25 = vcombine.low %v580_v13, %v584_v14  ;;  %v1441_v26 = vcombine.low %v581_v15, %v585_v16  ;;  %v611_v41 = vrot.slane %v1850_v35, %v610_v37  ;;  %v1554_v13 = vmov 1966171168  }
 0x1db   : > { %1044 = vmatprep.subr.bf16.mxu0 %v1400_v43  ;;  %1087 = vmatprep.subr.bf16.mxu1 %v1402_v44  ;;  %v1219_v14 = vunpack.c.l.s4 %v1554_v13 }
 0x1dc   : > { %1074 = vmatprep.mubr.bf16.mxu0 %v1553_v28  ;;  %1117 = vmatprep.mubr.bf16.mxu1 %v1553_v28  ;;  %v1450_v28 = vcombine.high %v589_v23, %v593_v24 }
 0x1dd   : > { %v1220_v23 = vunpack.c.0.s8 %v1219_v14 }
 0x1de   : > { %1045 = vmatpush1.bf16.msra.mxu0 %v1399_v49  ;;  %1088 = vmatpush1.bf16.msra.mxu1 %v1401_v50 }
 0x1df   : > { %1046 = vmatprep.subr.bf16.mxu0 %v1408_v51  ;;  %1089 = vmatprep.subr.bf16.mxu1 %v1410_v52  ;;  %v1859_v33 = vsub.s32 %v1220_v23, %v1843_v32 }
 0x1e2   : > { %1047 = vmatpush1.bf16.msra.mxu0 %v1407_v57  ;;  %1090 = vmatpush1.bf16.msra.mxu1 %v1409_v58 }
 0x1e3   : > { %1048 = vmatprep.subr.bf16.mxu0 %v1416_v59  ;;  %1091 = vmatprep.subr.bf16.mxu1 %v1418_v60 }
 0x1e6   : > { %1049 = vmatpush1.bf16.msra.mxu0 %v1415_v1  ;;  %1092 = vmatpush1.bf16.msra.mxu1 %v1417_v2 }
 0x1e7   : > { %1050 = vmatprep.subr.bf16.mxu0 %v1424_v3  ;;  %1093 = vmatprep.subr.bf16.mxu1 %v1426_v4 }
 0x1ea   : > { %1051 = vmatpush1.bf16.msra.mxu0 %v1423_v9  ;;  %1094 = vmatpush1.bf16.msra.mxu1 %v1425_v10 }
 0x1eb   : > { %1052 = vmatprep.subr.bf16.mxu0 %v1432_v11  ;;  %1095 = vmatprep.subr.bf16.mxu1 %v1434_v12 }
 0x1ee   : > { %1053 = vmatpush1.bf16.msra.mxu0 %v1431_v17  ;;  %1096 = vmatpush1.bf16.msra.mxu1 %v1433_v18 }
 0x1ef   : > { %1054 = vmatprep.subr.bf16.mxu0 %v1440_v19  ;;  %1097 = vmatprep.subr.bf16.mxu1 %v1442_v20 }
 0x1f2   : > { %1055 = vmatpush1.bf16.msra.mxu0 %v1439_v25  ;;  %1098 = vmatpush1.bf16.msra.mxu1 %v1441_v26 }
 0x1f3   : > { %1056 = vmatprep.subr.bf16.mxu0 %v1448_v27  ;;  %1099 = vmatprep.subr.bf16.mxu1 %v1450_v28 }
 0x1f6   : > { %1057 = vmatpush1.bf16.msra.mxu0 %v1447_v29  ;;  %1100 = vmatpush1.bf16.msra.mxu1 %v1449_v30 }
 0x1f9   : > { %1075 = vmatmul.mubr.bf16.vlgmr.msra.gmra.mrb[8].mxu0 %v1765_v42  ;;  %1118 = vmatmul.mubr.bf16.vlgmr.msra.gmra.mrb[8].mxu1 %v1765_v42 }
 0x2ac   : > { %v990_v42 = vpop.f32.mrb[4].mxu0  ;;  %v1033_v43 = vpop.f32.mrb[4].mxu1 }
 0x2ad   : > { %v991_v44 = vadd.f32 %v990_v42, %v599_v38  ;;  %v1034_v45 = vadd.f32 %v1033_v43, %v607_v39  ;;  %v992_v46 = vpop.f32.mrb[5].mxu0  ;;  %v1035_v47 = vpop.f32.mrb[5].mxu1  ;;  %v618_v43 = vsub.s32 5, %v1843_v32 }
 0x2ae   : > { %v993_v48 = vadd.f32 %v992_v46, %v603_v40  ;;  %v1036_v49 = vadd.f32 %v1035_v47, %v611_v41  ;;  %v994_v50 = vpop.f32.mrb[6].mxu0  ;;  %v1037_v51 = vpop.f32.mrb[6].mxu1 }
 0x2af   : > { %v995_v52 = vadd.f32 %v994_v50, %v599_v38  ;;  %v1038_v53 = vadd.f32 %v1037_v51, %v607_v39  ;;  %v996_v54 = vpop.f32.mrb[7].mxu0  ;;  %v1039_v55 = vpop.f32.mrb[7].mxu1  ;;  %v1128_v58 = vmax.f32 %v991_v44, 0.0  ;;  %v1130_v59 = vmax.f32 %v1034_v45, 0.0 }
 0x2b0   : > { %v997_v56 = vadd.f32 %v996_v54, %v603_v40  ;;  %v1040_v57 = vadd.f32 %v1039_v55, %v611_v41  ;;  %v1129_v62 = vmax.f32 %v993_v48, 0.0  ;;  %v1131_v63 = vmax.f32 %v1036_v49, 0.0 }
 0x2b1   : > { %v1136_v60 = vmax.f32 %v995_v52, 0.0  ;;  %v1138_v61 = vmax.f32 %v1038_v53, 0.0  ;;  %v614_v40 = vsub.s32 4, %v1843_v32  ;;  %v622_v41 = vsub.s32 6, %v1843_v32 }
 0x2b2   : > { %v1137_v0 = vmax.f32 %v997_v56, 0.0  ;;  %v1139_v1 = vmax.f32 %v1040_v57, 0.0  ;;  %v626_v44 = vsub.s32 7, %v1843_v32  ;;  %v619_v47 = vrot.slane %v1850_v35, %v618_v43 }
 0x2b3   : > { %v1144_v2 = vmax.f32 %v1128_v58, %v1136_v60  ;;  %v1158_v3 = vmax.f32 %v1130_v59, %v1138_v61  ;;  %v615_v45 = vrot.slane %v1850_v35, %v614_v40  ;;  %v623_v46 = vrot.slane %v1850_v35, %v622_v41 }
 0x2b4   : > { %v1151_v4 = vmax.f32 %v1129_v62, %v1137_v0  ;;  %v1165_v5 = vmax.f32 %v1131_v63, %v1139_v1  ;;  %v627_v48 = vrot.slane %v1850_v35, %v626_v44 }
 0x2b5   : > { %v1145_v6 = vrot.slane %v1144_v2, 4  ;;  %v1159_v7 = vrot.slane %v1158_v3, 4 }
 0x2b6   : > { %v1152_v8 = vrot.slane %v1151_v4, 4  ;;  %v1166_v9 = vrot.slane %v1165_v5, 4 }
 0x2b7   : > { %v1146_v10 = vmax.f32 %v1144_v2, %v1145_v6  ;;  %v1160_v11 = vmax.f32 %v1158_v3, %v1159_v7 }
 0x2b8   : > { %v1153_v12 = vmax.f32 %v1151_v4, %v1152_v8  ;;  %v1167_v15 = vmax.f32 %v1165_v5, %v1166_v9 }
 0x2b9   : > { %v1147_v16 = vrot.slane %v1146_v10, 2  ;;  %v1161_v17 = vrot.slane %v1160_v11, 2 }
 0x2ba   : > { %v1154_v18 = vrot.slane %v1153_v12, 2  ;;  %v1168_v19 = vrot.slane %v1167_v15, 2 }
 0x2bb   : > { %v1148_v20 = vmax.f32 %v1146_v10, %v1147_v16  ;;  %v1162_v21 = vmax.f32 %v1160_v11, %v1161_v17 }
 0x2bc   : > { %v1155_v22 = vmax.f32 %v1153_v12, %v1154_v18  ;;  %v1169_v24 = vmax.f32 %v1167_v15, %v1168_v19 }
 0x2bd   : > { %v1149_v25 = vrot.slane %v1148_v20, 1  ;;  %v1163_v26 = vrot.slane %v1162_v21, 1 }
 0x2be   : > { %v1156_v27 = vrot.slane %v1155_v22, 1  ;;  %v1170_v28 = vrot.slane %v1169_v24, 1 }
 0x2bf   : > { %v1150_v29 = vmax.f32 %v1148_v20, %v1149_v25  ;;  %v1164_v30 = vmax.f32 %v1162_v21, %v1163_v26 }
 0x2c0   : > { %v1157_v31 = vmax.f32 %v1155_v22, %v1156_v27  ;;  %v1171_v34 = vmax.f32 %v1169_v24, %v1170_v28 }
 0x2c2   : > { %v1214_v36 = vcombine.low %v1150_v29, %v1157_v31  ;;  %v1215_v37 = vcombine.low %v1164_v30, %v1171_v34 }
 0x2c4   : > { %v1862_v38 = vrot.slane %v1214_v36, %v1859_v33  ;;  %v1865_v39 = vrot.slane %v1215_v37, %v1859_v33 }
 0x2c6   : > { %v1246_v42 = vcombine.low %v1862_v38, %v1865_v39 }
 0x2cc   : > { %v1076_v49 = vpop.f32.mrb[8].mxu0  ;;  %v1119_v50 = vpop.f32.mrb[8].mxu1 }
 0x2cd   : > { %v1077_v51 = vadd.f32 %v1076_v49, %v615_v45  ;;  %v1120_v52 = vadd.f32 %v1119_v50, %v623_v46  ;;  %v1078_v53 = vpop.f32.mrb[9].mxu0  ;;  %v1121_v54 = vpop.f32.mrb[9].mxu1 }
 0x2ce   : > { %v1079_v55 = vadd.f32 %v1078_v53, %v619_v47  ;;  %v1122_v56 = vadd.f32 %v1121_v54, %v627_v48  ;;  %v1080_v57 = vpop.f32.mrb[10].mxu0  ;;  %v1123_v58 = vpop.f32.mrb[10].mxu1 }
 0x2cf   : > { %v1081_v59 = vadd.f32 %v1080_v57, %v615_v45  ;;  %v1124_v32 = vadd.f32 %v1123_v58, %v623_v46  ;;  %v1082_v60 = vpop.f32.mrb[11].mxu0  ;;  %v1125_v61 = vpop.f32.mrb[11].mxu1  ;;  %v1132_v0 = vmax.f32 %v1077_v51, 0.0  ;;  %v1134_v1 = vmax.f32 %v1120_v52, 0.0 }
 0x2d0   : > { %v1083_v62 = vadd.f32 %v1082_v60, %v619_v47  ;;  %v1126_v63 = vadd.f32 %v1125_v61, %v627_v48  ;;  %v1133_v3 = vmax.f32 %v1079_v55, 0.0  ;;  %v1135_v4 = vmax.f32 %v1122_v56, 0.0 }
 0x2d1   : > { %v1140_v2 = vmax.f32 %v1081_v59, 0.0  ;;  %v1142_v35 = vmax.f32 %v1124_v32, 0.0  ;;  %v1254_v46 = vrot.slane %v1246_v42, %v1859_v33 }
 0x2d2   : > { %v1141_v5 = vmax.f32 %v1083_v62, 0.0  ;;  %v1143_v6 = vmax.f32 %v1126_v63, 0.0 }
 0x2d3   : > { %v1172_v7 = vmax.f32 %v1132_v0, %v1140_v2  ;;  %v1186_v8 = vmax.f32 %v1134_v1, %v1142_v35 }
 0x2d4   : > { %v1179_v9 = vmax.f32 %v1133_v3, %v1141_v5  ;;  %v1193_v10 = vmax.f32 %v1135_v4, %v1143_v6 }
 0x2d5   : > { %v1173_v11 = vrot.slane %v1172_v7, 4  ;;  %v1187_v12 = vrot.slane %v1186_v8, 4 }
 0x2d6   : > { %v1180_v13 = vrot.slane %v1179_v9, 4  ;;  %v1194_v14 = vrot.slane %v1193_v10, 4 }
 0x2d7   : > { %v1174_v15 = vmax.f32 %v1172_v7, %v1173_v11  ;;  %v1188_v16 = vmax.f32 %v1186_v8, %v1187_v12 }
 0x2d8   : > { %v1181_v17 = vmax.f32 %v1179_v9, %v1180_v13  ;;  %v1195_v18 = vmax.f32 %v1193_v10, %v1194_v14 }
 0x2d9   : > { %v1175_v19 = vrot.slane %v1174_v15, 2  ;;  %v1189_v20 = vrot.slane %v1188_v16, 2 }
 0x2da   : > { %v1182_v21 = vrot.slane %v1181_v17, 2  ;;  %v1196_v22 = vrot.slane %v1195_v18, 2 }
 0x2db   : > { %v1176_v23 = vmax.f32 %v1174_v15, %v1175_v19  ;;  %v1190_v24 = vmax.f32 %v1188_v16, %v1189_v20 }
 0x2dc   : > { %v1183_v25 = vmax.f32 %v1181_v17, %v1182_v21  ;;  %v1197_v26 = vmax.f32 %v1195_v18, %v1196_v22 }
 0x2dd   : > { %v1177_v27 = vrot.slane %v1176_v23, 1  ;;  %v1191_v28 = vrot.slane %v1190_v24, 1 }
 0x2de   : > { %v1184_v29 = vrot.slane %v1183_v25, 1  ;;  %v1198_v30 = vrot.slane %v1197_v26, 1 }
 0x2df   : > { %v1178_v31 = vmax.f32 %v1176_v23, %v1177_v27  ;;  %v1192_v34 = vmax.f32 %v1190_v24, %v1191_v28 }
 0x2e0   : > { %v1185_v36 = vmax.f32 %v1183_v25, %v1184_v29  ;;  %v1199_v37 = vmax.f32 %v1197_v26, %v1198_v30 }
 0x2e2   : > { %v1216_v40 = vcombine.low %v1178_v31, %v1185_v36  ;;  %v1217_v41 = vcombine.low %v1192_v34, %v1199_v37 }
 0x2e4   : > { %v1238_v43 = vrot.slane %v1216_v40, %v1859_v33  ;;  %v1245_v44 = vrot.slane %v1217_v41, %v1859_v33 }
 0x2e6   : > { %v1247_v45 = vcombine.low %v1238_v43, %v1245_v44 }
 0x2e8   : > { %v1261_v47 = vrot.slane %v1247_v45, %v1859_v33 }
 0x2ea   : > { %v1262_v48 = vcombine.low %v1254_v46, %v1261_v47 }
 0x2ec   : > { %1265 = vst [vmem:[%s348_s12] sm:$0xff] %v1262_v48 }
 0x2ed PF: > { %s17_s26 = sadd.s32 1, %s1549_s26   ;;  %s1906_s24 = smov %s1545_s25 }
 0x2ee   : > { %p14_p5 = scmp.ge.s32.totalorder %s17_s26, 4   ;;  %s1907_s25 = smov %s1909_s27 }
 0x2f0   :  { %16 = sbr.rel (!%p14_p5) target bundleno = 2 (0x2), region = 85 }

// kernel: segmentation_pointnet.9
= control target key start
LH: loop header
LB: loop body
LE: loop exit
PB: predicated region body
PF: predicated region fallthrough
CT: control target
= control target key end

     0   :  { %s1980_s30 = smov 0   ;;  %s1982_s10 = smov 0   ;;  %s2335_s0 = inlined_call_operand.vmem [shape: bf16[2,16,64], index: 0, kind: input, shape index: {}]   ;;  %s2336_s1 = inlined_call_operand.vmem [shape: bf16[2,64,512], index: 1, kind: input, shape index: {}]   ;;  %s2337_s2 = inlined_call_operand.vmem [shape: f32[2,1,512], index: 2, kind: input, shape index: {}]   ;;  %s2338_s3 = inlined_call_operand.vmem [shape: bf16[512,256], index: 3, kind: input, shape index: {}]   ;;  %s2339_s4 = inlined_call_operand.vmem [shape: f32[1,256], index: 4, kind: input, shape index: {}]   ;;  %s2340_s5 = inlined_call_operand.vmem [shape: bf16[256,128], index: 5, kind: input, shape index: {}]   ;;  %s2341_s6 = inlined_call_operand.vmem [shape: f32[1,128], index: 6, kind: input, shape index: {}]   ;;  %s2342_s7 = inlined_call_operand.vmem [shape: bf16[128,128], index: 7, kind: input, shape index: {}]   ;;  %s2343_s8 = inlined_call_operand.vmem [shape: f32[1,128], index: 8, kind: input, shape index: {}]   ;;  %s2344_s9 = inlined_call_operand.vmem [shape: bf16[2,16,128], index: 9, kind: output, shape index: {}]  }
   0x1   :  { %s1984_s11 = smov 0  }
   0x2 LB: > { %s31_s12 = sadd.s32 1, %s1921_s10  ;;  %p1541_p0 = scmp.ge.s32.totalorder %s1925_s11, 1  ;;  %s1925_s11 = sphi %s1984_s11, %s19_s11   ;;  %s1921_s10 = sphi %s1982_s10, %s2346_s10   ;;  %s1917_s30 = sphi %s1980_s30, %s2345_s30  }
   0x3   : > { %p33_p1 = scmp.ge.s32.totalorder %s31_s12, 2  ;;  %p327_p2 = scmp.lt.s32.totalorder %s1925_s11, 3 }
   0x5   : > { %s2348_s12 = smov (%p33_p1, %s31_s12), 0  ;;  %p328_p3 = pnand %p1541_p0, %p327_p2 }
   0x6   : > { %p381_p4 = scmp.lt.s32.totalorder (!%p328_p3), %s1917_s30, 1  ;;  %v1927_v0 = vmov (!%p328_p3), 0   ;;  %v1783_v1 = vld [vmem:[%s2338_s3 + $0x4] ss:$8 sps:$4 sm:$0xff] (!%p328_p3)   ;;  %v1785_v2 = vld [vmem:[%s2338_s3] ss:$8 sps:$4 sm:$0xff] (!%p328_p3)   ;;  %v430_v62 = vlaneseq (!%p328_p3) }
   0x7   : > { %331 = sbr.rel (%p328_p3) target bundleno = 984 (0x3d8), region = 56  ;;  %571 = vmatprep.mubr.bf16.mxu1 (!%p328_p3), %v1927_v0  ;;  %v1786_v3 = vld [vmem:[%s2338_s3 + $0x14] ss:$8 sps:$4 sm:$0xff] (!%p328_p3)   ;;  %1033 = vmatprep.subr.bf16.mxu0 (!%p328_p3), %v1783_v1  ;;  %v1788_v4 = vld [vmem:[%s2338_s3 + $0x10] ss:$8 sps:$4 sm:$0xff] (!%p328_p3)   ;;  %vm535_vm0 = vcmask (!%p328_p3), 523264  }
   0x8   : > { %1034 = vmatpush1.bf16.msra.mxu0 (!%p328_p3), %v1785_v2  ;;  %v1789_v5 = vld [vmem:[%s2338_s3 + $0x24] ss:$8 sps:$4 sm:$0xff] (!%p328_p3)   ;;  %v1791_v9 = vld [vmem:[%s2338_s3 + $0x20] ss:$8 sps:$4 sm:$0xff] (!%p328_p3)   ;;  %v1792_v11 = vld [vmem:[%s2338_s3 + $0x34] ss:$8 sps:$4 sm:$0xff] (!%p328_p3)  }
   0x9   : > { %1035 = vmatprep.subr.bf16.mxu0 (!%p328_p3), %v1786_v3  ;;  %v1794_v13 = vld [vmem:[%s2338_s3 + $0x30] ss:$8 sps:$4 sm:$0xff] (!%p328_p3)   ;;  %v1795_v18 = vld [vmem:[%s2338_s3 + $0x44] ss:$8 sps:$4 sm:$0xff] (!%p328_p3)   ;;  %v1797_v19 = vld [vmem:[%s2338_s3 + $0x40] ss:$8 sps:$4 sm:$0xff] (!%p328_p3)  }
   0xa   : > { %v1798_v21 = vld [vmem:[%s2338_s3 + $0x54] ss:$8 sps:$4 sm:$0xff] (!%p328_p3)   ;;  %v1800_v23 = vld [vmem:[%s2338_s3 + $0x50] ss:$8 sps:$4 sm:$0xff] (!%p328_p3)   ;;  %v1801_v25 = vld [vmem:[%s2338_s3 + $0x64] ss:$8 sps:$4 sm:$0xff] (!%p328_p3)  }
   0xb   : > { %v1803_v27 = vld [vmem:[%s2338_s3 + $0x60] ss:$8 sps:$4 sm:$0xff] (!%p328_p3)   ;;  %v1804_v28 = vld [vmem:[%s2338_s3 + $0x74] ss:$8 sps:$4 sm:$0xff] (!%p328_p3)   ;;  %v1806_v31 = vld [vmem:[%s2338_s3 + $0x70] ss:$8 sps:$4 sm:$0xff] (!%p328_p3)  }
   0xc   : > { %1036 = vmatpush1.bf16.msra.mxu0 (!%p328_p3), %v1788_v4  ;;  %v1807_v32 = vld [vmem:[%s2338_s3 + $0x84] ss:$8 sps:$4 sm:$0xff] (!%p328_p3)   ;;  %v1809_v34 = vld [vmem:[%s2338_s3 + $0x80] ss:$8 sps:$4 sm:$0xff] (!%p328_p3)   ;;  %v1810_v36 = vld [vmem:[%s2338_s3 + $0x94] ss:$8 sps:$4 sm:$0xff] (!%p328_p3)  }
   0xd   : > { %1037 = vmatprep.subr.bf16.mxu0 (!%p328_p3), %v1789_v5  ;;  %v1812_v37 = vld [vmem:[%s2338_s3 + $0x90] ss:$8 sps:$4 sm:$0xff] (!%p328_p3)   ;;  %v1813_v38 = vld [vmem:[%s2338_s3 + $0xa4] ss:$8 sps:$4 sm:$0xff] (!%p328_p3)   ;;  %v1815_v39 = vld [vmem:[%s2338_s3 + $0xa0] ss:$8 sps:$4 sm:$0xff] (!%p328_p3)  }
   0xe   : > { %s2350_s30 = smov (!%p381_p4, %s1917_s30), 1  ;;  %v1816_v40 = vld [vmem:[%s2338_s3 + $0xb4] ss:$8 sps:$4 sm:$0xff]   ;;  %v1818_v41 = vld [vmem:[%s2338_s3 + $0xb0] ss:$8 sps:$4 sm:$0xff]   ;;  %v1879_v51 = vld [vmem:[%s2340_s5 + $0x40] sm:$0xff]  }
   0xf   : > { %s1663_s19 = sshll.u32 %s2350_s30, 7  ;;  %s1662_s27 = sshll.u32 %s2350_s30, 3  ;;  %v1819_v42 = vld [vmem:[%s2338_s3 + $0xc4] ss:$8 sps:$4 sm:$0xff]   ;;  %v1821_v43 = vld [vmem:[%s2338_s3 + $0xc0] ss:$8 sps:$4 sm:$0xff]  }
  0x10   : > { %s2016_s24 = scalar_lea.vmem %s2336_s1, %s1663_s19  ;;  %s388_s17 = scalar_lea.vmem %s2335_s0, %s1662_s27  ;;  %1038 = vmatpush1.bf16.msra.mxu0 %v1791_v9  ;;  %v1822_v44 = vld [vmem:[%s2338_s3 + $0xd4] ss:$8 sps:$4 sm:$0xff]   ;;  %v1824_v45 = vld [vmem:[%s2338_s3 + $0xd0] ss:$8 sps:$4 sm:$0xff]   ;;  %v1825_v46 = vld [vmem:[%s2338_s3 + $0xe4] ss:$8 sps:$4 sm:$0xff]  }
  0x11   : > { %v1758_v6 = vld [vmem:[%s2016_s24 + $0x4] ss:$16 sps:$4 sm:$0xff]   ;;  %v1760_v7 = vld [vmem:[%s2016_s24] ss:$16 sps:$4 sm:$0xff]   ;;  %1039 = vmatprep.subr.bf16.mxu0 %v1792_v11  ;;  %v1773_v17 = vld [vmem:[%s2016_s24 + $0xc] ss:$16 sps:$4 sm:$0xff]  }
  0x12   : > { %539 = vmatprep.subr.bf16.mxu1 %v1758_v6  ;;  %v1761_v8 = vld [vmem:[%s2016_s24 + $0x24] ss:$16 sps:$4 sm:$0xff]   ;;  %v1763_v10 = vld [vmem:[%s2016_s24 + $0x20] ss:$16 sps:$4 sm:$0xff]   ;;  %v1771_v22 = vld [vmem:[%s2016_s24 + $0x8] ss:$16 sps:$4 sm:$0xff]  }
  0x13   : > { %540 = vmatpush1.bf16.msra.mxu1 %v1760_v7  ;;  %v1764_v12 = vld [vmem:[%s2016_s24 + $0x44] ss:$16 sps:$4 sm:$0xff]   ;;  %v1766_v14 = vld [vmem:[%s2016_s24 + $0x40] ss:$16 sps:$4 sm:$0xff]   ;;  %v1776_v24 = vld [vmem:[%s2016_s24 + $0x2c] ss:$16 sps:$4 sm:$0xff]  }
  0x14   : > { %541 = vmatprep.subr.bf16.mxu1 %v1761_v8  ;;  %v1767_v15 = vld [vmem:[%s2016_s24 + $0x64] ss:$16 sps:$4 sm:$0xff]   ;;  %1040 = vmatpush1.bf16.msra.mxu0 %v1794_v13  ;;  %v1769_v16 = vld [vmem:[%s2016_s24 + $0x60] ss:$16 sps:$4 sm:$0xff]   ;;  %v1774_v26 = vld [vmem:[%s2016_s24 + $0x28] ss:$16 sps:$4 sm:$0xff]  }
  0x15   : > { %v1770_v20 = vld [vmem:[%s388_s17] sm:$0xff]   ;;  %1041 = vmatprep.subr.bf16.mxu0 %v1795_v18  ;;  %v1779_v29 = vld [vmem:[%s2016_s24 + $0x4c] ss:$16 sps:$4 sm:$0xff]   ;;  %v1777_v30 = vld [vmem:[%s2016_s24 + $0x48] ss:$16 sps:$4 sm:$0xff]   ;;  %s1546_s14 = sshll.u32 %s2350_s30, 2  ;;  %s407_s17 = scalar_lea.vmem %s2344_s9, %s1662_s27 }
  0x16   : > { %v1782_v33 = vld [vmem:[%s2016_s24 + $0x6c] ss:$16 sps:$4 sm:$0xff]   ;;  %v1780_v35 = vld [vmem:[%s2016_s24 + $0x68] ss:$16 sps:$4 sm:$0xff]   ;;  %v1880_v52 = vld [vmem:[%s2340_s5] sm:$0xff]   ;;  %v2163_v63 = vshrl.u32 %v430_v62, 7  ;;  %s398_s16 = scalar_lea.vmem %s2337_s2, %s1546_s14 }
  0x17   : > { %542 = vmatpush1.bf16.msra.mxu1 %v1763_v10  ;;  %v1827_v47 = vld [vmem:[%s2338_s3 + $0xe0] ss:$8 sps:$4 sm:$0xff]   ;;  %v1828_v48 = vld [vmem:[%s2338_s3 + $0xf4] ss:$8 sps:$4 sm:$0xff]   ;;  %v1830_v49 = vld [vmem:[%s2338_s3 + $0xf0] ss:$8 sps:$4 sm:$0xff]  }
  0x18   : > { %543 = vmatprep.subr.bf16.mxu1 %v1764_v12  ;;  %1042 = vmatpush1.bf16.msra.mxu0 %v1797_v19  ;;  %v1833_v50 = vld [vmem:[%s2338_s3 + $0x104] ss:$8 sps:$4 sm:$0xff]   ;;  %v1883_v55 = vld [vmem:[%s2340_s5 + $0x50] sm:$0xff]   ;;  %v1885_v57 = vld [vmem:[%s2340_s5 + $0x58] sm:$0xff]   ;;  %v436_v2 = vsub.s32 1, %v2163_v63  ;;  %vm1929_vm1 = vmmov 0  }
  0x19   : > { %1043 = vmatprep.subr.bf16.mxu0 %v1798_v21  ;;  %v1881_v53 = vld [vmem:[%s2340_s5 + $0x48] sm:$0xff]   ;;  %v1884_v56 = vld [vmem:[%s2340_s5 + $0x10] sm:$0xff]   ;;  %v1886_v58 = vld [vmem:[%s2340_s5 + $0x18] sm:$0xff]   ;;  %v440_v21 = vsub.s32 2, %v2163_v63 }
  0x1a   : > { %v1882_v54 = vld [vmem:[%s2340_s5 + $0x8] sm:$0xff]   ;;  %v1887_v59 = vld [vmem:[%s2340_s5 + $0x60] sm:$0xff]   ;;  %v1872_v62 = vld [vmem:[%s2338_s3 + $0x1d4] ss:$8 sps:$4 sm:$0xff]  }
  0x1b   : > { %544 = vmatpush1.bf16.msra.mxu1 %v1766_v14  ;;  %v1888_v60 = vld [vmem:[%s2340_s5 + $0x20] sm:$0xff]   ;;  %v1889_v61 = vld [vmem:[%s2340_s5 + $0x68] sm:$0xff]  }
  0x1c   : > { %545 = vmatprep.subr.bf16.mxu1 %v1767_v15  ;;  %1044 = vmatpush1.bf16.msra.mxu0 %v1800_v23  ;;  %v428_v1 = vld [vmem:[%s398_s16] sm:$0xf]  ;;  %v1834_v23 = vld [vmem:[%s2338_s3 + $0x110] ss:$8 sps:$4 sm:$0xff]  }
  0x1d   : > { %1045 = vmatprep.subr.bf16.mxu0 %v1801_v25  ;;  %v437_v4 = vrot.slane %v428_v1, %v436_v2  ;;  %v1831_v19 = vld [vmem:[%s2338_s3 + $0x100] ss:$8 sps:$4 sm:$0xff]   ;;  %v441_v25 = vrot.slane %v428_v1, %v440_v21 }
  0x1f   : > { %546 = vmatpush1.bf16.msra.mxu1 %v1769_v16 }
  0x20   : > { %582 = vmatprep.subr.bf16.mxu1 %v1773_v17  ;;  %1046 = vmatpush1.bf16.msra.mxu0 %v1803_v27  ;;  %v1837_v27 = vld [vmem:[%s2338_s3 + $0x120] ss:$8 sps:$4 sm:$0xff]  }
  0x21   : > { %1047 = vmatprep.subr.bf16.mxu0 %v1804_v28 }
  0x22   : > { %1566 = vmatmul.mubr.msk.bf16.vlgmr.msra.gmra.mrb[0].mxu1 %vm535_vm0, %v1770_v20 }
  0x23   : > { %583 = vmatpush1.bf16.msra.mxu1 %v1771_v22  ;;  %614 = vmatprep.mubr.bf16.mxu1 %v1927_v0  ;;  %v432_v0 = vsub.s32 0, %v2163_v63  ;;  %v444_v22 = vsub.s32 3, %v2163_v63  ;;  %v1896_v63 = vld [vmem:[%s2342_s7 + $0x8] sm:$0xff]  }
  0x24   : > { %584 = vmatprep.subr.bf16.mxu1 %v1776_v24  ;;  %1048 = vmatpush1.bf16.msra.mxu0 %v1806_v31  ;;  %v1839_v24 = vld [vmem:[%s2338_s3 + $0x124] ss:$8 sps:$4 sm:$0xff]  }
  0x25   : > { %1049 = vmatprep.subr.bf16.mxu0 %v1807_v32  ;;  %v433_v3 = vrot.slane %v428_v1, %v432_v0 }
  0x27   : > { %585 = vmatpush1.bf16.msra.mxu1 %v1774_v26  ;;  %v445_v26 = vrot.slane %v428_v1, %v444_v22  ;;  %v1870_v1 = vld [vmem:[%s2338_s3 + $0x1d0] ss:$8 sps:$4 sm:$0xff]  }
  0x28   : > { %586 = vmatprep.subr.bf16.mxu1 %v1779_v29  ;;  %1050 = vmatpush1.bf16.msra.mxu0 %v1809_v34  ;;  %v1842_v29 = vld [vmem:[%s2338_s3 + $0x134] ss:$8 sps:$4 sm:$0xff]  }
  0x29   : > { %1051 = vmatprep.subr.bf16.mxu0 %v1810_v36 }
  0x2b   : > { %587 = vmatpush1.bf16.msra.mxu1 %v1777_v30 }
  0x2c   : > { %588 = vmatprep.subr.bf16.mxu1 %v1782_v33  ;;  %1052 = vmatpush1.bf16.msra.mxu0 %v1812_v37  ;;  %v1840_v37 = vld [vmem:[%s2338_s3 + $0x130] ss:$8 sps:$4 sm:$0xff]  }
  0x2d   : > { %1053 = vmatprep.subr.bf16.mxu0 %v1813_v38 }
  0x2f   : > { %589 = vmatpush1.bf16.msra.mxu1 %v1780_v35 }
  0x30   : > { %1054 = vmatpush1.bf16.msra.mxu0 %v1815_v39  ;;  %1672 = vmatprep.subr.bf16.mxu1 %v1879_v51  ;;  %v1852_v51 = vld [vmem:[%s2338_s3 + $0x170] ss:$8 sps:$4 sm:$0xff]  }
  0x31   : > { %1055 = vmatprep.subr.bf16.mxu0 %v1816_v40  ;;  %v1845_v40 = vld [vmem:[%s2338_s3 + $0x144] ss:$8 sps:$4 sm:$0xff]  }
  0x32   : > { %1567 = vmatmul.mubr.msk.bf16.vlgmr.msra.gmra.mrb[4].mxu1 %vm535_vm0, %v1770_v20  ;;  %v1836_v20 = vld [vmem:[%s2338_s3 + $0x114] ss:$8 sps:$4 sm:$0xff]  }
  0x33   : > { %1673 = vmatpush3.bf16.msra.mxu1 %v1880_v52  ;;  %v1857_v52 = vld [vmem:[%s2338_s3 + $0x184] ss:$8 sps:$4 sm:$0xff]  }
  0x34   : > { %1056 = vmatpush1.bf16.msra.mxu0 %v1818_v41  ;;  %1674 = vmatprep.subr.bf16.mxu1 %v1881_v53  ;;  %v1855_v53 = vld [vmem:[%s2338_s3 + $0x180] ss:$8 sps:$4 sm:$0xff]  }
  0x35   : > { %1057 = vmatprep.subr.bf16.mxu0 %v1819_v42 }
  0x37   : > { %1675 = vmatpush3.bf16.msra.mxu1 %v1882_v54  ;;  %v1860_v54 = vld [vmem:[%s2338_s3 + $0x194] ss:$8 sps:$4 sm:$0xff]  }
  0x38   : > { %1058 = vmatpush1.bf16.msra.mxu0 %v1821_v43  ;;  %1676 = vmatprep.subr.bf16.mxu1 %v1883_v55  ;;  %v1858_v55 = vld [vmem:[%s2338_s3 + $0x190] ss:$8 sps:$4 sm:$0xff]  }
  0x39   : > { %1059 = vmatprep.subr.bf16.mxu0 %v1822_v44  ;;  %v1843_v44 = vld [vmem:[%s2338_s3 + $0x140] ss:$8 sps:$4 sm:$0xff]  }
  0x3b   : > { %1677 = vmatpush3.bf16.msra.mxu1 %v1884_v56  ;;  %v1863_v56 = vld [vmem:[%s2338_s3 + $0x1a4] ss:$8 sps:$4 sm:$0xff]  }
  0x3c   : > { %1060 = vmatpush1.bf16.msra.mxu0 %v1824_v45  ;;  %1678 = vmatprep.subr.bf16.mxu1 %v1885_v57  ;;  %v1861_v57 = vld [vmem:[%s2338_s3 + $0x1a0] ss:$8 sps:$4 sm:$0xff]  }
  0x3d   : > { %1061 = vmatprep.subr.bf16.mxu0 %v1825_v46  ;;  %v1848_v46 = vld [vmem:[%s2338_s3 + $0x154] ss:$8 sps:$4 sm:$0xff]  }
  0x3f   : > { %1679 = vmatpush3.bf16.msra.mxu1 %v1886_v58  ;;  %v1866_v58 = vld [vmem:[%s2338_s3 + $0x1b4] ss:$8 sps:$4 sm:$0xff]  }
  0x40   : > { %1062 = vmatpush1.bf16.msra.mxu0 %v1827_v47  ;;  %1680 = vmatprep.subr.bf16.mxu1 %v1887_v59  ;;  %v1846_v47 = vld [vmem:[%s2338_s3 + $0x150] ss:$8 sps:$4 sm:$0xff]  }
  0x41   : > { %1063 = vmatprep.subr.bf16.mxu0 %v1828_v48  ;;  %v1851_v48 = vld [vmem:[%s2338_s3 + $0x164] ss:$8 sps:$4 sm:$0xff]   ;;  %v1864_v59 = vld [vmem:[%s2338_s3 + $0x1b0] ss:$8 sps:$4 sm:$0xff]  }
  0x43   : > { %1681 = vmatpush3.bf16.msra.mxu1 %v1888_v60  ;;  %v1869_v60 = vld [vmem:[%s2338_s3 + $0x1c4] ss:$8 sps:$4 sm:$0xff]  }
  0x44   : > { %1064 = vmatpush1.bf16.msra.mxu0 %v1830_v49  ;;  %1682 = vmatprep.subr.bf16.mxu1 %v1889_v61  ;;  %v1849_v49 = vld [vmem:[%s2338_s3 + $0x160] ss:$8 sps:$4 sm:$0xff]  }
  0x45   : > { %1076 = vmatprep.subr.bf16.mxu0 %v1833_v50  ;;  %v1854_v50 = vld [vmem:[%s2338_s3 + $0x174] ss:$8 sps:$4 sm:$0xff]   ;;  %v1867_v61 = vld [vmem:[%s2338_s3 + $0x1c0] ss:$8 sps:$4 sm:$0xff]  }
  0xf5   : > { %v573_v5 = vpop.f32.mrb[0].mxu1 }
  0xf6   : > { %v574_v6 = vadd.f32 %v573_v5, %v433_v3  ;;  %v575_v7 = vpop.f32.mrb[1].mxu1  ;;  %v1878_v5 = vld [vmem:[%s2338_s3 + $0x1f4] ss:$8 sps:$4 sm:$0xff]  }
  0xf7   : > { %v576_v8 = vadd.f32 %v575_v7, %v437_v4  ;;  %v577_v9 = vpop.f32.mrb[2].mxu1  ;;  %v1890_v7 = vld [vmem:[%s2340_s5 + $0x28] sm:$0xff]  }
  0xf8   : > { %v578_v10 = vadd.f32 %v577_v9, %v433_v3  ;;  %v579_v11 = vpop.f32.mrb[3].mxu1  ;;  %v625_v13 = vmax.f32 %v574_v6, 0.0  ;;  %v1875_v3 = vld [vmem:[%s2338_s3 + $0x1e4] ss:$8 sps:$4 sm:$0xff]   ;;  %v1876_v6 = vld [vmem:[%s2338_s3 + $0x1f0] ss:$8 sps:$4 sm:$0xff]   ;;  %1683 = vmatpush3.bf16.msra.mxu1 %v1890_v7 }
  0xf9   : > { %v580_v12 = vadd.f32 %v579_v11, %v437_v4  ;;  %v626_v15 = vmax.f32 %v576_v8, 0.0  ;;  %v1873_v4 = vld [vmem:[%s2338_s3 + $0x1e0] ss:$8 sps:$4 sm:$0xff]   ;;  %v1891_v8 = vld [vmem:[%s2340_s5 + $0x70] sm:$0xff]   ;;  %v1894_v11 = vld [vmem:[%s2340_s5 + $0x38] sm:$0xff]  }
  0xfa   : > { %v629_v14 = vmax.f32 %v578_v10, 0.0  ;;  %v1892_v9 = vld [vmem:[%s2340_s5 + $0x30] sm:$0xff]   ;;  %1684 = vmatprep.subr.bf16.mxu1 %v1891_v8  ;;  %v1893_v10 = vld [vmem:[%s2340_s5 + $0x78] sm:$0xff]  }
  0xfb   : > { %v630_v16 = vmax.f32 %v580_v12, 0.0  ;;  %v1928_v12 = vmov 0.0  }
  0xfc   : > { %v633_v17 = vpack.c.bf16 %v629_v14, %v625_v13  ;;  %1685 = vmatpush3.bf16.msra.mxu1 %v1892_v9  ;;  %v701_v13 = vld [vmem:[%s2339_s4] sm:$0x3] }
  0xfd   : > { %v634_v18 = vpack.c.bf16 %v630_v16, %v626_v15  ;;  %1686 = vmatprep.subr.bf16.mxu1 %v1893_v10  ;;  %v706_v14 = vrot.slane %v701_v13, %v432_v0  ;;  %v710_v15 = vrot.slane %v701_v13, %v436_v2  ;;  %v1895_v0 = vld [vmem:[%s2342_s7] sm:$0xff]   ;;  %v1897_v2 = vld [vmem:[%s2342_s7 + $0x10] sm:$0xff]  }
  0xff   : > { %1065 = vmatprep.mubr.bf16.mxu0 %v634_v18 }
 0x100   : > { %1066 = vmatmul.mubr.bf16.vlgmr.msra.gmra.mrb[0].mxu0 %v633_v17  ;;  %1687 = vmatpush3.bf16.msra.mxu1 %v1894_v11 }
 0x101   : > { %1077 = vmatpush1.bf16.msra.mxu0 %v1831_v19  ;;  %1703 = vmatprep.subr.bf16.mxu1 %v1928_v12 }
 0x102   : > { %1078 = vmatprep.subr.bf16.mxu0 %v1836_v20 }
 0x105   : > { %1079 = vmatpush1.bf16.msra.mxu0 %v1834_v23  ;;  %v616_v28 = vpop.f32.mrb[4].mxu1 }
 0x106   : > { %1080 = vmatprep.subr.bf16.mxu0 %v1839_v24  ;;  %v617_v30 = vadd.f32 %v616_v28, %v441_v25  ;;  %v618_v31 = vpop.f32.mrb[5].mxu1 }
 0x107   : > { %v619_v32 = vadd.f32 %v618_v31, %v445_v26  ;;  %v620_v33 = vpop.f32.mrb[6].mxu1  ;;  %v1899_v31 = vld [vmem:[%s2342_s7 + $0x20] sm:$0xff]  }
 0x108   : > { %v627_v34 = vmax.f32 %v617_v30, 0.0  ;;  %v621_v35 = vadd.f32 %v620_v33, %v441_v25  ;;  %v622_v36 = vpop.f32.mrb[7].mxu1  ;;  %v1898_v30 = vld [vmem:[%s2342_s7 + $0x18] sm:$0xff]   ;;  %v1901_v33 = vld [vmem:[%s2342_s7 + $0x30] sm:$0xff]  }
 0x109   : > { %1081 = vmatpush1.bf16.msra.mxu0 %v1837_v27  ;;  %v628_v38 = vmax.f32 %v619_v32, 0.0  ;;  %v623_v39 = vadd.f32 %v622_v36, %v445_v26  ;;  %v1900_v32 = vld [vmem:[%s2342_s7 + $0x28] sm:$0xff]   ;;  %v1632_v36 = vld [vmem:[%s2341_s6] ss:$0 sm:$0xff] }
 0x10a   : > { %1082 = vmatprep.subr.bf16.mxu0 %v1842_v29  ;;  %v631_v41 = vmax.f32 %v621_v35, 0.0 }
 0x10b   : > { %v632_v42 = vmax.f32 %v623_v39, 0.0 }
 0x10c   : > { %v635_v43 = vpack.c.bf16 %v631_v41, %v627_v34  ;;  %v1902_v34 = vld [vmem:[%s2342_s7 + $0x38] sm:$0xff]  }
 0x10d   : > { %1083 = vmatpush1.bf16.msra.mxu0 %v1840_v37  ;;  %v636_v45 = vpack.c.bf16 %v632_v42, %v628_v38 }
 0x10e   : > { %1084 = vmatprep.subr.bf16.mxu0 %v1845_v40 }
 0x10f   : > { %1108 = vmatprep.mubr.bf16.mxu0 %v636_v45 }
 0x111   : > { %1085 = vmatpush1.bf16.msra.mxu0 %v1843_v44 }
 0x112   : > { %1086 = vmatprep.subr.bf16.mxu0 %v1848_v46 }
 0x115   : > { %1087 = vmatpush1.bf16.msra.mxu0 %v1846_v47  ;;  %v1649_v47 = vld [vmem:[%s2343_s8] ss:$0 sm:$0xff] }
 0x116   : > { %1088 = vmatprep.subr.bf16.mxu0 %v1851_v48 }
 0x119   : > { %1089 = vmatpush1.bf16.msra.mxu0 %v1849_v49 }
 0x11a   : > { %1090 = vmatprep.subr.bf16.mxu0 %v1854_v50 }
 0x11d   : > { %1091 = vmatpush1.bf16.msra.mxu0 %v1852_v51 }
 0x11e   : > { %1092 = vmatprep.subr.bf16.mxu0 %v1857_v52 }
 0x121   : > { %1093 = vmatpush1.bf16.msra.mxu0 %v1855_v53 }
 0x122   : > { %1094 = vmatprep.subr.bf16.mxu0 %v1860_v54 }
 0x125   : > { %1095 = vmatpush1.bf16.msra.mxu0 %v1858_v55 }
 0x126   : > { %1096 = vmatprep.subr.bf16.mxu0 %v1863_v56 }
 0x129   : > { %1097 = vmatpush1.bf16.msra.mxu0 %v1861_v57 }
 0x12a   : > { %1098 = vmatprep.subr.bf16.mxu0 %v1866_v58 }
 0x12d   : > { %1099 = vmatpush1.bf16.msra.mxu0 %v1864_v59 }
 0x12e   : > { %1100 = vmatprep.subr.bf16.mxu0 %v1869_v60 }
 0x131   : > { %1101 = vmatpush1.bf16.msra.mxu0 %v1867_v61 }
 0x132   : > { %1102 = vmatprep.subr.bf16.mxu0 %v1872_v62 }
 0x135   : > { %1103 = vmatpush1.bf16.msra.mxu0 %v1870_v1 }
 0x136   : > { %1104 = vmatprep.subr.bf16.mxu0 %v1875_v3 }
 0x139   : > { %1105 = vmatpush1.bf16.msra.mxu0 %v1873_v4 }
 0x13a   : > { %1106 = vmatprep.subr.bf16.mxu0 %v1878_v5 }
 0x13d   : > { %1107 = vmatpush1.bf16.msra.mxu0 %v1876_v6 }
 0x140   : > { %1109 = vmatmul.mubr.bf16.vlgmr.msra.gmra.mrb[0].mxu0 %v635_v43 }
 0x213   : > { %v1110_v16 = vpop.f32.mrb[0].mxu0 }
 0x214   : > { %v1723_v17 = vadd.f32 %v1110_v16, %v706_v14  ;;  %v1112_v18 = vpop.f32.mrb[1].mxu0 }
 0x215   : > { %v1724_v19 = vadd.f32 %v1112_v18, %v710_v15  ;;  %v1114_v20 = vpop.f32.mrb[2].mxu0 }
 0x216   : > { %v1725_v21 = vadd.f32 %v1114_v20, %v706_v14  ;;  %v1116_v22 = vpop.f32.mrb[3].mxu0  ;;  %v1119_v24 = vmax.f32 %v1723_v17, 0.0 }
 0x217   : > { %v1726_v23 = vadd.f32 %v1116_v22, %v710_v15  ;;  %v1120_v26 = vmax.f32 %v1724_v19, 0.0 }
 0x218   : > { %v1121_v25 = vmax.f32 %v1725_v21, 0.0 }
 0x219   : > { %v1122_v27 = vmax.f32 %v1726_v23, 0.0 }
 0x21a   : > { %v1123_v28 = vpack.c.bf16 %v1121_v25, %v1119_v24 }
 0x21b   : > { %v1124_v29 = vpack.c.bf16 %v1122_v27, %v1120_v26 }
 0x21d   : > { %1292 = vmatprep.mubr.bf16.mxu1 %v1124_v29 }
 0x21e   : > { %1293 = vmatmul.mubr.bf16.vlgmr.msra.gmra.mrb[8].mxu1 %v1123_v28 }
 0x21f   : > { %1704 = vmatpush3.bf16.msra.mxu1 %v1895_v0  ;;  %1719 = vmatprep.mubr.msk.bf16.mxu1 %vm1929_vm1, %v1928_v12 }
 0x220   : > { %1705 = vmatprep.subr.bf16.mxu1 %v1928_v12 }
 0x223   : > { %1706 = vmatpush3.bf16.msra.mxu1 %v1896_v63 }
 0x224   : > { %1707 = vmatprep.subr.bf16.mxu1 %v1928_v12 }
 0x227   : > { %1708 = vmatpush3.bf16.msra.mxu1 %v1897_v2 }
 0x228   : > { %1709 = vmatprep.subr.bf16.mxu1 %v1928_v12 }
 0x22b   : > { %1710 = vmatpush3.bf16.msra.mxu1 %v1898_v30 }
 0x22c   : > { %1711 = vmatprep.subr.bf16.mxu1 %v1928_v12 }
 0x22f   : > { %1712 = vmatpush3.bf16.msra.mxu1 %v1899_v31 }
 0x230   : > { %1713 = vmatprep.subr.bf16.mxu1 %v1928_v12 }
 0x233   : > { %1714 = vmatpush3.bf16.msra.mxu1 %v1900_v32 }
 0x234   : > { %1715 = vmatprep.subr.bf16.mxu1 %v1928_v12 }
 0x237   : > { %1716 = vmatpush3.bf16.msra.mxu1 %v1901_v33 }
 0x238   : > { %1717 = vmatprep.subr.bf16.mxu1 %v1928_v12 }
 0x23b   : > { %1718 = vmatpush3.bf16.msra.mxu1 %v1902_v34 }
 0x2f1   : > { %v1688_v35 = vpop.f32.mrb[8].mxu1 }
 0x2f2   : > { %v1689_v37 = vpop.f32.mrb[9].mxu1 }
 0x2f3   : > { %v1690_v38 = vadd.f32 %v1689_v37, %v1688_v35  ;;  %v1691_v39 = vpop.f32.mrb[10].mxu1 }
 0x2f4   : > { %v1692_v40 = vpop.f32.mrb[11].mxu1 }
 0x2f5   : > { %v1295_v41 = vadd.f32 %v1690_v38, %v1632_v36  ;;  %v1693_v42 = vadd.f32 %v1692_v40, %v1691_v39 }
 0x2f7   : > { %v1298_v43 = vadd.f32 %v1693_v42, %v1632_v36  ;;  %v1301_v44 = vmax.f32 %v1295_v41, 0.0 }
 0x2f9   : > { %v1302_v45 = vmax.f32 %v1298_v43, 0.0 }
 0x2fb   : > { %v1303_v46 = vpack.c.bf16 %v1302_v45, %v1301_v44 }
 0x2fd   : > { %1720 = vmatmul.mubr.bf16.vlgmr.msra.gmra.mrb[12].mxu1 %v1303_v46 }
 0x3d0   : > { %v1409_v48 = vpop.f32.mrb[12].mxu1 }
 0x3d1   : > { %v1721_v49 = vpop.f32.mrb[13].mxu1  ;;  %v1410_v51 = vadd.f32 %v1649_v47, %v1409_v48 }
 0x3d2   : > { %v1412_v50 = vpop.f32.mrb[14].mxu1 }
 0x3d3   : > { %v1413_v52 = vadd.f32 %v1649_v47, %v1412_v50  ;;  %v1722_v53 = vpop.f32.mrb[15].mxu1 }
 0x3d5   : > { %v1670_v54 = vpack.c.bf16 %v1413_v52, %v1410_v51 }
 0x3d7   : > { %1671 = vst [vmem:[%s407_s17] sm:$0xff] %v1670_v54  }
 0x3d8 PF: > { %s19_s11 = sadd.s32 1, %s1925_s11   ;;  %s2345_s30 = smov %s1921_s10 }
 0x3d9   : > { %p16_p5 = scmp.ge.s32.totalorder %s19_s11, 4   ;;  %s2346_s10 = smov %s2348_s12 }
 0x3db   :  { %18 = sbr.rel (!%p16_p5) target bundleno = 2 (0x2), region = 92 }

</bundles_post_ra>
